<compile_context>
chip_gen: v7x
topology: tpu7x:2x2x1
jax: 0.10.0
libtpu: 0.0.40
codegen_flags: <defaults>
</compile_context>

<pallas_src>
import functools
import math

import jax
import jax.numpy as jnp
from jax import lax
from jax.experimental import pallas as pl
from jax.experimental.pallas import tpu as pltpu

NUM_HEADS = 4
LN_EPS = 1e-5
NORM_EPS = 1e-12
NEG_INF = -1e9


# ----------------------------- kernel helpers ------------------------------

def _layer_norm(x, g, b):
    mu = jnp.mean(x, axis=-1, keepdims=True)
    var = jnp.mean((x - mu) ** 2, axis=-1, keepdims=True)
    return (x - mu) * lax.rsqrt(var + LN_EPS) * g + b


def _l2_normalize(x):
    n2 = jnp.sum(x * x, axis=-1, keepdims=True)
    return x * lax.rsqrt(jnp.maximum(n2, NORM_EPS * NORM_EPS))


# ------------------------------ fused kernel -------------------------------

def fused_branch_kernel(mask_ref, x_ref, pw_ref, pb_ref,
                        wq_ref, bq_ref, wk_ref, bk_ref, wv_ref, bv_ref,
                        wo_ref, bo_ref, ln1g_ref, ln1b_ref,
                        w1_ref, b1_ref, w2_ref, b2_ref,
                        ln2g_ref, ln2b_ref,
                        seq_ref, aggr_ref,
                        x_scr,
                        *, n_stage1):
    """Grid = (batch, layer).  One transformer layer per grid step.

    mask_ref : (1, 1, S)  additive key-padding mask for this batch element
    x_ref    : (1, S, Din) raw features/captions for this batch element
    pw/pb    : input projection (Din, E) / (1, E)
    w*_ref   : this layer's weights (leading stacked-layer dim of size 1)
    x_scr    : (S, E) VMEM scratch carrying the activation across layers
    """
    l = pl.program_id(1)
    n_layers = pl.num_programs(1)
    H = wq_ref.shape[1]
    hd = wq_ref.shape[3]
    S = x_scr.shape[0]
    E = x_scr.shape[1]
    scale = 1.0 / math.sqrt(hd)

    # Input projection (cap_proj / img_proj) once per batch element.
    @pl.when(l == 0)
    def _():
        x_scr[...] = (jnp.dot(x_ref[0], pw_ref[...],
                              preferred_element_type=jnp.float32)
                      + pb_ref[...])

    # TODO(synk): dropout layers are treated as identity (eval-mode
    # semantics); the .detach() between the two stacks is a forward no-op.
    x = x_scr[...]                                           # (S, E)
    xh = jnp.broadcast_to(x[None], (H, S, E))                # (H, S, E)

    # Head-batched QKV projections (no column slicing / stacking).
    q = jnp.einsum('hse,hed->hsd', xh, wq_ref[0],
                   preferred_element_type=jnp.float32) + bq_ref[0]
    k = jnp.einsum('hse,hed->hsd', xh, wk_ref[0],
                   preferred_element_type=jnp.float32) + bk_ref[0]
    v = jnp.einsum('hse,hed->hsd', xh, wv_ref[0],
                   preferred_element_type=jnp.float32) + bv_ref[0]

    s = jnp.einsum('hsd,htd->hst', q, k,
                   preferred_element_type=jnp.float32) * scale
    # Key-padding mask applies only in the first (masked) transformer stack.
    gate = jnp.where(l < n_stage1, 1.0, 0.0)
    s = s + mask_ref[...] * gate                             # (1,1,S) bcast
    s = s - jnp.max(s, axis=-1, keepdims=True)
    p = jnp.exp(s)
    p = p / jnp.sum(p, axis=-1, keepdims=True)

    o = jnp.einsum('hst,htd->hsd', p, v,
                   preferred_element_type=jnp.float32)       # (H, S, hd)
    attn = jnp.einsum('hsd,hde->hse', o, wo_ref[0],
                      preferred_element_type=jnp.float32)
    attn = jnp.sum(attn, axis=0) + bo_ref[0]                 # (S, E)

    x = _layer_norm(x + attn, ln1g_ref[0], ln1b_ref[0])

    # FFN with bf16 weights, f32 accumulation (small numeric deviation vs the
    # f32 PyTorch baseline, flagged per review).
    h1 = jnp.dot(x.astype(jnp.bfloat16), w1_ref[0],
                 preferred_element_type=jnp.float32) + b1_ref[0]
    h1 = jnp.maximum(h1, 0.0)
    ff = jnp.dot(h1.astype(jnp.bfloat16), w2_ref[0],
                 preferred_element_type=jnp.float32) + b2_ref[0]

    x = _layer_norm(x + ff, ln2g_ref[0], ln2b_ref[0])
    x_scr[...] = x

    # Epilogue on the last layer step only.
    @pl.when(l == n_layers - 1)
    def _():
        # TODO(synk): Aggregator's definition is not in the snippet;
        # implemented as masked mean over valid positions + l2norm.
        valid = jnp.where(mask_ref[0] < -0.5, 0.0, 1.0)      # (1, S)
        ssum = jnp.dot(valid, x, preferred_element_type=jnp.float32)  # (1, E)
        cnt = jnp.maximum(jnp.sum(valid, axis=-1, keepdims=True), 1.0)
        aggr = _l2_normalize(ssum / cnt)                     # (1, E)

        # F.normalize(seq, dim=-1) with position 0 overwritten by the
        # aggregated embedding (mirrors `full_emb[0] = full_emb_aggr`).
        seq = _l2_normalize(x)                               # (S, E)
        row0 = lax.broadcasted_iota(jnp.int32, (S, 1), 0) == 0
        seq_ref[0] = jnp.where(row0, aggr, seq)
        aggr_ref[0] = aggr


def fused_branch(x, key_mask, proj, stacked, n_stage1):
    """x: (B, S, Din), key_mask: (B, 1, S) -> (seq (B,S,E), aggr (B,E))."""
    B, S, Din = x.shape
    pw, pb = proj
    E = pw.shape[1]
    L, H, _, hd = stacked['wq'].shape
    F = stacked['w1'].shape[2]

    def b_idx(nd):
        return lambda b, l, _n=nd: (b,) + (0,) * (_n - 1)

    def l_idx(nd):
        return lambda b, l, _n=nd: (l,) + (0,) * (_n - 1)

    def fixed(nd):
        return lambda b, l, _n=nd: (0,) * _n

    in_specs = [
        pl.BlockSpec((1, 1, S), b_idx(3)),            # key mask
        pl.BlockSpec((1, S, Din), b_idx(3)),          # raw input
        pl.BlockSpec(pw.shape, fixed(2)),             # proj weight
        pl.BlockSpec(pb.shape, fixed(2)),             # proj bias
        pl.BlockSpec((1, H, E, hd), l_idx(4)),        # wq
        pl.BlockSpec((1, H, 1, hd), l_idx(4)),        # bq
        pl.BlockSpec((1, H, E, hd), l_idx(4)),        # wk
        pl.BlockSpec((1, H, 1, hd), l_idx(4)),        # bk
        pl.BlockSpec((1, H, E, hd), l_idx(4)),        # wv
        pl.BlockSpec((1, H, 1, hd), l_idx(4)),        # bv
        pl.BlockSpec((1, H, hd, E), l_idx(4)),        # wo
        pl.BlockSpec((1, 1, E), l_idx(3)),            # bo
        pl.BlockSpec((1, 1, E), l_idx(3)),            # ln1g
        pl.BlockSpec((1, 1, E), l_idx(3)),            # ln1b
        pl.BlockSpec((1, E, F), l_idx(3)),            # w1 (bf16)
        pl.BlockSpec((1, 1, F), l_idx(3)),            # b1
        pl.BlockSpec((1, F, E), l_idx(3)),            # w2 (bf16)
        pl.BlockSpec((1, 1, E), l_idx(3)),            # b2
        pl.BlockSpec((1, 1, E), l_idx(3)),            # ln2g
        pl.BlockSpec((1, 1, E), l_idx(3)),            # ln2b
    ]
    out_specs = (pl.BlockSpec((1, S, E), b_idx(3)),
                 pl.BlockSpec((1, 1, E), b_idx(3)))

    kernel = functools.partial(fused_branch_kernel, n_stage1=n_stage1)
    seq, aggr = pl.pallas_call(
        kernel,
        out_shape=(jax.ShapeDtypeStruct((B, S, E), jnp.float32),
                   jax.ShapeDtypeStruct((B, 1, E), jnp.float32)),
        grid=(B, L),
        in_specs=in_specs,
        out_specs=out_specs,
        scratch_shapes=[pltpu.VMEM((S, E), jnp.float32)],
        compiler_params=pltpu.CompilerParams(
            dimension_semantics=("parallel", "arbitrary"),
            vmem_limit_bytes=16 * 1024 * 1024),
    )(key_mask, x, pw, pb,
      stacked['wq'], stacked['bq'], stacked['wk'], stacked['bk'],
      stacked['wv'], stacked['bv'], stacked['wo'], stacked['bo'],
      stacked['ln1g'], stacked['ln1b'],
      stacked['w1'], stacked['b1'], stacked['w2'], stacked['b2'],
      stacked['ln2g'], stacked['ln2b'])
    return seq, aggr[:, 0, :]


# ----------------------- parameters / forward wrapper -----------------------

def _init_layer(key, E, F, H):
    """Init one transformer layer with head-major packed attention weights."""
    hd = E // H
    ks = jax.random.split(key, 4)

    # Torch-style in_proj (3E, E) (out, in) -> per-head packed (H, E, hd).
    w_in = jax.random.normal(ks[0], (3 * E, E), jnp.float32) * 0.02
    b_in = jnp.zeros((3 * E,), jnp.float32)

    def split_heads(w, b):
        wp = w.reshape(H, hd, E).transpose(0, 2, 1)   # (H, E, hd): x @ W.T
        bp = b.reshape(H, 1, hd)
        return wp, bp

    wq, bq = split_heads(w_in[:E], b_in[:E])
    wk, bk = split_heads(w_in[E:2 * E], b_in[E:2 * E])
    wv, bv = split_heads(w_in[2 * E:], b_in[2 * E:])

    # Torch out_proj (E, E) (out, in) -> per-head packed (H, hd, E).
    w_out = jax.random.normal(ks[1], (E, E), jnp.float32) * 0.02
    wo = w_out.T.reshape(H, hd, E)
    bo = jnp.zeros((1, E), jnp.float32)

    # FFN weights stored pre-transposed (in, out) and bf16.
    w1 = (jax.random.normal(ks[2], (E, F), jnp.float32) * 0.02).astype(jnp.bfloat16)
    b1 = jnp.zeros((1, F), jnp.float32)
    w2 = (jax.random.normal(ks[3], (F, E), jnp.float32) * 0.02).astype(jnp.bfloat16)
    b2 = jnp.zeros((1, E), jnp.float32)

    return dict(wq=wq, bq=bq, wk=wk, bk=bk, wv=wv, bv=bv, wo=wo, bo=bo,
                ln1g=jnp.ones((1, E), jnp.float32),
                ln1b=jnp.zeros((1, E), jnp.float32),
                w1=w1, b1=b1, w2=w2, b2=b2,
                ln2g=jnp.ones((1, E), jnp.float32),
                ln2b=jnp.zeros((1, E), jnp.float32))


def _stack_layers(layer_list):
    return {k: jnp.stack([lp[k] for lp in layer_list], axis=0)
            for k in layer_list[0]}


def _init_dense_t(key, in_dim, out_dim):
    w = jax.random.normal(key, (in_dim, out_dim), jnp.float32) * 0.02
    b = jnp.zeros((1, out_dim), jnp.float32)
    return w, b


def init_params(key, E, F, word_dim, feat_dim, layers):
    keys = jax.random.split(key, 6)
    cap_proj = _init_dense_t(keys[0], word_dim, E)
    img_proj = _init_dense_t(keys[1], feat_dim, E)

    def enc(k):
        return [_init_layer(kk, E, F, NUM_HEADS)
                for kk in jax.random.split(k, layers)]

    # Text branch: enc_1 (masked) then enc_text (unmasked).
    # Image branch: enc_2 (masked, shared_transformer=False) then enc_img.
    text_stack = _stack_layers(enc(keys[2]) + enc(keys[4]))
    img_stack = _stack_layers(enc(keys[3]) + enc(keys[5]))
    return dict(cap_proj=cap_proj, img_proj=img_proj,
                text_stack=text_stack, img_stack=img_stack)


def baseline_forward(params, features, captions, feat_len, cap_len, boxes):
    # TODO(synk): EncoderText / EncoderImage (external BERT / bottom-up
    # encoders) are not defined in the snippet; their sequence outputs are
    # taken to be the (already featurized) inputs, and their aggregate outputs
    # are overwritten by the transformer+Aggregator path as in the PyTorch
    # forward. Config: shared-transformer=False, measure!='order', istest=False.
    del boxes  # only consumed by the undefined EncoderImage
    B, St, _ = captions.shape
    _, Si, _ = features.shape

    def build_key_mask(S, length):
        pos = jnp.arange(S)[None, :]
        pad = pos >= length[:, None]                         # (B, S) bool
        return jnp.where(pad, NEG_INF, 0.0).astype(jnp.float32)[:, None, :]

    cmask = build_key_mask(St, cap_len)                      # (B, 1, St)
    imask = build_key_mask(Si, feat_len)                     # (B, 1, Si)

    n1_text = params['text_stack']['wq'].shape[0] // 2
    n1_img = params['img_stack']['wq'].shape[0] // 2

    cap_seq, cap_aggr = fused_branch(captions, cmask, params['cap_proj'],
                                     params['text_stack'], n1_text)
    img_seq, img_aggr = fused_branch(features, imask, params['img_proj'],
                                     params['img_stack'], n1_img)

    return img_aggr, cap_aggr, img_seq, cap_seq


if __name__ == "__main__":
    key = jax.random.PRNGKey(0)
    B, St, Si = 2, 8, 8
    word_dim, feat_dim = 48, 64
    E, F, layers = 32, 2048, 2   # embed-size=32, dim_feedforward=2048, layers=2

    k_feat, k_cap, k_p = jax.random.split(key, 3)
    features = jax.random.normal(k_feat, (B, Si, feat_dim), jnp.float32)
    captions = jax.random.normal(k_cap, (B, St, word_dim), jnp.float32)
    feat_len = jnp.array([Si, 6], jnp.int32)
    cap_len = jnp.array([St, 5], jnp.int32)
    boxes = jnp.zeros((B, Si, 4), jnp.float32)

    params = init_params(k_p, E, F, word_dim, feat_dim, layers)

    fwd = jax.jit(baseline_forward)
    out = fwd(params, features, captions, feat_len, cap_len, boxes)
    jax.block_until_ready(out)

    img_aggr, cap_aggr, img_seq, cap_seq = out
    assert img_aggr.shape == (B, E) and cap_aggr.shape == (B, E)
    assert img_seq.shape == (B, Si, E) and cap_seq.shape == (B, St, E)
    assert bool(jnp.all(jnp.isfinite(img_seq))) and bool(jnp.all(jnp.isfinite(cap_seq)))
    assert bool(jnp.all(jnp.isfinite(img_aggr))) and bool(jnp.all(jnp.isfinite(cap_aggr)))
    print("KERNEL_OK")
</pallas_src>

<mosaic_0001>
module attributes {stable_mosaic.version = 11 : i64} {
  func.func @fused_branch_kernel(%arg0: i32, %arg1: i32, %arg2: memref<1x1x8xf32, #tpu.memory_space<vmem>>, %arg3: memref<1x8x64xf32, #tpu.memory_space<vmem>>, %arg4: memref<64x32xf32, #tpu.memory_space<vmem>>, %arg5: memref<1x32xf32, #tpu.memory_space<vmem>>, %arg6: memref<1x4x32x8xf32, #tpu.memory_space<vmem>>, %arg7: memref<1x4x1x8xf32, #tpu.memory_space<vmem>>, %arg8: memref<1x4x32x8xf32, #tpu.memory_space<vmem>>, %arg9: memref<1x4x1x8xf32, #tpu.memory_space<vmem>>, %arg10: memref<1x4x32x8xf32, #tpu.memory_space<vmem>>, %arg11: memref<1x4x1x8xf32, #tpu.memory_space<vmem>>, %arg12: memref<1x4x8x32xf32, #tpu.memory_space<vmem>>, %arg13: memref<1x1x32xf32, #tpu.memory_space<vmem>>, %arg14: memref<1x1x32xf32, #tpu.memory_space<vmem>>, %arg15: memref<1x1x32xf32, #tpu.memory_space<vmem>>, %arg16: memref<1x32x2048xbf16, #tpu.memory_space<vmem>>, %arg17: memref<1x1x2048xf32, #tpu.memory_space<vmem>>, %arg18: memref<1x2048x32xbf16, #tpu.memory_space<vmem>>, %arg19: memref<1x1x32xf32, #tpu.memory_space<vmem>>, %arg20: memref<1x1x32xf32, #tpu.memory_space<vmem>>, %arg21: memref<1x1x32xf32, #tpu.memory_space<vmem>>, %arg22: memref<1x8x32xf32, #tpu.memory_space<vmem>>, %arg23: memref<1x1x32xf32, #tpu.memory_space<vmem>>, %arg24: memref<8x32xf32, #tpu.memory_space<vmem>>) attributes {dimension_semantics = [#tpu.dimension_semantics<parallel>, #tpu.dimension_semantics<arbitrary>], iteration_bounds = array<i64: 2, 4>, scalar_prefetch = 0 : i64, scratch_operands = 1 : i64, tpu.core_type = #tpu.core_type<tc>, window_params = [{transform_indices = @transform_0, window_bounds = array<i64: 1, 1, 8>}, {transform_indices = @transform_1, window_bounds = array<i64: 1, 8, 64>}, {pipeline_mode = #tpu.pipeline_mode<synchronous>, transform_indices = @transform_2, window_bounds = array<i64: 64, 32>}, {pipeline_mode = #tpu.pipeline_mode<synchronous>, transform_indices = @transform_3, window_bounds = array<i64: 1, 32>}, {transform_indices = @transform_4, window_bounds = array<i64: 1, 4, 32, 8>}, {transform_indices = @transform_5, window_bounds = array<i64: 1, 4, 1, 8>}, {transform_indices = @transform_6, window_bounds = array<i64: 1, 4, 32, 8>}, {transform_indices = @transform_7, window_bounds = array<i64: 1, 4, 1, 8>}, {transform_indices = @transform_8, window_bounds = array<i64: 1, 4, 32, 8>}, {transform_indices = @transform_9, window_bounds = array<i64: 1, 4, 1, 8>}, {transform_indices = @transform_10, window_bounds = array<i64: 1, 4, 8, 32>}, {transform_indices = @transform_11, window_bounds = array<i64: 1, 1, 32>}, {transform_indices = @transform_12, window_bounds = array<i64: 1, 1, 32>}, {transform_indices = @transform_13, window_bounds = array<i64: 1, 1, 32>}, {transform_indices = @transform_14, window_bounds = array<i64: 1, 32, 2048>}, {transform_indices = @transform_15, window_bounds = array<i64: 1, 1, 2048>}, {transform_indices = @transform_16, window_bounds = array<i64: 1, 2048, 32>}, {transform_indices = @transform_17, window_bounds = array<i64: 1, 1, 32>}, {transform_indices = @transform_18, window_bounds = array<i64: 1, 1, 32>}, {transform_indices = @transform_19, window_bounds = array<i64: 1, 1, 32>}, {transform_indices = @transform_20, window_bounds = array<i64: 1, 8, 32>}, {transform_indices = @transform_21, window_bounds = array<i64: 1, 1, 32>}]} {
    %c0_i32 = arith.constant 0 : i32
    %0 = arith.cmpi eq, %arg1, %c0_i32 : i32
    %1 = arith.extui %0 : i1 to i32
    %c0_i32_0 = arith.constant 0 : i32
    %2 = arith.cmpi ne, %1, %c0_i32_0 : i32
    scf.if %2 {
      %c0_87 = arith.constant 0 : index
      %c0_88 = arith.constant 0 : index
      %c0_89 = arith.constant 0 : index
      %132 = vector.load %arg3[%c0_87, %c0_88, %c0_89] : memref<1x8x64xf32, #tpu.memory_space<vmem>>, vector<1x8x64xf32>
      %133 = vector.shape_cast %132 : vector<1x8x64xf32> to vector<8x64xf32>
      %c0_90 = arith.constant 0 : index
      %c0_91 = arith.constant 0 : index
      %134 = vector.load %arg4[%c0_90, %c0_91] : memref<64x32xf32, #tpu.memory_space<vmem>>, vector<64x32xf32>
      %cst_92 = arith.constant dense<0.000000e+00> : vector<8x32xf32>
      %135 = tpu.matmul %133, %134, %cst_92 {dimension_numbers = #tpu.dot_dimension_numbers<[1], [0], [0], [1], [0, 0, 1, 1], [], []>} : vector<8x64xf32>, vector<64x32xf32>, vector<8x32xf32> -> vector<8x32xf32>
      %c0_93 = arith.constant 0 : index
      %c0_94 = arith.constant 0 : index
      %136 = vector.load %arg5[%c0_93, %c0_94] : memref<1x32xf32, #tpu.memory_space<vmem>>, vector<1x32xf32>
      %137 = vector.broadcast %136 : vector<1x32xf32> to vector<8x32xf32>
      %138 = arith.addf %135, %137 : vector<8x32xf32>
      %c0_95 = arith.constant 0 : index
      %c0_96 = arith.constant 0 : index
      %139 = vector.load %arg24[%c0_95, %c0_96] : memref<8x32xf32, #tpu.memory_space<vmem>>, vector<8x32xf32>
      tpu.vector_store %arg24[%c0_95, %c0_96], %138 {strides = array<i32>} : memref<8x32xf32, #tpu.memory_space<vmem>>, vector<8x32xf32>,
    } else {
    }
    %c0 = arith.constant 0 : index
    %c0_1 = arith.constant 0 : index
    %3 = vector.load %arg24[%c0, %c0_1] : memref<8x32xf32, #tpu.memory_space<vmem>>, vector<8x32xf32>
    %4 = vector.shape_cast %3 : vector<8x32xf32> to vector<1x8x32xf32>
    %5 = vector.shape_cast %4 : vector<1x8x32xf32> to vector<1x8x32xf32>
    %6 = vector.broadcast %5 : vector<1x8x32xf32> to vector<4x8x32xf32>
    %c0_2 = arith.constant 0 : index
    %c0_3 = arith.constant 0 : index
    %c0_4 = arith.constant 0 : index
    %c0_5 = arith.constant 0 : index
    %7 = vector.load %arg6[%c0_2, %c0_3, %c0_4, %c0_5] : memref<1x4x32x8xf32, #tpu.memory_space<vmem>>, vector<1x4x32x8xf32>
    %8 = vector.shape_cast %7 : vector<1x4x32x8xf32> to vector<4x32x8xf32>
    "tpu.trace_start"() <{level = 10 : i32, message = "hse,hed->hsd"}> : () -> ()
    %cst = arith.constant dense<0.000000e+00> : vector<4x8x8xf32>
    %9 = tpu.matmul %6, %8, %cst {dimension_numbers = #tpu.dot_dimension_numbers<[2], [1], [1], [2], [0, 0, 0, 1, 1, 2], [0], [0]>} : vector<4x8x32xf32>, vector<4x32x8xf32>, vector<4x8x8xf32> -> vector<4x8x8xf32>
    "tpu.trace_stop"() : () -> ()
    %c0_6 = arith.constant 0 : index
    %c0_7 = arith.constant 0 : index
    %c0_8 = arith.constant 0 : index
    %c0_9 = arith.constant 0 : index
    %10 = vector.load %arg7[%c0_6, %c0_7, %c0_8, %c0_9] : memref<1x4x1x8xf32, #tpu.memory_space<vmem>>, vector<1x4x1x8xf32>
    %11 = vector.shape_cast %10 : vector<1x4x1x8xf32> to vector<4x1x8xf32>
    %12 = vector.broadcast %11 : vector<4x1x8xf32> to vector<4x8x8xf32>
    %13 = arith.addf %9, %12 : vector<4x8x8xf32>
    %c0_10 = arith.constant 0 : index
    %c0_11 = arith.constant 0 : index
    %c0_12 = arith.constant 0 : index
    %c0_13 = arith.constant 0 : index
    %14 = vector.load %arg8[%c0_10, %c0_11, %c0_12, %c0_13] : memref<1x4x32x8xf32, #tpu.memory_space<vmem>>, vector<1x4x32x8xf32>
    %15 = vector.shape_cast %14 : vector<1x4x32x8xf32> to vector<4x32x8xf32>
    "tpu.trace_start"() <{level = 10 : i32, message = "hse,hed->hsd"}> : () -> ()
    %cst_14 = arith.constant dense<0.000000e+00> : vector<4x8x8xf32>
    %16 = tpu.matmul %6, %15, %cst_14 {dimension_numbers = #tpu.dot_dimension_numbers<[2], [1], [1], [2], [0, 0, 0, 1, 1, 2], [0], [0]>} : vector<4x8x32xf32>, vector<4x32x8xf32>, vector<4x8x8xf32> -> vector<4x8x8xf32>
    "tpu.trace_stop"() : () -> ()
    %c0_15 = arith.constant 0 : index
    %c0_16 = arith.constant 0 : index
    %c0_17 = arith.constant 0 : index
    %c0_18 = arith.constant 0 : index
    %17 = vector.load %arg9[%c0_15, %c0_16, %c0_17, %c0_18] : memref<1x4x1x8xf32, #tpu.memory_space<vmem>>, vector<1x4x1x8xf32>
    %18 = vector.shape_cast %17 : vector<1x4x1x8xf32> to vector<4x1x8xf32>
    %19 = vector.broadcast %18 : vector<4x1x8xf32> to vector<4x8x8xf32>
    %20 = arith.addf %16, %19 : vector<4x8x8xf32>
    %c0_19 = arith.constant 0 : index
    %c0_20 = arith.constant 0 : index
    %c0_21 = arith.constant 0 : index
    %c0_22 = arith.constant 0 : index
    %21 = vector.load %arg10[%c0_19, %c0_20, %c0_21, %c0_22] : memref<1x4x32x8xf32, #tpu.memory_space<vmem>>, vector<1x4x32x8xf32>
    %22 = vector.shape_cast %21 : vector<1x4x32x8xf32> to vector<4x32x8xf32>
    "tpu.trace_start"() <{level = 10 : i32, message = "hse,hed->hsd"}> : () -> ()
    %cst_23 = arith.constant dense<0.000000e+00> : vector<4x8x8xf32>
    %23 = tpu.matmul %6, %22, %cst_23 {dimension_numbers = #tpu.dot_dimension_numbers<[2], [1], [1], [2], [0, 0, 0, 1, 1, 2], [0], [0]>} : vector<4x8x32xf32>, vector<4x32x8xf32>, vector<4x8x8xf32> -> vector<4x8x8xf32>
    "tpu.trace_stop"() : () -> ()
    %c0_24 = arith.constant 0 : index
    %c0_25 = arith.constant 0 : index
    %c0_26 = arith.constant 0 : index
    %c0_27 = arith.constant 0 : index
    %24 = vector.load %arg11[%c0_24, %c0_25, %c0_26, %c0_27] : memref<1x4x1x8xf32, #tpu.memory_space<vmem>>, vector<1x4x1x8xf32>
    %25 = vector.shape_cast %24 : vector<1x4x1x8xf32> to vector<4x1x8xf32>
    %26 = vector.broadcast %25 : vector<4x1x8xf32> to vector<4x8x8xf32>
    %27 = arith.addf %23, %26 : vector<4x8x8xf32>
    "tpu.trace_start"() <{level = 10 : i32, message = "hsd,htd->hst"}> : () -> ()
    %cst_28 = arith.constant dense<0.000000e+00> : vector<4x8x8xf32>
    %28 = tpu.matmul %13, %20, %cst_28 {dimension_numbers = #tpu.dot_dimension_numbers<[2], [2], [1], [1], [0, 0, 0, 1, 1, 1], [0], [0]>} : vector<4x8x8xf32>, vector<4x8x8xf32>, vector<4x8x8xf32> -> vector<4x8x8xf32>
    "tpu.trace_stop"() : () -> ()
    %cst_29 = arith.constant 0.353553385 : f32
    %29 = vector.broadcast %cst_29 : f32 to vector<4x8x8xf32>
    %30 = arith.mulf %28, %29 : vector<4x8x8xf32>
    %c2_i32 = arith.constant 2 : i32
    %31 = arith.cmpi slt, %arg1, %c2_i32 : i32
    %cst_30 = arith.constant 1.000000e+00 : f32
    %cst_31 = arith.constant 0.000000e+00 : f32
    %32 = arith.select %31, %cst_30, %cst_31 : f32
    %c0_32 = arith.constant 0 : index
    %c0_33 = arith.constant 0 : index
    %c0_34 = arith.constant 0 : index
    %33 = vector.load %arg2[%c0_32, %c0_33, %c0_34] : memref<1x1x8xf32, #tpu.memory_space<vmem>>, vector<1x1x8xf32>
    %34 = vector.broadcast %32 : f32 to vector<1x1x8xf32>
    %35 = arith.mulf %33, %34 : vector<1x1x8xf32>
    %36 = vector.broadcast %35 : vector<1x1x8xf32> to vector<4x8x8xf32>
    %37 = arith.addf %30, %36 : vector<4x8x8xf32>
    %cst_35 = arith.constant dense<0xFF800000> : vector<4x8xf32>
    %38 = vector.multi_reduction <maximumf>, %37, %cst_35 [2] : vector<4x8x8xf32> to vector<4x8xf32>
    %39 = vector.shape_cast %38 : vector<4x8xf32> to vector<4x8x1xf32>
    %40 = vector.broadcast %39 : vector<4x8x1xf32> to vector<4x8x8xf32>
    %41 = arith.subf %37, %40 : vector<4x8x8xf32>
    %42 = math.exp %41 : vector<4x8x8xf32>
    %cst_36 = arith.constant dense<0.000000e+00> : vector<4x8xf32>
    %43 = vector.multi_reduction <add>, %42, %cst_36 [2] : vector<4x8x8xf32> to vector<4x8xf32>
    %44 = vector.shape_cast %43 : vector<4x8xf32> to vector<4x8x1xf32>
    %45 = vector.broadcast %44 : vector<4x8x1xf32> to vector<4x8x8xf32>
    %46 = arith.divf %42, %45 : vector<4x8x8xf32>
    "tpu.trace_start"() <{level = 10 : i32, message = "hst,htd->hsd"}> : () -> ()
    %cst_37 = arith.constant dense<0.000000e+00> : vector<4x8x8xf32>
    %47 = tpu.matmul %46, %27, %cst_37 {dimension_numbers = #tpu.dot_dimension_numbers<[2], [1], [1], [2], [0, 0, 0, 1, 1, 2], [0], [0]>} : vector<4x8x8xf32>, vector<4x8x8xf32>, vector<4x8x8xf32> -> vector<4x8x8xf32>
    "tpu.trace_stop"() : () -> ()
    %c0_38 = arith.constant 0 : index
    %c0_39 = arith.constant 0 : index
    %c0_40 = arith.constant 0 : index
    %c0_41 = arith.constant 0 : index
    %48 = vector.load %arg12[%c0_38, %c0_39, %c0_40, %c0_41] : memref<1x4x8x32xf32, #tpu.memory_space<vmem>>, vector<1x4x8x32xf32>
    %49 = vector.shape_cast %48 : vector<1x4x8x32xf32> to vector<4x8x32xf32>
    "tpu.trace_start"() <{level = 10 : i32, message = "hsd,hde->hse"}> : () -> ()
    %cst_42 = arith.constant dense<0.000000e+00> : vector<4x8x32xf32>
    %50 = tpu.matmul %47, %49, %cst_42 {dimension_numbers = #tpu.dot_dimension_numbers<[2], [1], [1], [2], [0, 0, 0, 1, 1, 2], [0], [0]>} : vector<4x8x8xf32>, vector<4x8x32xf32>, vector<4x8x32xf32> -> vector<4x8x32xf32>
    "tpu.trace_stop"() : () -> ()
    %cst_43 = arith.constant dense<0.000000e+00> : vector<8x32xf32>
    %51 = vector.multi_reduction <add>, %50, %cst_43 [0] : vector<4x8x32xf32> to vector<8x32xf32>
    %c0_44 = arith.constant 0 : index
    %c0_45 = arith.constant 0 : index
    %c0_46 = arith.constant 0 : index
    %52 = vector.load %arg13[%c0_44, %c0_45, %c0_46] : memref<1x1x32xf32, #tpu.memory_space<vmem>>, vector<1x1x32xf32>
    %53 = vector.shape_cast %52 : vector<1x1x32xf32> to vector<1x32xf32>
    %54 = vector.broadcast %53 : vector<1x32xf32> to vector<8x32xf32>
    %55 = arith.addf %51, %54 : vector<8x32xf32>
    %56 = arith.addf %3, %55 : vector<8x32xf32>
    %c0_47 = arith.constant 0 : index
    %c0_48 = arith.constant 0 : index
    %c0_49 = arith.constant 0 : index
    %57 = vector.load %arg14[%c0_47, %c0_48, %c0_49] : memref<1x1x32xf32, #tpu.memory_space<vmem>>, vector<1x1x32xf32>
    %58 = vector.shape_cast %57 : vector<1x1x32xf32> to vector<1x32xf32>
    %c0_50 = arith.constant 0 : index
    %c0_51 = arith.constant 0 : index
    %c0_52 = arith.constant 0 : index
    %59 = vector.load %arg15[%c0_50, %c0_51, %c0_52] : memref<1x1x32xf32, #tpu.memory_space<vmem>>, vector<1x1x32xf32>
    %60 = vector.shape_cast %59 : vector<1x1x32xf32> to vector<1x32xf32>
    %cst_53 = arith.constant dense<0.000000e+00> : vector<8xf32>
    %61 = vector.multi_reduction <add>, %56, %cst_53 [1] : vector<8x32xf32> to vector<8xf32>
    %62 = vector.shape_cast %61 : vector<8xf32> to vector<8x1xf32>
    %cst_54 = arith.constant 3.200000e+01 : f32
    %63 = vector.broadcast %cst_54 : f32 to vector<8x1xf32>
    %64 = arith.divf %62, %63 : vector<8x1xf32>
    %65 = vector.broadcast %64 : vector<8x1xf32> to vector<8x32xf32>
    %66 = arith.subf %56, %65 : vector<8x32xf32>
    %67 = arith.mulf %66, %66 : vector<8x32xf32>
    %cst_55 = arith.constant dense<0.000000e+00> : vector<8xf32>
    %68 = vector.multi_reduction <add>, %67, %cst_55 [1] : vector<8x32xf32> to vector<8xf32>
    %69 = vector.shape_cast %68 : vector<8xf32> to vector<8x1xf32>
    %cst_56 = arith.constant 3.200000e+01 : f32
    %70 = vector.broadcast %cst_56 : f32 to vector<8x1xf32>
    %71 = arith.divf %69, %70 : vector<8x1xf32>
    %72 = vector.broadcast %64 : vector<8x1xf32> to vector<8x32xf32>
    %73 = arith.subf %56, %72 : vector<8x32xf32>
    %cst_57 = arith.constant 9.99999974E-6 : f32
    %74 = vector.broadcast %cst_57 : f32 to vector<8x1xf32>
    %75 = arith.addf %71, %74 : vector<8x1xf32>
    %76 = math.rsqrt %75 : vector<8x1xf32>
    %77 = vector.broadcast %76 : vector<8x1xf32> to vector<8x32xf32>
    %78 = arith.mulf %73, %77 : vector<8x32xf32>
    %79 = vector.broadcast %58 : vector<1x32xf32> to vector<8x32xf32>
    %80 = arith.mulf %78, %79 : vector<8x32xf32>
    %81 = vector.broadcast %60 : vector<1x32xf32> to vector<8x32xf32>
    %82 = arith.addf %80, %81 : vector<8x32xf32>
    %83 = arith.truncf %82 : vector<8x32xf32> to vector<8x32xbf16>
    %c0_58 = arith.constant 0 : index
    %c0_59 = arith.constant 0 : index
    %c0_60 = arith.constant 0 : index
    %84 = vector.load %arg16[%c0_58, %c0_59, %c0_60] : memref<1x32x2048xbf16, #tpu.memory_space<vmem>>, vector<1x32x2048xbf16>
    %85 = vector.shape_cast %84 : vector<1x32x2048xbf16> to vector<32x2048xbf16>
    %cst_61 = arith.constant dense<0.000000e+00> : vector<8x2048xf32>
    %86 = tpu.matmul %83, %85, %cst_61 {dimension_numbers = #tpu.dot_dimension_numbers<[1], [0], [0], [1], [0, 0, 1, 1], [], []>} : vector<8x32xbf16>, vector<32x2048xbf16>, vector<8x2048xf32> -> vector<8x2048xf32>
    %c0_62 = arith.constant 0 : index
    %c0_63 = arith.constant 0 : index
    %c0_64 = arith.constant 0 : index
    %87 = vector.load %arg17[%c0_62, %c0_63, %c0_64] : memref<1x1x2048xf32, #tpu.memory_space<vmem>>, vector<1x1x2048xf32>
    %88 = vector.shape_cast %87 : vector<1x1x2048xf32> to vector<1x2048xf32>
    %89 = vector.broadcast %88 : vector<1x2048xf32> to vector<8x2048xf32>
    %90 = arith.addf %86, %89 : vector<8x2048xf32>
    %cst_65 = arith.constant 0.000000e+00 : f32
    %91 = vector.broadcast %cst_65 : f32 to vector<8x2048xf32>
    %92 = arith.maximumf %90, %91 : vector<8x2048xf32>
    %93 = arith.truncf %92 : vector<8x2048xf32> to vector<8x2048xbf16>
    %c0_66 = arith.constant 0 : index
    %c0_67 = arith.constant 0 : index
    %c0_68 = arith.constant 0 : index
    %94 = vector.load %arg18[%c0_66, %c0_67, %c0_68] : memref<1x2048x32xbf16, #tpu.memory_space<vmem>>, vector<1x2048x32xbf16>
    %95 = vector.shape_cast %94 : vector<1x2048x32xbf16> to vector<2048x32xbf16>
    %cst_69 = arith.constant dense<0.000000e+00> : vector<8x32xf32>
    %96 = tpu.matmul %93, %95, %cst_69 {dimension_numbers = #tpu.dot_dimension_numbers<[1], [0], [0], [1], [0, 0, 1, 1], [], []>} : vector<8x2048xbf16>, vector<2048x32xbf16>, vector<8x32xf32> -> vector<8x32xf32>
    %c0_70 = arith.constant 0 : index
    %c0_71 = arith.constant 0 : index
    %c0_72 = arith.constant 0 : index
    %97 = vector.load %arg19[%c0_70, %c0_71, %c0_72] : memref<1x1x32xf32, #tpu.memory_space<vmem>>, vector<1x1x32xf32>
    %98 = vector.shape_cast %97 : vector<1x1x32xf32> to vector<1x32xf32>
    %99 = vector.broadcast %98 : vector<1x32xf32> to vector<8x32xf32>
    %100 = arith.addf %96, %99 : vector<8x32xf32>
    %101 = arith.addf %82, %100 : vector<8x32xf32>
    %c0_73 = arith.constant 0 : index
    %c0_74 = arith.constant 0 : index
    %c0_75 = arith.constant 0 : index
    %102 = vector.load %arg20[%c0_73, %c0_74, %c0_75] : memref<1x1x32xf32, #tpu.memory_space<vmem>>, vector<1x1x32xf32>
    %103 = vector.shape_cast %102 : vector<1x1x32xf32> to vector<1x32xf32>
    %c0_76 = arith.constant 0 : index
    %c0_77 = arith.constant 0 : index
    %c0_78 = arith.constant 0 : index
    %104 = vector.load %arg21[%c0_76, %c0_77, %c0_78] : memref<1x1x32xf32, #tpu.memory_space<vmem>>, vector<1x1x32xf32>
    %105 = vector.shape_cast %104 : vector<1x1x32xf32> to vector<1x32xf32>
    %cst_79 = arith.constant dense<0.000000e+00> : vector<8xf32>
    %106 = vector.multi_reduction <add>, %101, %cst_79 [1] : vector<8x32xf32> to vector<8xf32>
    %107 = vector.shape_cast %106 : vector<8xf32> to vector<8x1xf32>
    %cst_80 = arith.constant 3.200000e+01 : f32
    %108 = vector.broadcast %cst_80 : f32 to vector<8x1xf32>
    %109 = arith.divf %107, %108 : vector<8x1xf32>
    %110 = vector.broadcast %109 : vector<8x1xf32> to vector<8x32xf32>
    %111 = arith.subf %101, %110 : vector<8x32xf32>
    %112 = arith.mulf %111, %111 : vector<8x32xf32>
    %cst_81 = arith.constant dense<0.000000e+00> : vector<8xf32>
    %113 = vector.multi_reduction <add>, %112, %cst_81 [1] : vector<8x32xf32> to vector<8xf32>
    %114 = vector.shape_cast %113 : vector<8xf32> to vector<8x1xf32>
    %cst_82 = arith.constant 3.200000e+01 : f32
    %115 = vector.broadcast %cst_82 : f32 to vector<8x1xf32>
    %116 = arith.divf %114, %115 : vector<8x1xf32>
    %117 = vector.broadcast %109 : vector<8x1xf32> to vector<8x32xf32>
    %118 = arith.subf %101, %117 : vector<8x32xf32>
    %cst_83 = arith.constant 9.99999974E-6 : f32
    %119 = vector.broadcast %cst_83 : f32 to vector<8x1xf32>
    %120 = arith.addf %116, %119 : vector<8x1xf32>
    %121 = math.rsqrt %120 : vector<8x1xf32>
    %122 = vector.broadcast %121 : vector<8x1xf32> to vector<8x32xf32>
    %123 = arith.mulf %118, %122 : vector<8x32xf32>
    %124 = vector.broadcast %103 : vector<1x32xf32> to vector<8x32xf32>
    %125 = arith.mulf %123, %124 : vector<8x32xf32>
    %126 = vector.broadcast %105 : vector<1x32xf32> to vector<8x32xf32>
    %127 = arith.addf %125, %126 : vector<8x32xf32>
    %c0_84 = arith.constant 0 : index
    %c0_85 = arith.constant 0 : index
    %128 = vector.load %arg24[%c0_84, %c0_85] : memref<8x32xf32, #tpu.memory_space<vmem>>, vector<8x32xf32>
    tpu.vector_store %arg24[%c0_84, %c0_85], %127 {strides = array<i32>} : memref<8x32xf32, #tpu.memory_space<vmem>>, vector<8x32xf32>,
    %c3_i32 = arith.constant 3 : i32
    %129 = arith.cmpi eq, %arg1, %c3_i32 : i32
    %130 = arith.extui %129 : i1 to i32
    %c0_i32_86 = arith.constant 0 : i32
    %131 = arith.cmpi ne, %130, %c0_i32_86 : i32
    scf.if %131 {
      %c0_87 = arith.constant 0 : index
      %c0_88 = arith.constant 0 : index
      %c0_89 = arith.constant 0 : index
      %132 = vector.load %arg2[%c0_87, %c0_88, %c0_89] : memref<1x1x8xf32, #tpu.memory_space<vmem>>, vector<1x1x8xf32>
      %133 = vector.shape_cast %132 : vector<1x1x8xf32> to vector<1x8xf32>
      %cst_90 = arith.constant -5.000000e-01 : f32
      %134 = vector.broadcast %cst_90 : f32 to vector<1x8xf32>
      %135 = arith.cmpf olt, %133, %134 : vector<1x8xf32>
      %cst_91 = arith.constant 0.000000e+00 : f32
      %cst_92 = arith.constant 1.000000e+00 : f32
      %136 = vector.broadcast %cst_91 : f32 to vector<1x8xf32>
      %137 = vector.broadcast %cst_92 : f32 to vector<1x8xf32>
      %138 = arith.select %135, %136, %137 : vector<1x8xi1>, vector<1x8xf32>
      %cst_93 = arith.constant dense<0.000000e+00> : vector<1x32xf32>
      %139 = tpu.matmul %138, %127, %cst_93 {dimension_numbers = #tpu.dot_dimension_numbers<[1], [0], [0], [1], [0, 0, 1, 1], [], []>} : vector<1x8xf32>, vector<8x32xf32>, vector<1x32xf32> -> vector<1x32xf32>
      %cst_94 = arith.constant dense<0.000000e+00> : vector<1xf32>
      %140 = vector.multi_reduction <add>, %138, %cst_94 [1] : vector<1x8xf32> to vector<1xf32>
      %141 = vector.shape_cast %140 : vector<1xf32> to vector<1x1xf32>
      %cst_95 = arith.constant 1.000000e+00 : f32
      %142 = vector.broadcast %cst_95 : f32 to vector<1x1xf32>
      %143 = arith.maximumf %141, %142 : vector<1x1xf32>
      %144 = vector.broadcast %143 : vector<1x1xf32> to vector<1x32xf32>
      %145 = arith.divf %139, %144 : vector<1x32xf32>
      %146 = arith.mulf %145, %145 : vector<1x32xf32>
      %cst_96 = arith.constant dense<0.000000e+00> : vector<1xf32>
      %147 = vector.multi_reduction <add>, %146, %cst_96 [1] : vector<1x32xf32> to vector<1xf32>
      %148 = vector.shape_cast %147 : vector<1xf32> to vector<1x1xf32>
      %cst_97 = arith.constant 1.000000e-24 : f32
      %149 = vector.broadcast %cst_97 : f32 to vector<1x1xf32>
      %150 = arith.maximumf %148, %149 : vector<1x1xf32>
      %151 = math.rsqrt %150 : vector<1x1xf32>
      %152 = vector.broadcast %151 : vector<1x1xf32> to vector<1x32xf32>
      %153 = arith.mulf %145, %152 : vector<1x32xf32>
      %154 = arith.mulf %127, %127 : vector<8x32xf32>
      %cst_98 = arith.constant dense<0.000000e+00> : vector<8xf32>
      %155 = vector.multi_reduction <add>, %154, %cst_98 [1] : vector<8x32xf32> to vector<8xf32>
      %156 = vector.shape_cast %155 : vector<8xf32> to vector<8x1xf32>
      %cst_99 = arith.constant 1.000000e-24 : f32
      %157 = vector.broadcast %cst_99 : f32 to vector<8x1xf32>
      %158 = arith.maximumf %156, %157 : vector<8x1xf32>
      %159 = math.rsqrt %158 : vector<8x1xf32>
      %160 = vector.broadcast %159 : vector<8x1xf32> to vector<8x32xf32>
      %161 = arith.mulf %127, %160 : vector<8x32xf32>
      %162 = tpu.iota {dimensions = array<i32: 0>} : vector<8x1xi32>
      %c0_i32_100 = arith.constant 0 : i32
      %163 = vector.broadcast %c0_i32_100 : i32 to vector<8x1xi32>
      %164 = arith.cmpi eq, %162, %163 : vector<8x1xi32>
      %165 = vector.shape_cast %164 : vector<8x1xi1> to vector<8x1xi1>
      %166 = vector.broadcast %165 : vector<8x1xi1> to vector<8x32xi1>
      %167 = vector.shape_cast %153 : vector<1x32xf32> to vector<1x32xf32>
      %168 = vector.broadcast %167 : vector<1x32xf32> to vector<8x32xf32>
      %169 = arith.select %166, %168, %161 : vector<8x32xi1>, vector<8x32xf32>
      %c0_101 = arith.constant 0 : index
      %c0_102 = arith.constant 0 : index
      %c0_103 = arith.constant 0 : index
      %170 = vector.load %arg22[%c0_101, %c0_102, %c0_103] : memref<1x8x32xf32, #tpu.memory_space<vmem>>, vector<1x8x32xf32>
      %171 = vector.shape_cast %170 : vector<1x8x32xf32> to vector<8x32xf32>
      %172 = vector.shape_cast %169 : vector<8x32xf32> to vector<1x8x32xf32>
      tpu.vector_store %arg22[%c0_101, %c0_102, %c0_103], %172 {strides = array<i32>} : memref<1x8x32xf32, #tpu.memory_space<vmem>>, vector<1x8x32xf32>,
      %c0_104 = arith.constant 0 : index
      %c0_105 = arith.constant 0 : index
      %c0_106 = arith.constant 0 : index
      %173 = vector.load %arg23[%c0_104, %c0_105, %c0_106] : memref<1x1x32xf32, #tpu.memory_space<vmem>>, vector<1x1x32xf32>
      %174 = vector.shape_cast %173 : vector<1x1x32xf32> to vector<1x32xf32>
      %175 = vector.shape_cast %153 : vector<1x32xf32> to vector<1x1x32xf32>
      tpu.vector_store %arg23[%c0_104, %c0_105, %c0_106], %175 {strides = array<i32>} : memref<1x1x32xf32, #tpu.memory_space<vmem>>, vector<1x1x32xf32>,
    } else {
    }
    return
  }
  func.func @transform_0(%arg0: i32, %arg1: i32) -> (i32, i32, i32) {
    %c0_i32 = arith.constant 0 : i32
    %c0_i32_0 = arith.constant 0 : i32
    %c0_i32_1 = arith.constant 0 : i32
    return %arg0, %c0_i32, %c0_i32_0 : i32, i32, i32
  }
  func.func @transform_1(%arg0: i32, %arg1: i32) -> (i32, i32, i32) {
    %c0_i32 = arith.constant 0 : i32
    %c0_i32_0 = arith.constant 0 : i32
    %c0_i32_1 = arith.constant 0 : i32
    return %arg0, %c0_i32, %c0_i32_0 : i32, i32, i32
  }
  func.func @transform_2(%arg0: i32, %arg1: i32) -> (i32, i32) {
    %c0_i32 = arith.constant 0 : i32
    %c0_i32_0 = arith.constant 0 : i32
    %c0_i32_1 = arith.constant 0 : i32
    return %c0_i32, %c0_i32_0 : i32, i32
  }
  func.func @transform_3(%arg0: i32, %arg1: i32) -> (i32, i32) {
    %c0_i32 = arith.constant 0 : i32
    %c0_i32_0 = arith.constant 0 : i32
    %c0_i32_1 = arith.constant 0 : i32
    return %c0_i32, %c0_i32_0 : i32, i32
  }
  func.func @transform_4(%arg0: i32, %arg1: i32) -> (i32, i32, i32, i32) {
    %c0_i32 = arith.constant 0 : i32
    %c0_i32_0 = arith.constant 0 : i32
    %c0_i32_1 = arith.constant 0 : i32
    %c0_i32_2 = arith.constant 0 : i32
    return %arg1, %c0_i32, %c0_i32_0, %c0_i32_1 : i32, i32, i32, i32
  }
  func.func @transform_5(%arg0: i32, %arg1: i32) -> (i32, i32, i32, i32) {
    %c0_i32 = arith.constant 0 : i32
    %c0_i32_0 = arith.constant 0 : i32
    %c0_i32_1 = arith.constant 0 : i32
    %c0_i32_2 = arith.constant 0 : i32
    return %arg1, %c0_i32, %c0_i32_0, %c0_i32_1 : i32, i32, i32, i32
  }
  func.func @transform_6(%arg0: i32, %arg1: i32) -> (i32, i32, i32, i32) {
    %c0_i32 = arith.constant 0 : i32
    %c0_i32_0 = arith.constant 0 : i32
    %c0_i32_1 = arith.constant 0 : i32
    %c0_i32_2 = arith.constant 0 : i32
    return %arg1, %c0_i32, %c0_i32_0, %c0_i32_1 : i32, i32, i32, i32
  }
  func.func @transform_7(%arg0: i32, %arg1: i32) -> (i32, i32, i32, i32) {
    %c0_i32 = arith.constant 0 : i32
    %c0_i32_0 = arith.constant 0 : i32
    %c0_i32_1 = arith.constant 0 : i32
    %c0_i32_2 = arith.constant 0 : i32
    return %arg1, %c0_i32, %c0_i32_0, %c0_i32_1 : i32, i32, i32, i32
  }
  func.func @transform_8(%arg0: i32, %arg1: i32) -> (i32, i32, i32, i32) {
    %c0_i32 = arith.constant 0 : i32
    %c0_i32_0 = arith.constant 0 : i32
    %c0_i32_1 = arith.constant 0 : i32
    %c0_i32_2 = arith.constant 0 : i32
    return %arg1, %c0_i32, %c0_i32_0, %c0_i32_1 : i32, i32, i32, i32
  }
  func.func @transform_9(%arg0: i32, %arg1: i32) -> (i32, i32, i32, i32) {
    %c0_i32 = arith.constant 0 : i32
    %c0_i32_0 = arith.constant 0 : i32
    %c0_i32_1 = arith.constant 0 : i32
    %c0_i32_2 = arith.constant 0 : i32
    return %arg1, %c0_i32, %c0_i32_0, %c0_i32_1 : i32, i32, i32, i32
  }
  func.func @transform_10(%arg0: i32, %arg1: i32) -> (i32, i32, i32, i32) {
    %c0_i32 = arith.constant 0 : i32
    %c0_i32_0 = arith.constant 0 : i32
    %c0_i32_1 = arith.constant 0 : i32
    %c0_i32_2 = arith.constant 0 : i32
    return %arg1, %c0_i32, %c0_i32_0, %c0_i32_1 : i32, i32, i32, i32
  }
  func.func @transform_11(%arg0: i32, %arg1: i32) -> (i32, i32, i32) {
    %c0_i32 = arith.constant 0 : i32
    %c0_i32_0 = arith.constant 0 : i32
    %c0_i32_1 = arith.constant 0 : i32
    return %arg1, %c0_i32, %c0_i32_0 : i32, i32, i32
  }
  func.func @transform_12(%arg0: i32, %arg1: i32) -> (i32, i32, i32) {
    %c0_i32 = arith.constant 0 : i32
    %c0_i32_0 = arith.constant 0 : i32
    %c0_i32_1 = arith.constant 0 : i32
    return %arg1, %c0_i32, %c0_i32_0 : i32, i32, i32
  }
  func.func @transform_13(%arg0: i32, %arg1: i32) -> (i32, i32, i32) {
    %c0_i32 = arith.constant 0 : i32
    %c0_i32_0 = arith.constant 0 : i32
    %c0_i32_1 = arith.constant 0 : i32
    return %arg1, %c0_i32, %c0_i32_0 : i32, i32, i32
  }
  func.func @transform_14(%arg0: i32, %arg1: i32) -> (i32, i32, i32) {
    %c0_i32 = arith.constant 0 : i32
    %c0_i32_0 = arith.constant 0 : i32
    %c0_i32_1 = arith.constant 0 : i32
    return %arg1, %c0_i32, %c0_i32_0 : i32, i32, i32
  }
  func.func @transform_15(%arg0: i32, %arg1: i32) -> (i32, i32, i32) {
    %c0_i32 = arith.constant 0 : i32
    %c0_i32_0 = arith.constant 0 : i32
    %c0_i32_1 = arith.constant 0 : i32
    return %arg1, %c0_i32, %c0_i32_0 : i32, i32, i32
  }
  func.func @transform_16(%arg0: i32, %arg1: i32) -> (i32, i32, i32) {
    %c0_i32 = arith.constant 0 : i32
    %c0_i32_0 = arith.constant 0 : i32
    %c0_i32_1 = arith.constant 0 : i32
    return %arg1, %c0_i32, %c0_i32_0 : i32, i32, i32
  }
  func.func @transform_17(%arg0: i32, %arg1: i32) -> (i32, i32, i32) {
    %c0_i32 = arith.constant 0 : i32
    %c0_i32_0 = arith.constant 0 : i32
    %c0_i32_1 = arith.constant 0 : i32
    return %arg1, %c0_i32, %c0_i32_0 : i32, i32, i32
  }
  func.func @transform_18(%arg0: i32, %arg1: i32) -> (i32, i32, i32) {
    %c0_i32 = arith.constant 0 : i32
    %c0_i32_0 = arith.constant 0 : i32
    %c0_i32_1 = arith.constant 0 : i32
    return %arg1, %c0_i32, %c0_i32_0 : i32, i32, i32
  }
  func.func @transform_19(%arg0: i32, %arg1: i32) -> (i32, i32, i32) {
    %c0_i32 = arith.constant 0 : i32
    %c0_i32_0 = arith.constant 0 : i32
    %c0_i32_1 = arith.constant 0 : i32
    return %arg1, %c0_i32, %c0_i32_0 : i32, i32, i32
  }
  func.func @transform_20(%arg0: i32, %arg1: i32) -> (i32, i32, i32) {
    %c0_i32 = arith.constant 0 : i32
    %c0_i32_0 = arith.constant 0 : i32
    %c0_i32_1 = arith.constant 0 : i32
    return %arg0, %c0_i32, %c0_i32_0 : i32, i32, i32
  }
  func.func @transform_21(%arg0: i32, %arg1: i32) -> (i32, i32, i32) {
    %c0_i32 = arith.constant 0 : i32
    %c0_i32_0 = arith.constant 0 : i32
    %c0_i32_1 = arith.constant 0 : i32
    return %arg0, %c0_i32, %c0_i32_0 : i32, i32, i32
  }
}

module attributes {stable_mosaic.version = 11 : i64} {
  func.func @fused_branch_kernel(%arg0: i32, %arg1: i32, %arg2: memref<1x1x8xf32, #tpu.memory_space<vmem>>, %arg3: memref<1x8x48xf32, #tpu.memory_space<vmem>>, %arg4: memref<48x32xf32, #tpu.memory_space<vmem>>, %arg5: memref<1x32xf32, #tpu.memory_space<vmem>>, %arg6: memref<1x4x32x8xf32, #tpu.memory_space<vmem>>, %arg7: memref<1x4x1x8xf32, #tpu.memory_space<vmem>>, %arg8: memref<1x4x32x8xf32, #tpu.memory_space<vmem>>, %arg9: memref<1x4x1x8xf32, #tpu.memory_space<vmem>>, %arg10: memref<1x4x32x8xf32, #tpu.memory_space<vmem>>, %arg11: memref<1x4x1x8xf32, #tpu.memory_space<vmem>>, %arg12: memref<1x4x8x32xf32, #tpu.memory_space<vmem>>, %arg13: memref<1x1x32xf32, #tpu.memory_space<vmem>>, %arg14: memref<1x1x32xf32, #tpu.memory_space<vmem>>, %arg15: memref<1x1x32xf32, #tpu.memory_space<vmem>>, %arg16: memref<1x32x2048xbf16, #tpu.memory_space<vmem>>, %arg17: memref<1x1x2048xf32, #tpu.memory_space<vmem>>, %arg18: memref<1x2048x32xbf16, #tpu.memory_space<vmem>>, %arg19: memref<1x1x32xf32, #tpu.memory_space<vmem>>, %arg20: memref<1x1x32xf32, #tpu.memory_space<vmem>>, %arg21: memref<1x1x32xf32, #tpu.memory_space<vmem>>, %arg22: memref<1x8x32xf32, #tpu.memory_space<vmem>>, %arg23: memref<1x1x32xf32, #tpu.memory_space<vmem>>, %arg24: memref<8x32xf32, #tpu.memory_space<vmem>>) attributes {dimension_semantics = [#tpu.dimension_semantics<parallel>, #tpu.dimension_semantics<arbitrary>], iteration_bounds = array<i64: 2, 4>, scalar_prefetch = 0 : i64, scratch_operands = 1 : i64, tpu.core_type = #tpu.core_type<tc>, window_params = [{transform_indices = @transform_0, window_bounds = array<i64: 1, 1, 8>}, {transform_indices = @transform_1, window_bounds = array<i64: 1, 8, 48>}, {pipeline_mode = #tpu.pipeline_mode<synchronous>, transform_indices = @transform_2, window_bounds = array<i64: 48, 32>}, {pipeline_mode = #tpu.pipeline_mode<synchronous>, transform_indices = @transform_3, window_bounds = array<i64: 1, 32>}, {transform_indices = @transform_4, window_bounds = array<i64: 1, 4, 32, 8>}, {transform_indices = @transform_5, window_bounds = array<i64: 1, 4, 1, 8>}, {transform_indices = @transform_6, window_bounds = array<i64: 1, 4, 32, 8>}, {transform_indices = @transform_7, window_bounds = array<i64: 1, 4, 1, 8>}, {transform_indices = @transform_8, window_bounds = array<i64: 1, 4, 32, 8>}, {transform_indices = @transform_9, window_bounds = array<i64: 1, 4, 1, 8>}, {transform_indices = @transform_10, window_bounds = array<i64: 1, 4, 8, 32>}, {transform_indices = @transform_11, window_bounds = array<i64: 1, 1, 32>}, {transform_indices = @transform_12, window_bounds = array<i64: 1, 1, 32>}, {transform_indices = @transform_13, window_bounds = array<i64: 1, 1, 32>}, {transform_indices = @transform_14, window_bounds = array<i64: 1, 32, 2048>}, {transform_indices = @transform_15, window_bounds = array<i64: 1, 1, 2048>}, {transform_indices = @transform_16, window_bounds = array<i64: 1, 2048, 32>}, {transform_indices = @transform_17, window_bounds = array<i64: 1, 1, 32>}, {transform_indices = @transform_18, window_bounds = array<i64: 1, 1, 32>}, {transform_indices = @transform_19, window_bounds = array<i64: 1, 1, 32>}, {transform_indices = @transform_20, window_bounds = array<i64: 1, 8, 32>}, {transform_indices = @transform_21, window_bounds = array<i64: 1, 1, 32>}]} {
    %c0_i32 = arith.constant 0 : i32
    %0 = arith.cmpi eq, %arg1, %c0_i32 : i32
    %1 = arith.extui %0 : i1 to i32
    %c0_i32_0 = arith.constant 0 : i32
    %2 = arith.cmpi ne, %1, %c0_i32_0 : i32
    scf.if %2 {
      %c0_87 = arith.constant 0 : index
      %c0_88 = arith.constant 0 : index
      %c0_89 = arith.constant 0 : index
      %132 = vector.load %arg3[%c0_87, %c0_88, %c0_89] : memref<1x8x48xf32, #tpu.memory_space<vmem>>, vector<1x8x48xf32>
      %133 = vector.shape_cast %132 : vector<1x8x48xf32> to vector<8x48xf32>
      %c0_90 = arith.constant 0 : index
      %c0_91 = arith.constant 0 : index
      %134 = vector.load %arg4[%c0_90, %c0_91] : memref<48x32xf32, #tpu.memory_space<vmem>>, vector<48x32xf32>
      %cst_92 = arith.constant dense<0.000000e+00> : vector<8x32xf32>
      %135 = tpu.matmul %133, %134, %cst_92 {dimension_numbers = #tpu.dot_dimension_numbers<[1], [0], [0], [1], [0, 0, 1, 1], [], []>} : vector<8x48xf32>, vector<48x32xf32>, vector<8x32xf32> -> vector<8x32xf32>
      %c0_93 = arith.constant 0 : index
      %c0_94 = arith.constant 0 : index
      %136 = vector.load %arg5[%c0_93, %c0_94] : memref<1x32xf32, #tpu.memory_space<vmem>>, vector<1x32xf32>
      %137 = vector.broadcast %136 : vector<1x32xf32> to vector<8x32xf32>
      %138 = arith.addf %135, %137 : vector<8x32xf32>
      %c0_95 = arith.constant 0 : index
      %c0_96 = arith.constant 0 : index
      %139 = vector.load %arg24[%c0_95, %c0_96] : memref<8x32xf32, #tpu.memory_space<vmem>>, vector<8x32xf32>
      tpu.vector_store %arg24[%c0_95, %c0_96], %138 {strides = array<i32>} : memref<8x32xf32, #tpu.memory_space<vmem>>, vector<8x32xf32>,
    } else {
    }
    %c0 = arith.constant 0 : index
    %c0_1 = arith.constant 0 : index
    %3 = vector.load %arg24[%c0, %c0_1] : memref<8x32xf32, #tpu.memory_space<vmem>>, vector<8x32xf32>
    %4 = vector.shape_cast %3 : vector<8x32xf32> to vector<1x8x32xf32>
    %5 = vector.shape_cast %4 : vector<1x8x32xf32> to vector<1x8x32xf32>
    %6 = vector.broadcast %5 : vector<1x8x32xf32> to vector<4x8x32xf32>
    %c0_2 = arith.constant 0 : index
    %c0_3 = arith.constant 0 : index
    %c0_4 = arith.constant 0 : index
    %c0_5 = arith.constant 0 : index
    %7 = vector.load %arg6[%c0_2, %c0_3, %c0_4, %c0_5] : memref<1x4x32x8xf32, #tpu.memory_space<vmem>>, vector<1x4x32x8xf32>
    %8 = vector.shape_cast %7 : vector<1x4x32x8xf32> to vector<4x32x8xf32>
    "tpu.trace_start"() <{level = 10 : i32, message = "hse,hed->hsd"}> : () -> ()
    %cst = arith.constant dense<0.000000e+00> : vector<4x8x8xf32>
    %9 = tpu.matmul %6, %8, %cst {dimension_numbers = #tpu.dot_dimension_numbers<[2], [1], [1], [2], [0, 0, 0, 1, 1, 2], [0], [0]>} : vector<4x8x32xf32>, vector<4x32x8xf32>, vector<4x8x8xf32> -> vector<4x8x8xf32>
    "tpu.trace_stop"() : () -> ()
    %c0_6 = arith.constant 0 : index
    %c0_7 = arith.constant 0 : index
    %c0_8 = arith.constant 0 : index
    %c0_9 = arith.constant 0 : index
    %10 = vector.load %arg7[%c0_6, %c0_7, %c0_8, %c0_9] : memref<1x4x1x8xf32, #tpu.memory_space<vmem>>, vector<1x4x1x8xf32>
    %11 = vector.shape_cast %10 : vector<1x4x1x8xf32> to vector<4x1x8xf32>
    %12 = vector.broadcast %11 : vector<4x1x8xf32> to vector<4x8x8xf32>
    %13 = arith.addf %9, %12 : vector<4x8x8xf32>
    %c0_10 = arith.constant 0 : index
    %c0_11 = arith.constant 0 : index
    %c0_12 = arith.constant 0 : index
    %c0_13 = arith.constant 0 : index
    %14 = vector.load %arg8[%c0_10, %c0_11, %c0_12, %c0_13] : memref<1x4x32x8xf32, #tpu.memory_space<vmem>>, vector<1x4x32x8xf32>
    %15 = vector.shape_cast %14 : vector<1x4x32x8xf32> to vector<4x32x8xf32>
    "tpu.trace_start"() <{level = 10 : i32, message = "hse,hed->hsd"}> : () -> ()
    %cst_14 = arith.constant dense<0.000000e+00> : vector<4x8x8xf32>
    %16 = tpu.matmul %6, %15, %cst_14 {dimension_numbers = #tpu.dot_dimension_numbers<[2], [1], [1], [2], [0, 0, 0, 1, 1, 2], [0], [0]>} : vector<4x8x32xf32>, vector<4x32x8xf32>, vector<4x8x8xf32> -> vector<4x8x8xf32>
    "tpu.trace_stop"() : () -> ()
    %c0_15 = arith.constant 0 : index
    %c0_16 = arith.constant 0 : index
    %c0_17 = arith.constant 0 : index
    %c0_18 = arith.constant 0 : index
    %17 = vector.load %arg9[%c0_15, %c0_16, %c0_17, %c0_18] : memref<1x4x1x8xf32, #tpu.memory_space<vmem>>, vector<1x4x1x8xf32>
    %18 = vector.shape_cast %17 : vector<1x4x1x8xf32> to vector<4x1x8xf32>
    %19 = vector.broadcast %18 : vector<4x1x8xf32> to vector<4x8x8xf32>
    %20 = arith.addf %16, %19 : vector<4x8x8xf32>
    %c0_19 = arith.constant 0 : index
    %c0_20 = arith.constant 0 : index
    %c0_21 = arith.constant 0 : index
    %c0_22 = arith.constant 0 : index
    %21 = vector.load %arg10[%c0_19, %c0_20, %c0_21, %c0_22] : memref<1x4x32x8xf32, #tpu.memory_space<vmem>>, vector<1x4x32x8xf32>
    %22 = vector.shape_cast %21 : vector<1x4x32x8xf32> to vector<4x32x8xf32>
    "tpu.trace_start"() <{level = 10 : i32, message = "hse,hed->hsd"}> : () -> ()
    %cst_23 = arith.constant dense<0.000000e+00> : vector<4x8x8xf32>
    %23 = tpu.matmul %6, %22, %cst_23 {dimension_numbers = #tpu.dot_dimension_numbers<[2], [1], [1], [2], [0, 0, 0, 1, 1, 2], [0], [0]>} : vector<4x8x32xf32>, vector<4x32x8xf32>, vector<4x8x8xf32> -> vector<4x8x8xf32>
    "tpu.trace_stop"() : () -> ()
    %c0_24 = arith.constant 0 : index
    %c0_25 = arith.constant 0 : index
    %c0_26 = arith.constant 0 : index
    %c0_27 = arith.constant 0 : index
    %24 = vector.load %arg11[%c0_24, %c0_25, %c0_26, %c0_27] : memref<1x4x1x8xf32, #tpu.memory_space<vmem>>, vector<1x4x1x8xf32>
    %25 = vector.shape_cast %24 : vector<1x4x1x8xf32> to vector<4x1x8xf32>
    %26 = vector.broadcast %25 : vector<4x1x8xf32> to vector<4x8x8xf32>
    %27 = arith.addf %23, %26 : vector<4x8x8xf32>
    "tpu.trace_start"() <{level = 10 : i32, message = "hsd,htd->hst"}> : () -> ()
    %cst_28 = arith.constant dense<0.000000e+00> : vector<4x8x8xf32>
    %28 = tpu.matmul %13, %20, %cst_28 {dimension_numbers = #tpu.dot_dimension_numbers<[2], [2], [1], [1], [0, 0, 0, 1, 1, 1], [0], [0]>} : vector<4x8x8xf32>, vector<4x8x8xf32>, vector<4x8x8xf32> -> vector<4x8x8xf32>
    "tpu.trace_stop"() : () -> ()
    %cst_29 = arith.constant 0.353553385 : f32
    %29 = vector.broadcast %cst_29 : f32 to vector<4x8x8xf32>
    %30 = arith.mulf %28, %29 : vector<4x8x8xf32>
    %c2_i32 = arith.constant 2 : i32
    %31 = arith.cmpi slt, %arg1, %c2_i32 : i32
    %cst_30 = arith.constant 1.000000e+00 : f32
    %cst_31 = arith.constant 0.000000e+00 : f32
    %32 = arith.select %31, %cst_30, %cst_31 : f32
    %c0_32 = arith.constant 0 : index
    %c0_33 = arith.constant 0 : index
    %c0_34 = arith.constant 0 : index
    %33 = vector.load %arg2[%c0_32, %c0_33, %c0_34] : memref<1x1x8xf32, #tpu.memory_space<vmem>>, vector<1x1x8xf32>
    %34 = vector.broadcast %32 : f32 to vector<1x1x8xf32>
    %35 = arith.mulf %33, %34 : vector<1x1x8xf32>
    %36 = vector.broadcast %35 : vector<1x1x8xf32> to vector<4x8x8xf32>
    %37 = arith.addf %30, %36 : vector<4x8x8xf32>
    %cst_35 = arith.constant dense<0xFF800000> : vector<4x8xf32>
    %38 = vector.multi_reduction <maximumf>, %37, %cst_35 [2] : vector<4x8x8xf32> to vector<4x8xf32>
    %39 = vector.shape_cast %38 : vector<4x8xf32> to vector<4x8x1xf32>
    %40 = vector.broadcast %39 : vector<4x8x1xf32> to vector<4x8x8xf32>
    %41 = arith.subf %37, %40 : vector<4x8x8xf32>
    %42 = math.exp %41 : vector<4x8x8xf32>
    %cst_36 = arith.constant dense<0.000000e+00> : vector<4x8xf32>
    %43 = vector.multi_reduction <add>, %42, %cst_36 [2] : vector<4x8x8xf32> to vector<4x8xf32>
    %44 = vector.shape_cast %43 : vector<4x8xf32> to vector<4x8x1xf32>
    %45 = vector.broadcast %44 : vector<4x8x1xf32> to vector<4x8x8xf32>
    %46 = arith.divf %42, %45 : vector<4x8x8xf32>
    "tpu.trace_start"() <{level = 10 : i32, message = "hst,htd->hsd"}> : () -> ()
    %cst_37 = arith.constant dense<0.000000e+00> : vector<4x8x8xf32>
    %47 = tpu.matmul %46, %27, %cst_37 {dimension_numbers = #tpu.dot_dimension_numbers<[2], [1], [1], [2], [0, 0, 0, 1, 1, 2], [0], [0]>} : vector<4x8x8xf32>, vector<4x8x8xf32>, vector<4x8x8xf32> -> vector<4x8x8xf32>
    "tpu.trace_stop"() : () -> ()
    %c0_38 = arith.constant 0 : index
    %c0_39 = arith.constant 0 : index
    %c0_40 = arith.constant 0 : index
    %c0_41 = arith.constant 0 : index
    %48 = vector.load %arg12[%c0_38, %c0_39, %c0_40, %c0_41] : memref<1x4x8x32xf32, #tpu.memory_space<vmem>>, vector<1x4x8x32xf32>
    %49 = vector.shape_cast %48 : vector<1x4x8x32xf32> to vector<4x8x32xf32>
    "tpu.trace_start"() <{level = 10 : i32, message = "hsd,hde->hse"}> : () -> ()
    %cst_42 = arith.constant dense<0.000000e+00> : vector<4x8x32xf32>
    %50 = tpu.matmul %47, %49, %cst_42 {dimension_numbers = #tpu.dot_dimension_numbers<[2], [1], [1], [2], [0, 0, 0, 1, 1, 2], [0], [0]>} : vector<4x8x8xf32>, vector<4x8x32xf32>, vector<4x8x32xf32> -> vector<4x8x32xf32>
    "tpu.trace_stop"() : () -> ()
    %cst_43 = arith.constant dense<0.000000e+00> : vector<8x32xf32>
    %51 = vector.multi_reduction <add>, %50, %cst_43 [0] : vector<4x8x32xf32> to vector<8x32xf32>
    %c0_44 = arith.constant 0 : index
    %c0_45 = arith.constant 0 : index
    %c0_46 = arith.constant 0 : index
    %52 = vector.load %arg13[%c0_44, %c0_45, %c0_46] : memref<1x1x32xf32, #tpu.memory_space<vmem>>, vector<1x1x32xf32>
    %53 = vector.shape_cast %52 : vector<1x1x32xf32> to vector<1x32xf32>
    %54 = vector.broadcast %53 : vector<1x32xf32> to vector<8x32xf32>
    %55 = arith.addf %51, %54 : vector<8x32xf32>
    %56 = arith.addf %3, %55 : vector<8x32xf32>
    %c0_47 = arith.constant 0 : index
    %c0_48 = arith.constant 0 : index
    %c0_49 = arith.constant 0 : index
    %57 = vector.load %arg14[%c0_47, %c0_48, %c0_49] : memref<1x1x32xf32, #tpu.memory_space<vmem>>, vector<1x1x32xf32>
    %58 = vector.shape_cast %57 : vector<1x1x32xf32> to vector<1x32xf32>
    %c0_50 = arith.constant 0 : index
    %c0_51 = arith.constant 0 : index
    %c0_52 = arith.constant 0 : index
    %59 = vector.load %arg15[%c0_50, %c0_51, %c0_52] : memref<1x1x32xf32, #tpu.memory_space<vmem>>, vector<1x1x32xf32>
    %60 = vector.shape_cast %59 : vector<1x1x32xf32> to vector<1x32xf32>
    %cst_53 = arith.constant dense<0.000000e+00> : vector<8xf32>
    %61 = vector.multi_reduction <add>, %56, %cst_53 [1] : vector<8x32xf32> to vector<8xf32>
    %62 = vector.shape_cast %61 : vector<8xf32> to vector<8x1xf32>
    %cst_54 = arith.constant 3.200000e+01 : f32
    %63 = vector.broadcast %cst_54 : f32 to vector<8x1xf32>
    %64 = arith.divf %62, %63 : vector<8x1xf32>
    %65 = vector.broadcast %64 : vector<8x1xf32> to vector<8x32xf32>
    %66 = arith.subf %56, %65 : vector<8x32xf32>
    %67 = arith.mulf %66, %66 : vector<8x32xf32>
    %cst_55 = arith.constant dense<0.000000e+00> : vector<8xf32>
    %68 = vector.multi_reduction <add>, %67, %cst_55 [1] : vector<8x32xf32> to vector<8xf32>
    %69 = vector.shape_cast %68 : vector<8xf32> to vector<8x1xf32>
    %cst_56 = arith.constant 3.200000e+01 : f32
    %70 = vector.broadcast %cst_56 : f32 to vector<8x1xf32>
    %71 = arith.divf %69, %70 : vector<8x1xf32>
    %72 = vector.broadcast %64 : vector<8x1xf32> to vector<8x32xf32>
    %73 = arith.subf %56, %72 : vector<8x32xf32>
    %cst_57 = arith.constant 9.99999974E-6 : f32
    %74 = vector.broadcast %cst_57 : f32 to vector<8x1xf32>
    %75 = arith.addf %71, %74 : vector<8x1xf32>
    %76 = math.rsqrt %75 : vector<8x1xf32>
    %77 = vector.broadcast %76 : vector<8x1xf32> to vector<8x32xf32>
    %78 = arith.mulf %73, %77 : vector<8x32xf32>
    %79 = vector.broadcast %58 : vector<1x32xf32> to vector<8x32xf32>
    %80 = arith.mulf %78, %79 : vector<8x32xf32>
    %81 = vector.broadcast %60 : vector<1x32xf32> to vector<8x32xf32>
    %82 = arith.addf %80, %81 : vector<8x32xf32>
    %83 = arith.truncf %82 : vector<8x32xf32> to vector<8x32xbf16>
    %c0_58 = arith.constant 0 : index
    %c0_59 = arith.constant 0 : index
    %c0_60 = arith.constant 0 : index
    %84 = vector.load %arg16[%c0_58, %c0_59, %c0_60] : memref<1x32x2048xbf16, #tpu.memory_space<vmem>>, vector<1x32x2048xbf16>
    %85 = vector.shape_cast %84 : vector<1x32x2048xbf16> to vector<32x2048xbf16>
    %cst_61 = arith.constant dense<0.000000e+00> : vector<8x2048xf32>
    %86 = tpu.matmul %83, %85, %cst_61 {dimension_numbers = #tpu.dot_dimension_numbers<[1], [0], [0], [1], [0, 0, 1, 1], [], []>} : vector<8x32xbf16>, vector<32x2048xbf16>, vector<8x2048xf32> -> vector<8x2048xf32>
    %c0_62 = arith.constant 0 : index
    %c0_63 = arith.constant 0 : index
    %c0_64 = arith.constant 0 : index
    %87 = vector.load %arg17[%c0_62, %c0_63, %c0_64] : memref<1x1x2048xf32, #tpu.memory_space<vmem>>, vector<1x1x2048xf32>
    %88 = vector.shape_cast %87 : vector<1x1x2048xf32> to vector<1x2048xf32>
    %89 = vector.broadcast %88 : vector<1x2048xf32> to vector<8x2048xf32>
    %90 = arith.addf %86, %89 : vector<8x2048xf32>
    %cst_65 = arith.constant 0.000000e+00 : f32
    %91 = vector.broadcast %cst_65 : f32 to vector<8x2048xf32>
    %92 = arith.maximumf %90, %91 : vector<8x2048xf32>
    %93 = arith.truncf %92 : vector<8x2048xf32> to vector<8x2048xbf16>
    %c0_66 = arith.constant 0 : index
    %c0_67 = arith.constant 0 : index
    %c0_68 = arith.constant 0 : index
    %94 = vector.load %arg18[%c0_66, %c0_67, %c0_68] : memref<1x2048x32xbf16, #tpu.memory_space<vmem>>, vector<1x2048x32xbf16>
    %95 = vector.shape_cast %94 : vector<1x2048x32xbf16> to vector<2048x32xbf16>
    %cst_69 = arith.constant dense<0.000000e+00> : vector<8x32xf32>
    %96 = tpu.matmul %93, %95, %cst_69 {dimension_numbers = #tpu.dot_dimension_numbers<[1], [0], [0], [1], [0, 0, 1, 1], [], []>} : vector<8x2048xbf16>, vector<2048x32xbf16>, vector<8x32xf32> -> vector<8x32xf32>
    %c0_70 = arith.constant 0 : index
    %c0_71 = arith.constant 0 : index
    %c0_72 = arith.constant 0 : index
    %97 = vector.load %arg19[%c0_70, %c0_71, %c0_72] : memref<1x1x32xf32, #tpu.memory_space<vmem>>, vector<1x1x32xf32>
    %98 = vector.shape_cast %97 : vector<1x1x32xf32> to vector<1x32xf32>
    %99 = vector.broadcast %98 : vector<1x32xf32> to vector<8x32xf32>
    %100 = arith.addf %96, %99 : vector<8x32xf32>
    %101 = arith.addf %82, %100 : vector<8x32xf32>
    %c0_73 = arith.constant 0 : index
    %c0_74 = arith.constant 0 : index
    %c0_75 = arith.constant 0 : index
    %102 = vector.load %arg20[%c0_73, %c0_74, %c0_75] : memref<1x1x32xf32, #tpu.memory_space<vmem>>, vector<1x1x32xf32>
    %103 = vector.shape_cast %102 : vector<1x1x32xf32> to vector<1x32xf32>
    %c0_76 = arith.constant 0 : index
    %c0_77 = arith.constant 0 : index
    %c0_78 = arith.constant 0 : index
    %104 = vector.load %arg21[%c0_76, %c0_77, %c0_78] : memref<1x1x32xf32, #tpu.memory_space<vmem>>, vector<1x1x32xf32>
    %105 = vector.shape_cast %104 : vector<1x1x32xf32> to vector<1x32xf32>
    %cst_79 = arith.constant dense<0.000000e+00> : vector<8xf32>
    %106 = vector.multi_reduction <add>, %101, %cst_79 [1] : vector<8x32xf32> to vector<8xf32>
    %107 = vector.shape_cast %106 : vector<8xf32> to vector<8x1xf32>
    %cst_80 = arith.constant 3.200000e+01 : f32
    %108 = vector.broadcast %cst_80 : f32 to vector<8x1xf32>
    %109 = arith.divf %107, %108 : vector<8x1xf32>
    %110 = vector.broadcast %109 : vector<8x1xf32> to vector<8x32xf32>
    %111 = arith.subf %101, %110 : vector<8x32xf32>
    %112 = arith.mulf %111, %111 : vector<8x32xf32>
    %cst_81 = arith.constant dense<0.000000e+00> : vector<8xf32>
    %113 = vector.multi_reduction <add>, %112, %cst_81 [1] : vector<8x32xf32> to vector<8xf32>
    %114 = vector.shape_cast %113 : vector<8xf32> to vector<8x1xf32>
    %cst_82 = arith.constant 3.200000e+01 : f32
    %115 = vector.broadcast %cst_82 : f32 to vector<8x1xf32>
    %116 = arith.divf %114, %115 : vector<8x1xf32>
    %117 = vector.broadcast %109 : vector<8x1xf32> to vector<8x32xf32>
    %118 = arith.subf %101, %117 : vector<8x32xf32>
    %cst_83 = arith.constant 9.99999974E-6 : f32
    %119 = vector.broadcast %cst_83 : f32 to vector<8x1xf32>
    %120 = arith.addf %116, %119 : vector<8x1xf32>
    %121 = math.rsqrt %120 : vector<8x1xf32>
    %122 = vector.broadcast %121 : vector<8x1xf32> to vector<8x32xf32>
    %123 = arith.mulf %118, %122 : vector<8x32xf32>
    %124 = vector.broadcast %103 : vector<1x32xf32> to vector<8x32xf32>
    %125 = arith.mulf %123, %124 : vector<8x32xf32>
    %126 = vector.broadcast %105 : vector<1x32xf32> to vector<8x32xf32>
    %127 = arith.addf %125, %126 : vector<8x32xf32>
    %c0_84 = arith.constant 0 : index
    %c0_85 = arith.constant 0 : index
    %128 = vector.load %arg24[%c0_84, %c0_85] : memref<8x32xf32, #tpu.memory_space<vmem>>, vector<8x32xf32>
    tpu.vector_store %arg24[%c0_84, %c0_85], %127 {strides = array<i32>} : memref<8x32xf32, #tpu.memory_space<vmem>>, vector<8x32xf32>,
    %c3_i32 = arith.constant 3 : i32
    %129 = arith.cmpi eq, %arg1, %c3_i32 : i32
    %130 = arith.extui %129 : i1 to i32
    %c0_i32_86 = arith.constant 0 : i32
    %131 = arith.cmpi ne, %130, %c0_i32_86 : i32
    scf.if %131 {
      %c0_87 = arith.constant 0 : index
      %c0_88 = arith.constant 0 : index
      %c0_89 = arith.constant 0 : index
      %132 = vector.load %arg2[%c0_87, %c0_88, %c0_89] : memref<1x1x8xf32, #tpu.memory_space<vmem>>, vector<1x1x8xf32>
      %133 = vector.shape_cast %132 : vector<1x1x8xf32> to vector<1x8xf32>
      %cst_90 = arith.constant -5.000000e-01 : f32
      %134 = vector.broadcast %cst_90 : f32 to vector<1x8xf32>
      %135 = arith.cmpf olt, %133, %134 : vector<1x8xf32>
      %cst_91 = arith.constant 0.000000e+00 : f32
      %cst_92 = arith.constant 1.000000e+00 : f32
      %136 = vector.broadcast %cst_91 : f32 to vector<1x8xf32>
      %137 = vector.broadcast %cst_92 : f32 to vector<1x8xf32>
      %138 = arith.select %135, %136, %137 : vector<1x8xi1>, vector<1x8xf32>
      %cst_93 = arith.constant dense<0.000000e+00> : vector<1x32xf32>
      %139 = tpu.matmul %138, %127, %cst_93 {dimension_numbers = #tpu.dot_dimension_numbers<[1], [0], [0], [1], [0, 0, 1, 1], [], []>} : vector<1x8xf32>, vector<8x32xf32>, vector<1x32xf32> -> vector<1x32xf32>
      %cst_94 = arith.constant dense<0.000000e+00> : vector<1xf32>
      %140 = vector.multi_reduction <add>, %138, %cst_94 [1] : vector<1x8xf32> to vector<1xf32>
      %141 = vector.shape_cast %140 : vector<1xf32> to vector<1x1xf32>
      %cst_95 = arith.constant 1.000000e+00 : f32
      %142 = vector.broadcast %cst_95 : f32 to vector<1x1xf32>
      %143 = arith.maximumf %141, %142 : vector<1x1xf32>
      %144 = vector.broadcast %143 : vector<1x1xf32> to vector<1x32xf32>
      %145 = arith.divf %139, %144 : vector<1x32xf32>
      %146 = arith.mulf %145, %145 : vector<1x32xf32>
      %cst_96 = arith.constant dense<0.000000e+00> : vector<1xf32>
      %147 = vector.multi_reduction <add>, %146, %cst_96 [1] : vector<1x32xf32> to vector<1xf32>
      %148 = vector.shape_cast %147 : vector<1xf32> to vector<1x1xf32>
      %cst_97 = arith.constant 1.000000e-24 : f32
      %149 = vector.broadcast %cst_97 : f32 to vector<1x1xf32>
      %150 = arith.maximumf %148, %149 : vector<1x1xf32>
      %151 = math.rsqrt %150 : vector<1x1xf32>
      %152 = vector.broadcast %151 : vector<1x1xf32> to vector<1x32xf32>
      %153 = arith.mulf %145, %152 : vector<1x32xf32>
      %154 = arith.mulf %127, %127 : vector<8x32xf32>
      %cst_98 = arith.constant dense<0.000000e+00> : vector<8xf32>
      %155 = vector.multi_reduction <add>, %154, %cst_98 [1] : vector<8x32xf32> to vector<8xf32>
      %156 = vector.shape_cast %155 : vector<8xf32> to vector<8x1xf32>
      %cst_99 = arith.constant 1.000000e-24 : f32
      %157 = vector.broadcast %cst_99 : f32 to vector<8x1xf32>
      %158 = arith.maximumf %156, %157 : vector<8x1xf32>
      %159 = math.rsqrt %158 : vector<8x1xf32>
      %160 = vector.broadcast %159 : vector<8x1xf32> to vector<8x32xf32>
      %161 = arith.mulf %127, %160 : vector<8x32xf32>
      %162 = tpu.iota {dimensions = array<i32: 0>} : vector<8x1xi32>
      %c0_i32_100 = arith.constant 0 : i32
      %163 = vector.broadcast %c0_i32_100 : i32 to vector<8x1xi32>
      %164 = arith.cmpi eq, %162, %163 : vector<8x1xi32>
      %165 = vector.shape_cast %164 : vector<8x1xi1> to vector<8x1xi1>
      %166 = vector.broadcast %165 : vector<8x1xi1> to vector<8x32xi1>
      %167 = vector.shape_cast %153 : vector<1x32xf32> to vector<1x32xf32>
      %168 = vector.broadcast %167 : vector<1x32xf32> to vector<8x32xf32>
      %169 = arith.select %166, %168, %161 : vector<8x32xi1>, vector<8x32xf32>
      %c0_101 = arith.constant 0 : index
      %c0_102 = arith.constant 0 : index
      %c0_103 = arith.constant 0 : index
      %170 = vector.load %arg22[%c0_101, %c0_102, %c0_103] : memref<1x8x32xf32, #tpu.memory_space<vmem>>, vector<1x8x32xf32>
      %171 = vector.shape_cast %170 : vector<1x8x32xf32> to vector<8x32xf32>
      %172 = vector.shape_cast %169 : vector<8x32xf32> to vector<1x8x32xf32>
      tpu.vector_store %arg22[%c0_101, %c0_102, %c0_103], %172 {strides = array<i32>} : memref<1x8x32xf32, #tpu.memory_space<vmem>>, vector<1x8x32xf32>,
      %c0_104 = arith.constant 0 : index
      %c0_105 = arith.constant 0 : index
      %c0_106 = arith.constant 0 : index
      %173 = vector.load %arg23[%c0_104, %c0_105, %c0_106] : memref<1x1x32xf32, #tpu.memory_space<vmem>>, vector<1x1x32xf32>
      %174 = vector.shape_cast %173 : vector<1x1x32xf32> to vector<1x32xf32>
      %175 = vector.shape_cast %153 : vector<1x32xf32> to vector<1x1x32xf32>
      tpu.vector_store %arg23[%c0_104, %c0_105, %c0_106], %175 {strides = array<i32>} : memref<1x1x32xf32, #tpu.memory_space<vmem>>, vector<1x1x32xf32>,
    } else {
    }
    return
  }
  func.func @transform_0(%arg0: i32, %arg1: i32) -> (i32, i32, i32) {
    %c0_i32 = arith.constant 0 : i32
    %c0_i32_0 = arith.constant 0 : i32
    %c0_i32_1 = arith.constant 0 : i32
    return %arg0, %c0_i32, %c0_i32_0 : i32, i32, i32
  }
  func.func @transform_1(%arg0: i32, %arg1: i32) -> (i32, i32, i32) {
    %c0_i32 = arith.constant 0 : i32
    %c0_i32_0 = arith.constant 0 : i32
    %c0_i32_1 = arith.constant 0 : i32
    return %arg0, %c0_i32, %c0_i32_0 : i32, i32, i32
  }
  func.func @transform_2(%arg0: i32, %arg1: i32) -> (i32, i32) {
    %c0_i32 = arith.constant 0 : i32
    %c0_i32_0 = arith.constant 0 : i32
    %c0_i32_1 = arith.constant 0 : i32
    return %c0_i32, %c0_i32_0 : i32, i32
  }
  func.func @transform_3(%arg0: i32, %arg1: i32) -> (i32, i32) {
    %c0_i32 = arith.constant 0 : i32
    %c0_i32_0 = arith.constant 0 : i32
    %c0_i32_1 = arith.constant 0 : i32
    return %c0_i32, %c0_i32_0 : i32, i32
  }
  func.func @transform_4(%arg0: i32, %arg1: i32) -> (i32, i32, i32, i32) {
    %c0_i32 = arith.constant 0 : i32
    %c0_i32_0 = arith.constant 0 : i32
    %c0_i32_1 = arith.constant 0 : i32
    %c0_i32_2 = arith.constant 0 : i32
    return %arg1, %c0_i32, %c0_i32_0, %c0_i32_1 : i32, i32, i32, i32
  }
  func.func @transform_5(%arg0: i32, %arg1: i32) -> (i32, i32, i32, i32) {
    %c0_i32 = arith.constant 0 : i32
    %c0_i32_0 = arith.constant 0 : i32
    %c0_i32_1 = arith.constant 0 : i32
    %c0_i32_2 = arith.constant 0 : i32
    return %arg1, %c0_i32, %c0_i32_0, %c0_i32_1 : i32, i32, i32, i32
  }
  func.func @transform_6(%arg0: i32, %arg1: i32) -> (i32, i32, i32, i32) {
    %c0_i32 = arith.constant 0 : i32
    %c0_i32_0 = arith.constant 0 : i32
    %c0_i32_1 = arith.constant 0 : i32
    %c0_i32_2 = arith.constant 0 : i32
    return %arg1, %c0_i32, %c0_i32_0, %c0_i32_1 : i32, i32, i32, i32
  }
  func.func @transform_7(%arg0: i32, %arg1: i32) -> (i32, i32, i32, i32) {
    %c0_i32 = arith.constant 0 : i32
    %c0_i32_0 = arith.constant 0 : i32
    %c0_i32_1 = arith.constant 0 : i32
    %c0_i32_2 = arith.constant 0 : i32
    return %arg1, %c0_i32, %c0_i32_0, %c0_i32_1 : i32, i32, i32, i32
  }
  func.func @transform_8(%arg0: i32, %arg1: i32) -> (i32, i32, i32, i32) {
    %c0_i32 = arith.constant 0 : i32
    %c0_i32_0 = arith.constant 0 : i32
    %c0_i32_1 = arith.constant 0 : i32
    %c0_i32_2 = arith.constant 0 : i32
    return %arg1, %c0_i32, %c0_i32_0, %c0_i32_1 : i32, i32, i32, i32
  }
  func.func @transform_9(%arg0: i32, %arg1: i32) -> (i32, i32, i32, i32) {
    %c0_i32 = arith.constant 0 : i32
    %c0_i32_0 = arith.constant 0 : i32
    %c0_i32_1 = arith.constant 0 : i32
    %c0_i32_2 = arith.constant 0 : i32
    return %arg1, %c0_i32, %c0_i32_0, %c0_i32_1 : i32, i32, i32, i32
  }
  func.func @transform_10(%arg0: i32, %arg1: i32) -> (i32, i32, i32, i32) {
    %c0_i32 = arith.constant 0 : i32
    %c0_i32_0 = arith.constant 0 : i32
    %c0_i32_1 = arith.constant 0 : i32
    %c0_i32_2 = arith.constant 0 : i32
    return %arg1, %c0_i32, %c0_i32_0, %c0_i32_1 : i32, i32, i32, i32
  }
  func.func @transform_11(%arg0: i32, %arg1: i32) -> (i32, i32, i32) {
    %c0_i32 = arith.constant 0 : i32
    %c0_i32_0 = arith.constant 0 : i32
    %c0_i32_1 = arith.constant 0 : i32
    return %arg1, %c0_i32, %c0_i32_0 : i32, i32, i32
  }
  func.func @transform_12(%arg0: i32, %arg1: i32) -> (i32, i32, i32) {
    %c0_i32 = arith.constant 0 : i32
    %c0_i32_0 = arith.constant 0 : i32
    %c0_i32_1 = arith.constant 0 : i32
    return %arg1, %c0_i32, %c0_i32_0 : i32, i32, i32
  }
  func.func @transform_13(%arg0: i32, %arg1: i32) -> (i32, i32, i32) {
    %c0_i32 = arith.constant 0 : i32
    %c0_i32_0 = arith.constant 0 : i32
    %c0_i32_1 = arith.constant 0 : i32
    return %arg1, %c0_i32, %c0_i32_0 : i32, i32, i32
  }
  func.func @transform_14(%arg0: i32, %arg1: i32) -> (i32, i32, i32) {
    %c0_i32 = arith.constant 0 : i32
    %c0_i32_0 = arith.constant 0 : i32
    %c0_i32_1 = arith.constant 0 : i32
    return %arg1, %c0_i32, %c0_i32_0 : i32, i32, i32
  }
  func.func @transform_15(%arg0: i32, %arg1: i32) -> (i32, i32, i32) {
    %c0_i32 = arith.constant 0 : i32
    %c0_i32_0 = arith.constant 0 : i32
    %c0_i32_1 = arith.constant 0 : i32
    return %arg1, %c0_i32, %c0_i32_0 : i32, i32, i32
  }
  func.func @transform_16(%arg0: i32, %arg1: i32) -> (i32, i32, i32) {
    %c0_i32 = arith.constant 0 : i32
    %c0_i32_0 = arith.constant 0 : i32
    %c0_i32_1 = arith.constant 0 : i32
    return %arg1, %c0_i32, %c0_i32_0 : i32, i32, i32
  }
  func.func @transform_17(%arg0: i32, %arg1: i32) -> (i32, i32, i32) {
    %c0_i32 = arith.constant 0 : i32
    %c0_i32_0 = arith.constant 0 : i32
    %c0_i32_1 = arith.constant 0 : i32
    return %arg1, %c0_i32, %c0_i32_0 : i32, i32, i32
  }
  func.func @transform_18(%arg0: i32, %arg1: i32) -> (i32, i32, i32) {
    %c0_i32 = arith.constant 0 : i32
    %c0_i32_0 = arith.constant 0 : i32
    %c0_i32_1 = arith.constant 0 : i32
    return %arg1, %c0_i32, %c0_i32_0 : i32, i32, i32
  }
  func.func @transform_19(%arg0: i32, %arg1: i32) -> (i32, i32, i32) {
    %c0_i32 = arith.constant 0 : i32
    %c0_i32_0 = arith.constant 0 : i32
    %c0_i32_1 = arith.constant 0 : i32
    return %arg1, %c0_i32, %c0_i32_0 : i32, i32, i32
  }
  func.func @transform_20(%arg0: i32, %arg1: i32) -> (i32, i32, i32) {
    %c0_i32 = arith.constant 0 : i32
    %c0_i32_0 = arith.constant 0 : i32
    %c0_i32_1 = arith.constant 0 : i32
    return %arg0, %c0_i32, %c0_i32_0 : i32, i32, i32
  }
  func.func @transform_21(%arg0: i32, %arg1: i32) -> (i32, i32, i32) {
    %c0_i32 = arith.constant 0 : i32
    %c0_i32_0 = arith.constant 0 : i32
    %c0_i32_1 = arith.constant 0 : i32
    return %arg0, %c0_i32, %c0_i32_0 : i32, i32, i32
  }
}

</mosaic_0001>

<bundles_post_ra>
// kernel: baseline_forward.2
= control target key start
LH: loop header
LB: loop body
LE: loop exit
PB: predicated region body
PF: predicated region fallthrough
CT: control target
= control target key end

     0   :  { %s7594_s0 = inlined_call_operand.vmem [shape: f32[2,1,8], index: 0, kind: input, shape index: {}]   ;;  %s7595_s1 = inlined_call_operand.vmem [shape: f32[2,8,48], index: 1, kind: input, shape index: {}]   ;;  %s7596_s2 = inlined_call_operand.vmem [shape: f32[48,32], index: 2, kind: input, shape index: {}]   ;;  %s7597_s3 = inlined_call_operand.vmem [shape: f32[1,32], index: 3, kind: input, shape index: {}]   ;;  %s7598_s4 = inlined_call_operand.vmem [shape: f32[4,4,32,8], index: 4, kind: input, shape index: {}]   ;;  %s7599_s5 = inlined_call_operand.vmem [shape: f32[4,4,1,8], index: 5, kind: input, shape index: {}]   ;;  %s7600_s6 = inlined_call_operand.vmem [shape: f32[4,4,32,8], index: 6, kind: input, shape index: {}]   ;;  %s7601_s7 = inlined_call_operand.vmem [shape: f32[4,4,1,8], index: 7, kind: input, shape index: {}]   ;;  %s7602_s8 = inlined_call_operand.vmem [shape: f32[4,4,32,8], index: 8, kind: input, shape index: {}]   ;;  %s7603_s9 = inlined_call_operand.vmem [shape: f32[4,4,1,8], index: 9, kind: input, shape index: {}]   ;;  %s7604_s10 = inlined_call_operand.vmem [shape: f32[4,4,8,32], index: 10, kind: input, shape index: {}]   ;;  %s7605_s11 = inlined_call_operand.vmem [shape: f32[4,1,32], index: 11, kind: input, shape index: {}]   ;;  %s7606_s12 = inlined_call_operand.vmem [shape: f32[4,1,32], index: 12, kind: input, shape index: {}]   ;;  %s7607_s13 = inlined_call_operand.vmem [shape: f32[4,1,32], index: 13, kind: input, shape index: {}]   ;;  %s7608_s14 = inlined_call_operand.vmem [shape: bf16[4,32,2048], index: 14, kind: input, shape index: {}]   ;;  %s7609_s15 = inlined_call_operand.vmem [shape: f32[4,1,2048], index: 15, kind: input, shape index: {}]   ;;  %s7610_s16 = inlined_call_operand.vmem [shape: bf16[4,2048,32], index: 16, kind: input, shape index: {}]   ;;  %s7611_s17 = inlined_call_operand.vmem [shape: f32[4,1,32], index: 17, kind: input, shape index: {}]   ;;  %s7612_s18 = inlined_call_operand.vmem [shape: f32[4,1,32], index: 18, kind: input, shape index: {}]   ;;  %s7613_s19 = inlined_call_operand.vmem [shape: f32[4,1,32], index: 19, kind: input, shape index: {}]   ;;  %s7614_s20 = inlined_call_operand.hbm [shape: f32[2,8,32], index: 20, kind: output, shape index: {0}]   ;;  %s7615_s21 = inlined_call_operand.hbm [shape: f32[2,1,32], index: 21, kind: output, shape index: {1}]  }
   0x1   :  { %7638 = sst [smem:[#allocation27_spill]] %s7594_s0 }
   0x2   :  { %7639 = sst [smem:[#allocation28_spill]] %s7595_s1 }
   0x3   :  { %7640 = sst [smem:[#allocation29_spill]] %s7596_s2 }
   0x4   :  { %7641 = sst [smem:[#allocation30_spill]] %s7597_s3 }
   0x5   :  { %7642 = sst [smem:[#allocation31_spill]] %s7598_s4 }
   0x6   :  { %7643 = sst [smem:[#allocation32_spill]] %s7599_s5 }
   0x7   :  { %7644 = sst [smem:[#allocation33_spill]] %s7600_s6 }
   0x8   :  { %7645 = sst [smem:[#allocation34_spill]] %s7601_s7 }
   0x9   :  { %7646 = sst [smem:[#allocation35_spill]] %s7602_s8 }
   0xa   :  { %7647 = sst [smem:[#allocation36_spill]] %s7603_s9 }
   0xb   :  { %7648 = sst [smem:[#allocation37_spill]] %s7604_s10 }
   0xc   :  { %7649 = sst [smem:[#allocation38_spill]] %s7607_s13 }
   0xd   :  { %7650 = sst [smem:[#allocation39_spill]] %s7608_s14 }
   0xe   :  { %7651 = sst [smem:[#allocation40_spill]] %s7609_s15 }
   0xf   :  { %7652 = sst [smem:[#allocation41_spill]] %s7612_s18 }
  0x10   :  { %7653 = sst [smem:[#allocation42_spill]] %s7613_s19 }
  0x11   :  { %7654 = sst [smem:[#allocation43_spill]] %s7614_s20 }
  0x12   :  { %7655 = sst [smem:[#allocation44_spill]] %s7615_s21 }
  0x13   :  { %27 = vsyncpa [#allocation4], 0 }
  0x14   :  { %29 = vsyncpa [#allocation4 + $0x1], 0 }
  0x15   :  { %30 = vsyncpa [#allocation6], 0 }
  0x16   :  { %32 = vsyncpa [#allocation6 + $0x1], 0  ;;  %s6788_s2 = smov 0   ;;  %s6790_s25 = smov 0  }
  0x17   :  { %s6792_s26 = smov 0   ;;  %s6794_s27 = smov 0  }
  0x18   :  { %s6796_s3 = smov 0   ;;  %s6798_s28 = smov 0  }
  0x19   :  { %s6800_s29 = smov 0   ;;  %s6802_s0 = smov 0  }
  0x1a LB: > { %7656 = sst [smem:[#allocation9_spill]] %s6636_s2  ;;  %s5482_s4 = sadd.s32 4294967295, %s6664_s0   ;;  %s6664_s0 = sphi %s6802_s0, %s38_s0   ;;  %s6660_s29 = sphi %s6800_s29, %s7721_s29   ;;  %s6656_s28 = sphi %s6798_s28, %s7720_s28   ;;  %s6652_s3 = sphi %s6796_s3, %s7719_s3   ;;  %s6648_s27 = sphi %s6794_s27, %s7718_s27   ;;  %s6644_s26 = sphi %s6792_s26, %s7717_s26   ;;  %s6640_s25 = sphi %s6790_s25, %s7716_s25   ;;  %s6636_s2 = sphi %s6788_s2, %s7715_s2  }
  0x1b   : > { %7657 = sst [smem:[#allocation10_spill]] %s6640_s25  ;;  %s5483_s30 = sadd.s32 4294967294, %s6664_s0  }
  0x1c   : > { %7658 = sst [smem:[#allocation11_spill]] %s6644_s26  ;;  %s47_s5 = sadd.s32 1, %s6656_s28 }
  0x1d   : > { %7659 = sst [smem:[#allocation12_spill]] %s6648_s27  ;;  %p48_p0 = scmp.ge.s32.totalorder %s47_s5, 4 }
  0x1e   : > { %7660 = sst [smem:[#allocation13_spill]] %s6652_s3  ;;  %s50_s22 = sadd.s32 1, %s6660_s29 }
  0x1f   : > { %7661 = sst [smem:[#allocation14_spill]] %s6656_s28  ;;  %p577_p1 = scmp.ne.s32.totalorder %s6644_s26, %s6640_s25 }
  0x20   : > { %7662 = sst [smem:[#allocation15_spill]] %s6660_s29  ;;  %p578_p2 = scmp.eq.s32.totalorder %s5482_s4, 7 }
  0x21   : > { %7663 = sst [smem:[#allocation16_spill]] %s6664_s0  ;;  %s7723_s5 = smov (%p48_p0, %s47_s5), 0 }
  0x22   : > { %7664 = sst [smem:[#allocation17_spill]] %s7723_s5  ;;  %s7725_s22 = smov (!%p48_p0, %s50_s22), %s6660_s29 }
  0x23   : > { %p6837_p3 = por %p578_p2, %p577_p1  ;;  %p583_p4 = scmp.ne.s32.totalorder %s6640_s25, %s6636_s2 }
  0x24   : > { %p52_p5 = scmp.ge.s32.totalorder %s7725_s22, 2  ;;  %p584_p6 = scmp.eq.s32.totalorder %s5483_s30, 7 }
  0x25   : > { %s7665_s23 = scalar_select %p6837_p3, 1, 0 }
  0x26   : > { %p5486_p7 = scmp.ge.s32.totalorder %s6664_s0, 1  ;;  %p759_p8 = scmp.lt.s32.totalorder %s6664_s0, 9 }
  0x27   : > { %7666 = sst [smem:[#allocation18_spill]] %s7665_s23  ;;  %s7727_s22 = smov (%p52_p5, %s7725_s22), 0 }
  0x28   : > { %7667 = sst [smem:[#allocation19_spill]] %s7727_s22  ;;  %p6847_p9 = por %p584_p6, %p583_p4 }
  0x29   : > { %p760_p10 = pnand %p5486_p7, %p759_p8  ;;  %s564_s24 = ssub.s32 %s6660_s29, %s7727_s22 }
  0x2a   : > { %s7668_s1 = scalar_select %p6847_p9, 1, 0 }
  0x2b   : > { %s567_s4 = sadd.s32 1, %s6644_s26  ;;  %p565_p11 = scmp.eq.s32.totalorder %s564_s24, 0 }
  0x2c   : > { %7669 = sst [smem:[#allocation20_spill]] %s7668_s1  ;;  %763 = sbr.rel (%p760_p10) target bundleno = 3130 (0xc3a), region = 100 }
  0x2d   : > { %s6855_s5 = scalar_select %p565_p11, %s6644_s26, %s567_s4  }
  0x2f   : > { %7670 = sst [smem:[#allocation21_spill]] %s6855_s5 }
  0x33   : > { %s6858_s30 = sand.u32 1, %s6640_s25   ;;  %p889_p12 = scmp.lt.s32.totalorder %s6652_s3, 1 }
  0x34   : > { %p896_p13 = scmp.lt.s32.totalorder %s6648_s27, 3  ;;  %s7671_s24 = sld [smem:[#allocation27_spill]] }
  0x35   : > { %s890_s2 = scalar_select %p889_p12, %s6652_s3, 1 }
  0x36   : > { %s6865_s1 = scalar_select %p896_p13, %s6648_s27, 3 }
  0x37   : > { %s5488_s5 = sshll.u32 %s890_s2, 3  ;;  %s7673_s28 = sld [smem:[#allocation28_spill]] }
  0x38   : > { %s5729_s21 = sshll.u32 %s6865_s1, 7  ;;  %s7674_s29 = sld [smem:[#allocation31_spill]] }
  0x39   : > { %s5491_s3 = sshll.u32 %s6865_s1, 2  ;;  %s7677_s6 = sld [smem:[#allocation33_spill]] }
  0x3a   : > { %s6870_s4 = scalar_lea.vmem %s7671_s24, %s890_s2  ;;  %s7675_s24 = sld [smem:[#allocation32_spill]] }
  0x3b   : > { %7672 = sst [smem:[#allocation22_spill]] %s6870_s4  ;;  %s7680_s8 = sld [smem:[#allocation35_spill]] }
  0x3c   : > { %s7678_s7 = sld [smem:[#allocation34_spill]]  ;;  %s7681_s9 = sld [smem:[#allocation36_spill]] }
  0x3d   : > { %s6875_s0 = scalar_lea.vmem %s7673_s28, %s5488_s5  ;;  %s5732_s18 = sshll.u32 %s6865_s1, 5 }
  0x3e   : > { %s6881_s22 = scalar_lea.vmem %s7674_s29, %s5729_s21  ;;  %s7683_s10 = sld [smem:[#allocation37_spill]] }
  0x3f   : > { %s6892_s25 = scalar_lea.vmem %s7677_s6, %s5729_s21  ;;  %s5733_s27 = sshll.u32 %s6865_s1, 8 }
  0x40   : > { %s6887_s4 = scalar_lea.vmem %s7675_s24, %s5491_s3  ;;  %s7685_s14 = sld [smem:[#allocation39_spill]] }
  0x41   : > { %7676 = sst [smem:[#allocation23_spill]] %s6887_s4  ;;  %s6902_s29 = scalar_lea.vmem %s7680_s8, %s5729_s21 }
  0x42   : > { %s6897_s20 = scalar_lea.vmem %s7678_s7, %s5491_s3  ;;  %s6907_s24 = scalar_lea.vmem %s7681_s9, %s5491_s3 }
  0x43   : > { %7679 = sst [smem:[#allocation24_spill]] %s6897_s20  ;;  %s5502_s9 = sshll.u32 %s6865_s1, 4 }
  0x44   : > { %7682 = sst [smem:[#allocation25_spill]] %s6907_s24  ;;  %s6913_s26 = scalar_lea.vmem %s7683_s10, %s5732_s18 }
  0x45   : > { %s7686_s15 = sld [smem:[#allocation40_spill]]  ;;  %s5734_s28 = sshll.u32 %s6865_s1, 10 }
  0x46   : > { %s6932_s6 = scalar_lea.vmem %s7685_s14, %s5733_s27  ;;  %s953_s21 = scalar_lea.vmem %s7611_s17, %s6865_s1 }
  0x47   : > { %s6947_s19 = scalar_lea.vmem %s7610_s16, %s5734_s28  ;;  %s7688_s20 = sld [smem:[#allocation41_spill]] }
  0x48   : > { %s7689_s13 = sld [smem:[#allocation42_spill]] }
  0x4b   : > { %s6937_s7 = scalar_lea.vmem %s7686_s15, %s5502_s9  ;;  %s7690_s9 = sshll.u32 %s6858_s30, 3 }
  0x4c   : > { %7687 = sst [smem:[#allocation26_spill]] %s6937_s7  ;;  %s6959_s2 = scalar_lea.vmem [#allocation3], %s7690_s9 }
  0x4d   : > { %s956_s24 = scalar_lea.vmem %s7688_s20, %s6865_s1  ;;  %s888_s15 = scalar_lea.vmem [#allocation5], %s6858_s30 }
  0x4e   : > { %s959_s18 = scalar_lea.vmem %s7689_s13, %s6865_s1  ;;  %s7691_s7 = sld [smem:[#allocation12_spill]] }
  0x54   : > { %p5505_p0 = scmp.ne.s32.totalorder %s7691_s7, 0 }
  0x55   : > { %s7692_s8 = sld [smem:[#allocation29_spill]] (!%p5505_p0)  ;;  %v6666_v3 = vmov (!%p5505_p0), 0.0|0.0   ;;  %vm6667_vm0 = vmmov (!%p5505_p0), 0   ;;  %v6668_v6 = vmov (!%p5505_p0), 0.0   ;;  %v965_v11 = vld [vmem:[%s6875_s0] sm:$0xff] (!%p5505_p0)  ;;  %vm979_vm1 = vcmask (!%p5505_p0), 392192  }
  0x56   : > { %964 = sbr.rel (%p5505_p0) target bundleno = 320 (0x140), region = 104  ;;  %6216 = vmatprep.subr.bf16.mxu0 (!%p5505_p0), %v6666_v3  ;;  %6016 = vmatprep.mubr.msk.f32.mxu0 (!%p5505_p0), %vm6667_vm0, %v6668_v6  ;;  %s7693_s28 = sld [smem:[#allocation30_spill]] (!%p5505_p0)  ;;  %vm1053_vm2 = vcmask (!%p5505_p0), 261120  }
  0x5b   : > { %v966_v0 = vld [vmem:[%s7692_s8] sm:$0xff] (!%p5505_p0)  ;;  %v967_v1 = vld [vmem:[%s7692_s8 + $0x8] sm:$0xff] (!%p5505_p0)  ;;  %v968_v2 = vld [vmem:[%s7692_s8 + $0x10] sm:$0xff] (!%p5505_p0) }
  0x5c   : > { %v6217_v4 = vpack.c.bf16 (!%p5505_p0), %v967_v1, %v966_v0  ;;  %v969_v5 = vld [vmem:[%s7692_s8 + $0x18] sm:$0xff] (!%p5505_p0)  ;;  %v970_v8 = vld [vmem:[%s7692_s8 + $0x20] sm:$0xff] (!%p5505_p0)  ;;  %v971_v9 = vld [vmem:[%s7692_s8 + $0x28] sm:$0xff] (!%p5505_p0) }
  0x5d   : > { %v6220_v7 = vpack.c.bf16 %v969_v5, %v968_v2  ;;  %v6223_v10 = vpack.c.bf16 %v971_v9, %v970_v8  ;;  %v5506_v12 = vld [vmem:[%s7693_s28] ss:$0 sm:$0xff] }
  0x5e   : > { %6218 = vmatpush3.bf16.msra.mxu0 %v6217_v4 }
  0x5f   : > { %6219 = vmatprep.subr.bf16.mxu0 %v6666_v3 }
  0x62   : > { %6221 = vmatpush3.bf16.msra.mxu0 %v6220_v7 }
  0x63   : > { %6222 = vmatprep.subr.bf16.mxu0 %v6666_v3 }
  0x66   : > { %6224 = vmatpush3.bf16.msra.mxu0 %v6223_v10 }
  0x69   : > { %6017 = vmatmul.mubr.msk.f32.vlgmr.msra.gmra.mrb[0].mxu0 %vm979_vm1, %v965_v11 }
 0x13c   : > { %v1049_v13 = vpop.f32.mrb[0].mxu0 }
 0x13d   : > { %v1050_v14 = vadd.f32 %v5506_v12, %v1049_v13  ;;  %v6018_v15 = vpop.f32.mrb[1].mxu0 }
 0x13f   : > { %1054 = vst.msk [vmem:[#allocation2] sm:$0xff] %vm1053_vm2, %v1050_v14 }
 0x140 PF: > { %v1056_v16 = vld [vmem:[%s6881_s22] sm:$0xff]  ;;  %v1057_v17 = vld [vmem:[%s6881_s22 + $0x8] sm:$0xff]  ;;  %v6669_v19 = vmov 0.0|0.0   ;;  %v1058_v22 = vld [vmem:[%s6881_s22 + $0x10] sm:$0xff]  ;;  %vm6670_vm3 = vmmov 0   ;;  %v6671_v27 = vmov 0.0   ;;  %s7699_s13 = scalar_lea.vmem %s7605_s11, %s6865_s1  ;;  %s7700_s20 = scalar_lea.vmem %s7606_s12, %s6865_s1 }
 0x141   : > { %v1060_v18 = vld [vmem:[%s6881_s22 + $0x20] sm:$0xff]  ;;  %6225 = vmatprep.subr.bf16.mxu0 %v6669_v19  ;;  %6231 = vmatprep.subr.bf16.mxu1 %v6669_v19  ;;  %v6226_v20 = vpack.c.bf16 %v1057_v17, %v1056_v16  ;;  %v1061_v21 = vld [vmem:[%s6881_s22 + $0x28] sm:$0xff]  ;;  %v1059_v23 = vld [vmem:[%s6881_s22 + $0x18] sm:$0xff]  ;;  %vm1100_vm4 = vcmask 261120   ;;  %s7694_s0 = sld [smem:[#allocation24_spill]]  ;;  %vm2032_vm5 = vcmask 64512  }
 0x142   : > { %v6232_v24 = vpack.c.bf16 %v1061_v21, %v1060_v18  ;;  %v1062_v25 = vld [vmem:[%s6881_s22 + $0x30] sm:$0xff]  ;;  %v1063_v26 = vld [vmem:[%s6881_s22 + $0x38] sm:$0xff]  ;;  %6027 = vmatprep.mubr.msk.f32.mxu0 %vm6670_vm3, %v6671_v27  ;;  %6038 = vmatprep.mubr.msk.f32.mxu1 %vm6670_vm3, %v6671_v27  ;;  %v6229_v28 = vpack.c.bf16 %v1059_v23, %v1058_v22  ;;  %v1064_v30 = vld [vmem:[%s6881_s22 + $0x40] sm:$0xff]  ;;  %s7698_s4 = sld [smem:[#allocation22_spill]]  ;;  %s7701_s5 = sld [smem:[#allocation38_spill]] }
 0x143   : > { %6227 = vmatpush3.bf16.msra.mxu0 %v6226_v20  ;;  %v6235_v29 = vpack.c.bf16 %v1063_v26, %v1062_v25  ;;  %v1065_v31 = vld [vmem:[%s6881_s22 + $0x48] sm:$0xff]  ;;  %v1068_v32 = vld [vmem:[%s6881_s22 + $0x60] sm:$0xff]  ;;  %v1066_v37 = vld [vmem:[%s6881_s22 + $0x50] sm:$0xff] }
 0x144   : > { %6233 = vmatpush3.bf16.msra.mxu1 %v6232_v24  ;;  %6228 = vmatprep.subr.bf16.mxu0 %v6669_v19  ;;  %v1069_v33 = vld [vmem:[%s6881_s22 + $0x68] sm:$0xff]  ;;  %v6238_v35 = vpack.c.bf16 %v1065_v31, %v1064_v30  ;;  %v1067_v38 = vld [vmem:[%s6881_s22 + $0x58] sm:$0xff]  ;;  %v1070_v39 = vld [vmem:[%s6881_s22 + $0x70] sm:$0xff] }
 0x145   : > { %6234 = vmatprep.subr.bf16.mxu1 %v6669_v19  ;;  %v6244_v36 = vpack.c.bf16 %v1069_v33, %v1068_v32  ;;  %v1071_v40 = vld [vmem:[%s6881_s22 + $0x78] sm:$0xff]  ;;  %v6241_v41 = vpack.c.bf16 %v1067_v38, %v1066_v37  ;;  %v1384_v42 = vld [vmem:[%s6892_s25] sm:$0xff]  ;;  %v1385_v43 = vld [vmem:[%s6892_s25 + $0x8] sm:$0xff]  ;;  %s7695_s22 = sld [smem:[#allocation23_spill]] }
 0x146   : > { %v7005_v34 = vld [vmem:[#allocation2] sm:$0xff]  ;;  %v6247_v44 = vpack.c.bf16 %v1071_v40, %v1070_v39  ;;  %v1389_v46 = vld [vmem:[%s6892_s25 + $0x28] sm:$0xff]  ;;  %v1386_v47 = vld [vmem:[%s6892_s25 + $0x10] sm:$0xff]  ;;  %v6250_v49 = vpack.c.bf16 %v1385_v43, %v1384_v42 }
 0x147   : > { %6230 = vmatpush3.bf16.msra.mxu0 %v6229_v28  ;;  %v1388_v45 = vld [vmem:[%s6892_s25 + $0x20] sm:$0xff]  ;;  %v1387_v48 = vld [vmem:[%s6892_s25 + $0x18] sm:$0xff]  ;;  %v1390_v50 = vld [vmem:[%s6892_s25 + $0x30] sm:$0xff] }
 0x148   : > { %6236 = vmatpush3.bf16.msra.mxu1 %v6235_v29  ;;  %6237 = vmatprep.subr.bf16.mxu0 %v6669_v19  ;;  %v1391_v51 = vld [vmem:[%s6892_s25 + $0x38] sm:$0xff]  ;;  %v6256_v52 = vpack.c.bf16 %v1389_v46, %v1388_v45  ;;  %v1392_v53 = vld [vmem:[%s6892_s25 + $0x40] sm:$0xff]  ;;  %v1393_v54 = vld [vmem:[%s6892_s25 + $0x48] sm:$0xff]  ;;  %v6253_v55 = vpack.c.bf16 %v1387_v48, %v1386_v47  ;;  %s7702_s23 = scalar_lea.vmem %s7701_s5, %s6865_s1 }
 0x149   : > { %6243 = vmatprep.subr.bf16.mxu1 %v6669_v19  ;;  %v1396_v56 = vld [vmem:[%s6892_s25 + $0x60] sm:$0xff]  ;;  %v1397_v57 = vld [vmem:[%s6892_s25 + $0x68] sm:$0xff]  ;;  %v6259_v58 = vpack.c.bf16 %v1391_v51, %v1390_v50  ;;  %v1394_v59 = vld [vmem:[%s6892_s25 + $0x50] sm:$0xff]  ;;  %v6262_v61 = vpack.c.bf16 %v1393_v54, %v1392_v53 }
 0x14a   : > { %6028 = vmatmul.mubr.msk.f32.vlgmr.msra.gmra.mrb[0].mxu0 %vm1100_vm4, %v7005_v34  ;;  %v1395_v60 = vld [vmem:[%s6892_s25 + $0x58] sm:$0xff]  ;;  %v1398_v62 = vld [vmem:[%s6892_s25 + $0x70] sm:$0xff]  ;;  %v6268_v0 = vpack.c.bf16 %v1397_v57, %v1396_v56  ;;  %v1708_v1 = vld [vmem:[%s6902_s29] sm:$0xff] }
 0x14b   : > { %6039 = vmatmul.mubr.msk.f32.vlgmr.msra.gmra.mrb[0].mxu1 %vm1100_vm4, %v7005_v34  ;;  %6239 = vmatpush3.bf16.msra.mxu0 %v6238_v35  ;;  %v1399_v63 = vld [vmem:[%s6892_s25 + $0x78] sm:$0xff]  ;;  %v1709_v2 = vld [vmem:[%s6902_s29 + $0x8] sm:$0xff]  ;;  %v6265_v3 = vpack.c.bf16 %v1395_v60, %v1394_v59  ;;  %v1712_v4 = vld [vmem:[%s6902_s29 + $0x20] sm:$0xff]  ;;  %s7696_s25 = sld [smem:[#allocation25_spill]] }
 0x14c   : > { %6245 = vmatpush3.bf16.msra.mxu1 %v6244_v36  ;;  %6240 = vmatprep.subr.bf16.mxu0 %v6669_v19  ;;  %v1713_v5 = vld [vmem:[%s6902_s29 + $0x28] sm:$0xff]  ;;  %v6271_v6 = vpack.c.bf16 %v1399_v63, %v1398_v62  ;;  %v6274_v7 = vpack.c.bf16 %v1709_v2, %v1708_v1  ;;  %v1710_v9 = vld [vmem:[%s6902_s29 + $0x10] sm:$0xff]  ;;  %v1711_v10 = vld [vmem:[%s6902_s29 + $0x18] sm:$0xff] }
 0x14d   : > { %6246 = vmatprep.subr.bf16.mxu1 %v6669_v19  ;;  %6049 = vmatprep.mubr.msk.f32.mxu0 %vm6670_vm3, %v6671_v27  ;;  %v6280_v8 = vpack.c.bf16 %v1713_v5, %v1712_v4  ;;  %v1714_v11 = vld [vmem:[%s6902_s29 + $0x30] sm:$0xff]  ;;  %v6277_v12 = vpack.c.bf16 %v1711_v10, %v1710_v9  ;;  %v1715_v13 = vld [vmem:[%s6902_s29 + $0x38] sm:$0xff]  ;;  %v1716_v15 = vld [vmem:[%s6902_s29 + $0x40] sm:$0xff] }
 0x14e   : > { %6060 = vmatprep.mubr.msk.f32.mxu1 %vm6670_vm3, %v6671_v27  ;;  %v6283_v14 = vpack.c.bf16 %v1715_v13, %v1714_v11  ;;  %v1717_v16 = vld [vmem:[%s6902_s29 + $0x48] sm:$0xff]  ;;  %v1720_v17 = vld [vmem:[%s6902_s29 + $0x60] sm:$0xff]  ;;  %v1718_v22 = vld [vmem:[%s6902_s29 + $0x50] sm:$0xff] }
 0x14f   : > { %6242 = vmatpush3.bf16.msra.mxu0 %v6241_v41  ;;  %v6286_v18 = vpack.c.bf16 %v1717_v16, %v1716_v15  ;;  %v1721_v20 = vld [vmem:[%s6902_s29 + $0x68] sm:$0xff]  ;;  %v1719_v23 = vld [vmem:[%s6902_s29 + $0x58] sm:$0xff]  ;;  %v1722_v24 = vld [vmem:[%s6902_s29 + $0x70] sm:$0xff] }
 0x150   : > { %6248 = vmatpush3.bf16.msra.mxu1 %v6247_v44  ;;  %6249 = vmatprep.subr.bf16.mxu0 %v6669_v19  ;;  %v6292_v21 = vpack.c.bf16 %v1721_v20, %v1720_v17  ;;  %v6289_v25 = vpack.c.bf16 %v1719_v23, %v1718_v22  ;;  %v1723_v26 = vld [vmem:[%s6902_s29 + $0x78] sm:$0xff]  ;;  %v5516_v37 = vld [vmem:[%s7694_s0] ss:$0 sm:$0xff]  ;;  %v5517_v38 = vld [vmem:[%s7694_s0 + $0x1] ss:$0 sm:$0xff]  ;;  %s7697_s29 = sld [smem:[#allocation12_spill]] }
 0x151   : > { %6255 = vmatprep.subr.bf16.mxu1 %v6669_v19  ;;  %v6295_v28 = vpack.c.bf16 %v1723_v26, %v1722_v24  ;;  %v5509_v43 = vld [vmem:[%s7695_s22 + $0x1] ss:$0 sm:$0xff]  ;;  %v5518_v48 = vld [vmem:[%s7694_s0 + $0x2] ss:$0 sm:$0xff]  ;;  %v5524_v60 = vld [vmem:[%s7696_s25] ss:$0 sm:$0xff] }
 0x152   : > { %6050 = vmatmul.mubr.msk.f32.vlgmr.msra.gmra.mrb[2].mxu0 %vm1100_vm4, %v7005_v34  ;;  %v5510_v51 = vld [vmem:[%s7695_s22 + $0x2] ss:$0 sm:$0xff]  ;;  %v2343_v10 = vld [vmem:[%s7698_s4] sm:$0x1] }
 0x153   : > { %6061 = vmatmul.mubr.msk.f32.vlgmr.msra.gmra.mrb[2].mxu1 %vm1100_vm4, %v7005_v34  ;;  %6251 = vmatpush3.bf16.msra.mxu0 %v6250_v49  ;;  %v5519_v49 = vld [vmem:[%s7694_s0 + $0x3] ss:$0 sm:$0xff] }
 0x154   : > { %6257 = vmatpush3.bf16.msra.mxu1 %v6256_v52  ;;  %6252 = vmatprep.subr.bf16.mxu0 %v6669_v19 }
 0x155   : > { %6258 = vmatprep.subr.bf16.mxu1 %v6669_v19  ;;  %6071 = vmatprep.mubr.msk.f32.mxu0 %vm6670_vm3, %v6671_v27 }
 0x156   : > { %6082 = vmatprep.mubr.msk.f32.mxu1 %vm6670_vm3, %v6671_v27  ;;  %p2341_p1 = scmp.lt.s32.totalorder %s7697_s29, 2  ;;  %p5722_p2 = scmp.ne.s32.totalorder %s7697_s29, 3 }
 0x157   : > { %6254 = vmatpush3.bf16.msra.mxu0 %v6253_v55  ;;  %v5511_v55 = vld [vmem:[%s7695_s22 + $0x3] ss:$0 sm:$0xff]  ;;  %vm5136_vm6 = vcmask (!%p5722_p2), 57344   ;;  %vm6674_vm7 = vmmov (!%p5722_p2), 0   ;;  %vm5144_vm9 = vcmask (!%p5722_p2), 253952  }
 0x158   : > { %6260 = vmatpush3.bf16.msra.mxu1 %v6259_v58  ;;  %6261 = vmatprep.subr.bf16.mxu0 %v6669_v19  ;;  %s2342_s10 = scalar_select %p2341_p1, 1.0, 0.0 }
 0x159   : > { %6267 = vmatprep.subr.bf16.mxu1 %v6669_v19 }
 0x15a   : > { %6072 = vmatmul.mubr.msk.f32.vlgmr.msra.gmra.mrb[4].mxu0 %vm1100_vm4, %v7005_v34  ;;  %v2344_v11 = vstv %s2342_s10 }
 0x15b   : > { %6083 = vmatmul.mubr.msk.f32.vlgmr.msra.gmra.mrb[4].mxu1 %vm1100_vm4, %v7005_v34  ;;  %6263 = vmatpush3.bf16.msra.mxu0 %v6262_v61  ;;  %v5525_v61 = vld [vmem:[%s7696_s25 + $0x1] ss:$0 sm:$0xff] }
 0x15c   : > { %6269 = vmatpush3.bf16.msra.mxu1 %v6268_v0  ;;  %6264 = vmatprep.subr.bf16.mxu0 %v6669_v19 }
 0x15d   : > { %6270 = vmatprep.subr.bf16.mxu1 %v6669_v19  ;;  %6093 = vmatprep.mubr.msk.f32.mxu0 %vm6670_vm3, %v6671_v27 }
 0x15e   : > { %6104 = vmatprep.mubr.msk.f32.mxu1 %vm6670_vm3, %v6671_v27 }
 0x15f   : > { %6266 = vmatpush3.bf16.msra.mxu0 %v6265_v3 }
 0x160   : > { %6272 = vmatpush3.bf16.msra.mxu1 %v6271_v6  ;;  %6273 = vmatprep.subr.bf16.mxu0 %v6669_v19 }
 0x161   : > { %6279 = vmatprep.subr.bf16.mxu1 %v6669_v19 }
 0x162   : > { %6094 = vmatmul.mubr.msk.f32.vlgmr.msra.gmra.mrb[6].mxu0 %vm1100_vm4, %v7005_v34 }
 0x163   : > { %6105 = vmatmul.mubr.msk.f32.vlgmr.msra.gmra.mrb[6].mxu1 %vm1100_vm4, %v7005_v34  ;;  %6275 = vmatpush3.bf16.msra.mxu0 %v6274_v7 }
 0x164   : > { %6281 = vmatpush3.bf16.msra.mxu1 %v6280_v8  ;;  %6276 = vmatprep.subr.bf16.mxu0 %v6669_v19  ;;  %v2347_v8 = vlaneseq }
 0x165   : > { %6282 = vmatprep.subr.bf16.mxu1 %v6669_v19  ;;  %6115 = vmatprep.mubr.msk.f32.mxu0 %vm6670_vm3, %v6671_v27 }
 0x166   : > { %6126 = vmatprep.mubr.msk.f32.mxu1 %vm6670_vm3, %v6671_v27  ;;  %v7150_v9 = vshrl.u32 %v2347_v8, 7  ;;  %v2692_v8 = vld [vmem:[%s6913_s26] sm:$0xff] }
 0x167   : > { %6278 = vmatpush3.bf16.msra.mxu0 %v6277_v12  ;;  %v2345_v12 = vmul.f32 %v2344_v11, %v2343_v10  ;;  %v2693_v10 = vld [vmem:[%s6913_s26 + $0x8] sm:$0xff]  ;;  %v2694_v11 = vld [vmem:[%s6913_s26 + $0x10] sm:$0xff] }
 0x168   : > { %6284 = vmatpush3.bf16.msra.mxu1 %v6283_v14  ;;  %6285 = vmatprep.subr.bf16.mxu0 %v6669_v19  ;;  %v7154_v13 = vsub.s32 0, %v7150_v9  ;;  %vm5160_vm10 = vcmp.eq.s32.totalorder (!%p5722_p2), %v7150_v9, 0 }
 0x169   : > { %6291 = vmatprep.subr.bf16.mxu1 %v6669_v19 }
 0x16a   : > { %6116 = vmatmul.mubr.msk.f32.vlgmr.msra.gmra.mrb[8].mxu0 %vm1100_vm4, %v7005_v34  ;;  %v2350_v14 = vrot.slane %v2345_v12, %v7154_v13 }
 0x16b   : > { %6127 = vmatmul.mubr.msk.f32.vlgmr.msra.gmra.mrb[8].mxu1 %vm1100_vm4, %v7005_v34  ;;  %6287 = vmatpush3.bf16.msra.mxu0 %v6286_v18 }
 0x16c   : > { %6293 = vmatpush3.bf16.msra.mxu1 %v6292_v21  ;;  %6288 = vmatprep.subr.bf16.mxu0 %v6669_v19 }
 0x16d   : > { %6294 = vmatprep.subr.bf16.mxu1 %v6669_v19  ;;  %6137 = vmatprep.mubr.msk.f32.mxu0 %vm6670_vm3, %v6671_v27 }
 0x16e   : > { %6148 = vmatprep.mubr.msk.f32.mxu1 %vm6670_vm3, %v6671_v27 }
 0x16f   : > { %6290 = vmatpush3.bf16.msra.mxu0 %v6289_v25 }
 0x170   : > { %6296 = vmatpush3.bf16.msra.mxu1 %v6295_v28  ;;  %6151 = vmatprep.subr.mxu0 %v6671_v27 }
 0x171   : > { %6156 = vmatprep.subr.mxu1 %v6671_v27 }
 0x172   : > { %6138 = vmatmul.mubr.msk.f32.vlgmr.msra.gmra.mrb[10].mxu0 %vm1100_vm4, %v7005_v34 }
 0x173   : > { %6149 = vmatmul.mubr.msk.f32.vlgmr.msra.gmra.mrb[10].mxu1 %vm1100_vm4, %v7005_v34  ;;  %6153 = vmatprep.mubr.msk.f32.mxu0 %vm6670_vm3, %v6671_v27  ;;  %v5508_v34 = vld [vmem:[%s7695_s22] ss:$0 sm:$0xff] }
 0x174   : > { %6158 = vmatprep.mubr.msk.f32.mxu1 %vm6670_vm3, %v6671_v27 }
 0x21d   : > { %v1170_v19 = vpop.f32.mrb[0].mxu0 }
 0x21e   : > { %v6029_v29 = vpop.f32.mrb[1].mxu0  ;;  %v1240_v30 = vpop.f32.mrb[0].mxu1  ;;  %v1171_v46 = vadd.f32 %v5508_v34, %v1170_v19 }
 0x21f   : > { %v6040_v31 = vpop.f32.mrb[1].mxu1  ;;  %v1241_v47 = vadd.f32 %v5509_v43, %v1240_v30 }
 0x225   : > { %v1310_v32 = vpop.f32.mrb[2].mxu0 }
 0x226   : > { %v6051_v33 = vpop.f32.mrb[3].mxu0  ;;  %v1380_v35 = vpop.f32.mrb[2].mxu1  ;;  %v1311_v58 = vadd.f32 %v5510_v51, %v1310_v32 }
 0x227   : > { %v6062_v36 = vpop.f32.mrb[3].mxu1  ;;  %v1381_v59 = vadd.f32 %v5511_v55, %v1380_v35 }
 0x22d   : > { %v1494_v39 = vpop.f32.mrb[4].mxu0 }
 0x22e   : > { %v1495_v40 = vadd.f32 %v5516_v37, %v1494_v39  ;;  %v1564_v41 = vpop.f32.mrb[4].mxu1  ;;  %v6073_v42 = vpop.f32.mrb[5].mxu0 }
 0x22f   : > { %v1565_v44 = vadd.f32 %v5517_v38, %v1564_v41  ;;  %v6084_v45 = vpop.f32.mrb[5].mxu1 }
 0x230   : > { %6152 = vmatpush3.xpose.msk.msra.mxu0 %vm2032_vm5, %v1495_v40 }
 0x231   : > { %6157 = vmatpush3.xpose.msk.msra.mxu1 %vm2032_vm5, %v1565_v44  ;;  %6161 = vmatprep.subr.mxu0 %v6671_v27 }
 0x232   : > { %6166 = vmatprep.subr.mxu1 %v6671_v27 }
 0x233   : > { %6154 = vmatmul.mubr.msk.f32.vlgmr.msra.gmra.mrb[12].mxu0 %vm2032_vm5, %v1171_v46 }
 0x234   : > { %6159 = vmatmul.mubr.msk.f32.vlgmr.msra.gmra.mrb[12].mxu1 %vm2032_vm5, %v1241_v47  ;;  %6163 = vmatprep.mubr.msk.f32.mxu0 %vm6670_vm3, %v6671_v27 }
 0x235   : > { %v1634_v50 = vpop.f32.mrb[6].mxu0  ;;  %6168 = vmatprep.mubr.msk.f32.mxu1 %vm6670_vm3, %v6671_v27 }
 0x236   : > { %v1635_v52 = vadd.f32 %v5518_v48, %v1634_v50  ;;  %v1704_v53 = vpop.f32.mrb[6].mxu1  ;;  %v6095_v54 = vpop.f32.mrb[7].mxu0 }
 0x237   : > { %v1705_v56 = vadd.f32 %v5519_v49, %v1704_v53  ;;  %v6106_v57 = vpop.f32.mrb[7].mxu1 }
 0x238   : > { %6162 = vmatpush3.xpose.msk.msra.mxu0 %vm2032_vm5, %v1635_v52 }
 0x239   : > { %6167 = vmatpush3.xpose.msk.msra.mxu1 %vm2032_vm5, %v1705_v56  ;;  %6171 = vmatprep.subr.mxu0 %v6671_v27 }
 0x23a   : > { %6176 = vmatprep.subr.mxu1 %v6671_v27 }
 0x23b   : > { %6164 = vmatmul.mubr.msk.f32.vlgmr.msra.gmra.mrb[14].mxu0 %vm2032_vm5, %v1311_v58 }
 0x23c   : > { %6169 = vmatmul.mubr.msk.f32.vlgmr.msra.gmra.mrb[14].mxu1 %vm2032_vm5, %v1381_v59  ;;  %6173 = vmatprep.mubr.msk.f32.mxu0 %vm6670_vm3, %v6671_v27  ;;  %v5526_v59 = vld [vmem:[%s7696_s25 + $0x2] ss:$0 sm:$0xff] }
 0x23d   : > { %6178 = vmatprep.mubr.msk.f32.mxu1 %vm6670_vm3, %v6671_v27  ;;  %v1818_v62 = vpop.f32.mrb[8].mxu0 }
 0x23e   : > { %v1819_v63 = vadd.f32 %v5524_v60, %v1818_v62  ;;  %v6117_v0 = vpop.f32.mrb[9].mxu0  ;;  %v1888_v1 = vpop.f32.mrb[8].mxu1 }
 0x23f   : > { %v1889_v2 = vadd.f32 %v5525_v61, %v1888_v1  ;;  %v6128_v3 = vpop.f32.mrb[9].mxu1  ;;  %v5527_v0 = vld [vmem:[%s7696_s25 + $0x3] ss:$0 sm:$0xff] }
 0x240   : > { %6172 = vmatpush3.msra.mxu0 %v1819_v63 }
 0x241   : > { %6177 = vmatpush3.msra.mxu1 %v1889_v2  ;;  %6181 = vmatprep.subr.mxu0 %v6671_v27 }
 0x242   : > { %6186 = vmatprep.subr.mxu1 %v6671_v27 }
 0x245   : > { %v7145_v4 = vpop.f32.mrb[10].mxu0 }
 0x246   : > { %v7147_v5 = vpop.f32.mrb[10].mxu1  ;;  %v6139_v6 = vpop.f32.mrb[11].mxu0  ;;  %v1959_v63 = vadd.f32 %v5526_v59, %v7145_v4  ;;  %v3060_v59 = vld [vmem:[%s6932_s6 + $0xc8] sm:$0xff] }
 0x247   : > { %v6150_v7 = vpop.f32.mrb[11].mxu1  ;;  %v2029_v3 = vadd.f32 %v5527_v0, %v7147_v5  ;;  %v3045_v0 = vld [vmem:[%s6932_s6 + $0x50] sm:$0xff] }
 0x306   : > { %v2105_v15 = vpop.f32.mrb[12].mxu0 }
 0x307   : > { %v2337_v16 = vmul.f32 0.35355338, %v2105_v15  ;;  %v2181_v17 = vpop.f32.mrb[12].mxu1  ;;  %v6155_v18 = vpop.f32.mrb[13].mxu0  ;;  %v2695_v15 = vld [vmem:[%s6913_s26 + $0x18] sm:$0xff]  ;;  %s7706_s26 = sld [smem:[#allocation22_spill]] (!%p5722_p2) }
 0x308   : > { %v2338_v20 = vmul.f32 0.35355338, %v2181_v17  ;;  %v6160_v21 = vpop.f32.mrb[13].mxu1 }
 0x309   : > { %v2352_v22 = vadd.f32 %v2350_v14, %v2337_v16 }
 0x30a   : > { %v2353_v24 = vadd.f32 %v2350_v14, %v2338_v20 }
 0x30b   : > { %v2356_v23 = vsel %vm2032_vm5, %v2352_v22, -inf }
 0x30c   : > { %2357 = vmax.xlane.f32.xlu0 %v2356_v23  ;;  %v2359_v29 = vsel %vm2032_vm5, %v2353_v24, -inf }
 0x30e   : > { %v2257_v25 = vpop.f32.mrb[14].mxu0 }
 0x30f   : > { %v2339_v26 = vmul.f32 0.35355338, %v2257_v25  ;;  %v2333_v28 = vpop.f32.mrb[14].mxu1  ;;  %v6165_v19 = vpop.f32.mrb[15].mxu0 }
 0x310   : > { %v2340_v30 = vmul.f32 0.35355338, %v2333_v28  ;;  %v6170_v31 = vpop.f32.mrb[15].mxu1  ;;  %2360 = vmax.xlane.f32.xlu0 %v2359_v29 }
 0x311   : > { %v2354_v32 = vadd.f32 %v2350_v14, %v2339_v26 }
 0x312   : > { %v2355_v35 = vadd.f32 %v2350_v14, %v2340_v30 }
 0x313   : > { %v2362_v33 = vsel %vm2032_vm5, %v2354_v32, -inf }
 0x314   : > { %2363 = vmax.xlane.f32.xlu1 %v2362_v33  ;;  %v2365_v36 = vsel %vm2032_vm5, %v2355_v35, -inf }
 0x318   : > { %2366 = vmax.xlane.f32.xlu1 %v2365_v36  ;;  %v5548_v36 = vld [vmem:[%s7699_s13] ss:$0 sm:$0xff] }
 0x399   : > { %v2358_v37 = vpop.xlane.xlu0 %2357 }
 0x39a   : > { %v2368_v38 = vsub.f32 %v2352_v22, %v2358_v37 }
 0x39c   : > { %v2372_v39 = vmul.f32 1.442695, %v2368_v38 }
 0x39d   : > { %v2361_v34 = vpop.xlane.xlu0 %2360 }
 0x39e   : > { %6511 = vpow2.f32 %v2372_v39  ;;  %v2369_v40 = vsub.f32 %v2353_v24, %v2361_v34  ;;  %v6531_v34 = vld [vmem:[#allocation2] sm:$0xff] }
 0x3a0   : > { %v2374_v41 = vmul.f32 1.442695, %v2369_v40 }
 0x3a1   : > { %v2364_v42 = vpop.xlane.xlu1 %2363 }
 0x3a2   : > { %6513 = vpow2.f32 %v2374_v41  ;;  %v2370_v43 = vsub.f32 %v2354_v32, %v2364_v42 }
 0x3a4   : > { %v2376_v44 = vmul.f32 1.442695, %v2370_v43 }
 0x3a5   : > { %v2367_v45 = vpop.xlane.xlu1 %2366 }
 0x3a6   : > { %6515 = vpow2.f32 %v2376_v44  ;;  %v2371_v46 = vsub.f32 %v2355_v35, %v2367_v45 }
 0x3a8   : > { %v6512_v47 = vpop.eup %6511  ;;  %v2378_v48 = vmul.f32 1.442695, %v2371_v46 }
 0x3a9   : > { %v2380_v49 = vsel %vm2032_vm5, %v6512_v47, 0.0 }
 0x3aa   : > { %6517 = vpow2.f32 %v2378_v48  ;;  %2381 = vadd.xlane.f32.xlu0 %v2380_v49  ;;  %v3043_v48 = vld [vmem:[%s6932_s6 + $0x40] sm:$0xff]  ;;  %v3036_v49 = vld [vmem:[%s6932_s6 + $0x8] sm:$0xff] }
 0x3ac   : > { %v6514_v50 = vpop.eup %6513 }
 0x3ad   : > { %v2383_v51 = vsel %vm2032_vm5, %v6514_v50, 0.0 }
 0x3ae   : > { %2384 = vadd.xlane.f32.xlu1 %v2383_v51  ;;  %v3044_v51 = vld [vmem:[%s6932_s6 + $0x48] sm:$0xff] }
 0x3b0   : > { %v6516_v52 = vpop.eup %6515 }
 0x3b1   : > { %v2386_v53 = vsel %vm2032_vm5, %v6516_v52, 0.0 }
 0x3b2   : > { %2387 = vadd.xlane.f32.xlu0 %v2386_v53  ;;  %v5553_v53 = vcombine.low %v3036_v49, %v3044_v51 }
 0x3b4   : > { %v6518_v54 = vpop.eup %6517 }
 0x3b5   : > { %v2389_v55 = vsel %vm2032_vm5, %v6518_v54, 0.0 }
 0x3b6   : > { %2390 = vadd.xlane.f32.xlu1 %v2389_v55  ;;  %v3051_v55 = vld [vmem:[%s6932_s6 + $0x80] sm:$0xff] }
 0x437   : > { %v2382_v56 = vpop.xlane.xlu0 %2381 }
 0x438   : > { %6519 = vrcp.f32 %v2382_v56  ;;  %v3059_v56 = vld [vmem:[%s6932_s6 + $0xc0] sm:$0xff] }
 0x43b   : > { %v2385_v57 = vpop.xlane.xlu1 %2384 }
 0x43c   : > { %6521 = vrcp.f32 %v2385_v57  ;;  %v3052_v57 = vld [vmem:[%s6932_s6 + $0x88] sm:$0xff] }
 0x43f   : > { %v2388_v58 = vpop.xlane.xlu0 %2387 }
 0x440   : > { %6523 = vrcp.f32 %v2388_v58  ;;  %v5568_v58 = vcombine.high %v3051_v55, %v3059_v56 }
 0x442   : > { %v6520_v60 = vpop.eup %6519 }
 0x443   : > { %v2393_v61 = vmul.f32 %v6520_v60, %v6512_v47  ;;  %v2391_v62 = vpop.xlane.xlu1 %2390  ;;  %v3035_v47 = vld [vmem:[%s6932_s6] sm:$0xff]  ;;  %v5567_v60 = vcombine.low %v3051_v55, %v3059_v56 }
 0x444   : > { %6525 = vrcp.f32 %v2391_v62  ;;  %v5570_v62 = vcombine.high %v3052_v57, %v3060_v59 }
 0x445   : > { %6174 = vmatmul.mubr.msk.f32.vlgmr.msra.gmra.mrb[16].mxu0 %vm2032_vm5, %v2393_v61  ;;  %v5569_v61 = vcombine.low %v3052_v57, %v3060_v59 }
 0x446   : > { %v6522_v1 = vpop.eup %6521  ;;  %6182 = vmatpush3.msra.mxu0 %v1959_v63  ;;  %6183 = vmatprep.mubr.msk.f32.mxu0 %vm6670_vm3, %v6671_v27  ;;  %v3037_v63 = vld [vmem:[%s6932_s6 + $0x10] sm:$0xff] }
 0x447   : > { %v2395_v2 = vmul.f32 %v6522_v1, %v6514_v50  ;;  %6191 = vmatprep.subr.mxu0 %v6671_v27  ;;  %v5552_v50 = vcombine.high %v3035_v47, %v3043_v48  ;;  %v3038_v1 = vld [vmem:[%s6932_s6 + $0x18] sm:$0xff] }
 0x449   : > { %6179 = vmatmul.mubr.msk.f32.vlgmr.msra.gmra.mrb[16].mxu1 %vm2032_vm5, %v2395_v2  ;;  %v6672_v2 = vmov 0  }
 0x44a   : > { %v6524_v6 = vpop.eup %6523  ;;  %6187 = vmatpush3.msra.mxu1 %v2029_v3  ;;  %6188 = vmatprep.mubr.msk.f32.mxu1 %vm6670_vm3, %v6671_v27  ;;  %v5556_v3 = vcombine.high %v3037_v63, %v3045_v0 }
 0x44b   : > { %v2397_v4 = vmul.f32 %v6524_v6, %v6516_v52  ;;  %6196 = vmatprep.subr.mxu1 %v6671_v27  ;;  %v5551_v52 = vcombine.low %v3035_v47, %v3043_v48  ;;  %v3046_v6 = vld [vmem:[%s6932_s6 + $0x58] sm:$0xff] }
 0x44d   : > { %6184 = vmatmul.mubr.msk.f32.vlgmr.msra.gmra.mrb[18].mxu0 %vm2032_vm5, %v2397_v4  ;;  %v5555_v4 = vcombine.low %v3037_v63, %v3045_v0  ;;  %v6386_v63 = vld [vmem:[%s6947_s19 + $0x80] sm:$0xff]   ;;  %v6387_v0 = vld [vmem:[%s6947_s19 + $0x48] sm:$0xff]  }
 0x44e   : > { %v6526_v7 = vpop.eup %6525  ;;  %6193 = vmatprep.mubr.msk.f32.mxu0 %vm6670_vm3, %v6671_v27  ;;  %6192 = vmatpush3.msra.mxu0 %v2692_v8 }
 0x44f   : > { %v2399_v5 = vmul.f32 %v6526_v7, %v6518_v54  ;;  %6201 = vmatprep.subr.mxu0 %v6671_v27  ;;  %v5554_v54 = vcombine.high %v3036_v49, %v3044_v51  ;;  %v5557_v7 = vcombine.low %v3038_v1, %v3046_v6  ;;  %v3065_v51 = vld [vmem:[%s6932_s6 + $0xf0] sm:$0xff] }
 0x451   : > { %6189 = vmatmul.mubr.msk.f32.vlgmr.msra.gmra.mrb[18].mxu1 %vm2032_vm5, %v2399_v5  ;;  %v5558_v5 = vcombine.high %v3038_v1, %v3046_v6  ;;  %v6388_v1 = vld [vmem:[%s6947_s19 + $0xc8] sm:$0xff]   ;;  %v6391_v6 = vld [vmem:[%s6947_s19 + $0x50] sm:$0xff]  }
 0x452   : > { %6198 = vmatprep.mubr.msk.f32.mxu1 %vm6670_vm3, %v6671_v27  ;;  %6197 = vmatpush3.msra.mxu1 %v2693_v10 }
 0x453   : > { %6206 = vmatprep.subr.mxu1 %v6671_v27 }
 0x518   : > { %v2469_v12 = vpop.f32.mrb[16].mxu0 }
 0x519   : > { %v6175_v14 = vpop.f32.mrb[17].mxu0  ;;  %6194 = vmatmul.mubr.msk.f32.vlgmr.msra.gmra.mrb[20].mxu0 %vm2032_vm5, %v2469_v12 }
 0x51a   : > { %6202 = vmatpush3.msra.mxu0 %v2694_v11  ;;  %6203 = vmatprep.mubr.msk.f32.mxu0 %vm6670_vm3, %v6671_v27  ;;  %v5549_v14 = vld [vmem:[%s7700_s20] ss:$0 sm:$0xff] }
 0x51b   : > { %3314 = vmatprep.subr.bf16.mxu0 %v5552_v50  ;;  %v3057_v50 = vld [vmem:[%s6932_s6 + $0xb0] sm:$0xff] }
 0x51c   : > { %v2542_v16 = vpop.f32.mrb[16].mxu1  ;;  %v5580_v56 = vcombine.high %v3057_v50, %v3065_v51 }
 0x51d   : > { %v6180_v17 = vpop.f32.mrb[17].mxu1  ;;  %6199 = vmatmul.mubr.msk.f32.vlgmr.msra.gmra.mrb[20].mxu1 %vm2032_vm5, %v2542_v16  ;;  %v5550_v16 = vld [vmem:[%s7702_s23] ss:$0 sm:$0xff] }
 0x51e   : > { %6207 = vmatpush3.msra.mxu1 %v2695_v15  ;;  %6208 = vmatprep.mubr.msk.f32.mxu1 %vm6670_vm3, %v6671_v27 }
 0x51f   : > { %3355 = vmatprep.subr.bf16.mxu1 %v5554_v54 }
 0x520   : > { %v2615_v18 = vpop.f32.mrb[18].mxu0 }
 0x521   : > { %v6185_v20 = vpop.f32.mrb[19].mxu0  ;;  %6204 = vmatmul.mubr.msk.f32.vlgmr.msra.gmra.mrb[22].mxu0 %vm2032_vm5, %v2615_v18  ;;  %v3053_v18 = vld [vmem:[%s6932_s6 + $0x90] sm:$0xff] }
 0x522   : > { %3315 = vmatpush1.bf16.msra.mxu0 %v5551_v52  ;;  %3346 = vmatprep.mubr.bf16.mxu0 %v6672_v2  ;;  %v3061_v20 = vld [vmem:[%s6932_s6 + $0xd0] sm:$0xff]  ;;  %v3058_v52 = vld [vmem:[%s6932_s6 + $0xb8] sm:$0xff] }
 0x523   : > { %3316 = vmatprep.subr.bf16.mxu0 %v5568_v58  ;;  %v5579_v58 = vcombine.low %v3057_v50, %v3065_v51 }
 0x524   : > { %v2688_v21 = vpop.f32.mrb[18].mxu1 }
 0x525   : > { %v6190_v22 = vpop.f32.mrb[19].mxu1  ;;  %6209 = vmatmul.mubr.msk.f32.vlgmr.msra.gmra.mrb[22].mxu1 %vm2032_vm5, %v2688_v21  ;;  %v3054_v21 = vld [vmem:[%s6932_s6 + $0x98] sm:$0xff] }
 0x526   : > { %3356 = vmatpush1.bf16.msra.mxu1 %v5553_v53  ;;  %3317 = vmatpush1.bf16.msra.mxu0 %v5567_v60  ;;  %v3062_v22 = vld [vmem:[%s6932_s6 + $0xd8] sm:$0xff]  ;;  %v6383_v60 = vld [vmem:[%s6947_s19 + $0x40] sm:$0xff]  }
 0x527   : > { %3357 = vmatprep.subr.bf16.mxu1 %v5570_v62  ;;  %3387 = vmatprep.mubr.bf16.mxu1 %v6672_v2  ;;  %v3066_v53 = vld [vmem:[%s6932_s6 + $0xf8] sm:$0xff]  ;;  %v6385_v62 = vld [vmem:[%s6947_s19] sm:$0xff]  }
 0x528   : > { %3396 = vmatprep.subr.bf16.mxu0 %v5556_v3  ;;  %v5582_v57 = vcombine.high %v3058_v52, %v3066_v53  ;;  %v5581_v59 = vcombine.low %v3058_v52, %v3066_v53  ;;  %v6390_v3 = vld [vmem:[%s6947_s19 + $0x88] sm:$0xff]  }
 0x52a   : > { %3358 = vmatpush1.bf16.msra.mxu1 %v5569_v61  ;;  %v6384_v61 = vld [vmem:[%s6947_s19 + $0xc0] sm:$0xff]  }
 0x52b   : > { %3437 = vmatprep.subr.bf16.mxu1 %v5558_v5  ;;  %v6394_v5 = vld [vmem:[%s6947_s19 + $0x90] sm:$0xff]  }
 0x5ec   : > { %v2765_v23 = vpop.f32.mrb[20].mxu0 }
 0x5ed   : > { %v6195_v24 = vpop.f32.mrb[21].mxu0  ;;  %v2988_v26 = vsel %vm1100_vm4, %v2765_v23, 0.0 }
 0x5f0   : > { %v2838_v25 = vpop.f32.mrb[20].mxu1 }
 0x5f1   : > { %v2989_v28 = vsel %vm1100_vm4, %v2838_v25, 0.0  ;;  %v6200_v19 = vpop.f32.mrb[21].mxu1  ;;  %v5572_v25 = vcombine.high %v3053_v18, %v3061_v20 }
 0x5f2   : > { %v2990_v29 = vadd.f32 %v2989_v28, %v2988_v26  ;;  %v5574_v26 = vcombine.high %v3054_v21, %v3062_v22  ;;  %v3039_v28 = vld [vmem:[%s6932_s6 + $0x20] sm:$0xff] }
 0x5f3   : > { %v3047_v19 = vld [vmem:[%s6932_s6 + $0x60] sm:$0xff] }
 0x5f4   : > { %v2911_v30 = vpop.f32.mrb[22].mxu0 }
 0x5f5   : > { %v2991_v27 = vsel %vm1100_vm4, %v2911_v30, 0.0  ;;  %v6205_v31 = vpop.f32.mrb[23].mxu0  ;;  %v3048_v30 = vld [vmem:[%s6932_s6 + $0x68] sm:$0xff] }
 0x5f6   : > { %v2992_v32 = vadd.f32 %v2991_v27, %v2990_v29  ;;  %v3040_v29 = vld [vmem:[%s6932_s6 + $0x28] sm:$0xff]  ;;  %v5571_v27 = vcombine.low %v3053_v18, %v3061_v20  ;;  %v5573_v31 = vcombine.low %v3054_v21, %v3062_v22 }
 0x5f7   : > { %v6403_v18 = vld [vmem:[%s6947_s19 + $0x68] sm:$0xff]  }
 0x5f8   : > { %v2984_v33 = vpop.f32.mrb[22].mxu1  ;;  %v6404_v20 = vld [vmem:[%s6947_s19 + $0xe8] sm:$0xff]  }
 0x5f9   : > { %v2993_v35 = vsel %vm1100_vm4, %v2984_v33, 0.0  ;;  %v6210_v37 = vpop.f32.mrb[23].mxu1  ;;  %v5562_v33 = vcombine.high %v3040_v29, %v3048_v30  ;;  %v6405_v21 = vld [vmem:[%s6947_s19 + $0x28] sm:$0xff]  }
 0x5fa   : > { %v2994_v38 = vadd.f32 %v2993_v35, %v2992_v32  ;;  %v5560_v32 = vcombine.high %v3039_v28, %v3047_v19  ;;  %v3055_v35 = vld [vmem:[%s6932_s6 + $0xa0] sm:$0xff]  ;;  %v3056_v37 = vld [vmem:[%s6932_s6 + $0xa8] sm:$0xff] }
 0x5fb   : > { %v6406_v22 = vld [vmem:[%s6947_s19 + $0xa8] sm:$0xff]  }
 0x5fc   : > { %v3002_v39 = vadd.f32 %v5548_v36, %v2994_v38  ;;  %v3063_v36 = vld [vmem:[%s6932_s6 + $0xe0] sm:$0xff]  ;;  %v3064_v38 = vld [vmem:[%s6932_s6 + $0xe8] sm:$0xff] }
 0x5fd   : > { %v5577_v47 = vcombine.low %v3056_v37, %v3064_v38 }
 0x5fe   : > { %v3003_v40 = vadd.f32 %v6531_v34, %v3002_v39  ;;  %v5559_v39 = vcombine.low %v3039_v28, %v3047_v19  ;;  %v5561_v34 = vcombine.low %v3040_v29, %v3048_v30  ;;  %v6410_v28 = vld [vmem:[%s6947_s19 + $0xb0] sm:$0xff]   ;;  %v6411_v19 = vld [vmem:[%s6947_s19 + $0x78] sm:$0xff]  }
 0x5ff   : > { %v6412_v29 = vld [vmem:[%s6947_s19 + $0xf8] sm:$0xff]  }
 0x600   : > { %v3006_v41 = vsel %vm1100_vm4, %v3003_v40, 0.0  ;;  %v6413_v30 = vld [vmem:[%s6947_s19 + $0x38] sm:$0xff]  }
 0x601   : > { %3007 = vadd.xlane.f32.xlu0 %v3006_v41  ;;  %v5578_v41 = vcombine.high %v3056_v37, %v3064_v38  ;;  %v3081_v37 = vsub.s32 2, %v7150_v9 }
 0x68e   : > { %v3008_v42 = vpop.xlane.xlu0 %3007 }
 0x68f   : > { %v3010_v43 = vmul.f32 0.03125, %v3008_v42  ;;  %v3041_v42 = vld [vmem:[%s6932_s6 + $0x30] sm:$0xff] }
 0x691   : > { %v3011_v44 = vsub.f32 %v3003_v40, %v3010_v43  ;;  %v5576_v40 = vcombine.high %v3055_v35, %v3063_v36  ;;  %v3049_v43 = vld [vmem:[%s6932_s6 + $0x70] sm:$0xff] }
 0x692   : > { %v5564_v48 = vcombine.high %v3041_v42, %v3049_v43  ;;  %v5563_v54 = vcombine.low %v3041_v42, %v3049_v43 }
 0x693   : > { %v3012_v45 = vmul.f32 %v3011_v44, %v3011_v44 }
 0x695   : > { %v3013_v46 = vsel %vm1100_vm4, %v3012_v45, 0.0  ;;  %v3050_v45 = vld [vmem:[%s6932_s6 + $0x78] sm:$0xff] }
 0x696   : > { %3014 = vadd.xlane.f32.xlu1 %v3013_v46  ;;  %v5575_v46 = vcombine.low %v3055_v35, %v3063_v36 }
 0x723   : > { %v3015_v8 = vpop.xlane.xlu1 %3014 }
 0x724   : > { %v3016_v10 = vmul.f32 0.03125, %v3015_v8  ;;  %v6395_v8 = vld [vmem:[%s6947_s19 + $0x58] sm:$0xff]  }
 0x726   : > { %v3017_v11 = vadd.f32 1e-05, %v3016_v10  ;;  %v6396_v10 = vld [vmem:[%s6947_s19 + $0xd8] sm:$0xff]  }
 0x728   : > { %6527 = vrsqrt.f32 %v3017_v11  ;;  %v6397_v11 = vld [vmem:[%s6947_s19 + $0x18] sm:$0xff]  }
 0x732   : > { %v6528_v12 = vpop.eup %6527 }
 0x733   : > { %v3019_v15 = vmul.f32 %v6528_v12, %v3011_v44  ;;  %v3042_v44 = vld [vmem:[%s6932_s6 + $0x38] sm:$0xff]  ;;  %s7703_s6 = sld [smem:[#allocation26_spill]] }
 0x734   : > { %v5566_v49 = vcombine.high %v3042_v44, %v3050_v45  ;;  %v5565_v55 = vcombine.low %v3042_v44, %v3050_v45  ;;  %v6398_v12 = vld [vmem:[%s6947_s19 + $0x98] sm:$0xff]  }
 0x735   : > { %v3026_v17 = vmul.f32 %v5549_v14, %v3019_v15  ;;  %v6399_v14 = vld [vmem:[%s6947_s19 + $0x60] sm:$0xff]  }
 0x736   : > { %v6400_v15 = vld [vmem:[%s6947_s19 + $0xe0] sm:$0xff]  }
 0x737   : > { %v7236_v23 = vadd.f32 %v5550_v16, %v3026_v17  ;;  %v6401_v16 = vld [vmem:[%s6947_s19 + $0x20] sm:$0xff]  }
 0x738   : > { %v6402_v17 = vld [vmem:[%s6947_s19 + $0xa0] sm:$0xff]  }
 0x739   : > { %v7240_v24 = vpack.c.bf16 %v7236_v23, %v7236_v23  ;;  %v7316_v35 = vld [vmem:[%s7703_s6 + $0x8] sm:$0xff]  ;;  %v7325_v38 = vld [vmem:[%s7703_s6] sm:$0xff] }
 0x73b   : > { %5583 = vmatmul.mubr.msk.bf16.vlgmr.msra.gmra.mrb[24].mxu0 %vm1100_vm4, %v7240_v24  ;;  %5584 = vmatmul.mubr.msk.bf16.vlgmr.msra.gmra.mrb[24].mxu1 %vm1100_vm4, %v7240_v24 }
 0x73c   : > { %3397 = vmatpush1.bf16.msra.mxu0 %v5555_v4  ;;  %3438 = vmatpush1.bf16.msra.mxu1 %v5557_v7  ;;  %v6392_v4 = vld [vmem:[%s6947_s19 + $0xd0] sm:$0xff]  }
 0x73d   : > { %3398 = vmatprep.subr.bf16.mxu0 %v5572_v25  ;;  %3439 = vmatprep.subr.bf16.mxu1 %v5574_v26  ;;  %v6393_v7 = vld [vmem:[%s6947_s19 + $0x10] sm:$0xff]  }
 0x73e   : > { %3428 = vmatprep.mubr.bf16.mxu0 %v6672_v2  ;;  %3469 = vmatprep.mubr.bf16.mxu1 %v6672_v2  ;;  %v6408_v25 = vld [vmem:[%s6947_s19 + $0xf0] sm:$0xff]  }
 0x73f   : > { %v6409_v26 = vld [vmem:[%s6947_s19 + $0x30] sm:$0xff]  }
 0x740   : > { %3399 = vmatpush1.bf16.msra.mxu0 %v5571_v27  ;;  %3440 = vmatpush1.bf16.msra.mxu1 %v5573_v31  ;;  %v6414_v27 = vld [vmem:[%s6947_s19 + $0xb8] sm:$0xff]   ;;  %v6415_v31 = vld [vmem:[%s6947_s19 + $0x140] sm:$0xff]  }
 0x741   : > { %3478 = vmatprep.subr.bf16.mxu0 %v5560_v32  ;;  %3519 = vmatprep.subr.bf16.mxu1 %v5562_v33  ;;  %v6416_v32 = vld [vmem:[%s6947_s19 + $0x1c0] sm:$0xff]   ;;  %v3097_v33 = vsub.s32 6, %v7150_v9 }
 0x743   : > { %5585 = vmatmul.mubr.msk.bf16.vlgmr.msra.gmra.mrb[28].mxu0 %vm1100_vm4, %v7240_v24  ;;  %5586 = vmatmul.mubr.msk.bf16.vlgmr.msra.gmra.mrb[28].mxu1 %vm1100_vm4, %v7240_v24  ;;  %v7321_v36 = vrot.slane %v7316_v35, %v3097_v33 }
 0x744   : > { %3479 = vmatpush1.bf16.msra.mxu0 %v5559_v39  ;;  %3520 = vmatpush1.bf16.msra.mxu1 %v5561_v34  ;;  %v3077_v39 = vsub.s32 1, %v7150_v9  ;;  %v3085_v34 = vsub.s32 3, %v7150_v9 }
 0x745   : > { %3480 = vmatprep.subr.bf16.mxu0 %v5576_v40  ;;  %3521 = vmatprep.subr.bf16.mxu1 %v5578_v41  ;;  %v3074_v40 = vrot.slane %v7325_v38, %v7154_v13  ;;  %v3082_v41 = vrot.slane %v7325_v38, %v3081_v37 }
 0x746   : > { %3510 = vmatprep.mubr.bf16.mxu0 %v6672_v2  ;;  %3551 = vmatprep.mubr.bf16.mxu1 %v6672_v2  ;;  %v3078_v42 = vrot.slane %v7325_v38, %v3077_v39  ;;  %v3086_v43 = vrot.slane %v7325_v38, %v3085_v34 }
 0x748   : > { %3481 = vmatpush1.bf16.msra.mxu0 %v5575_v46  ;;  %3522 = vmatpush1.bf16.msra.mxu1 %v5577_v47 }
 0x749   : > { %3560 = vmatprep.subr.bf16.mxu0 %v5564_v48  ;;  %3601 = vmatprep.subr.bf16.mxu1 %v5566_v49 }
 0x74b   : > { %5587 = vmatmul.mubr.msk.bf16.vlgmr.msra.gmra.mrb[32].mxu0 %vm1100_vm4, %v7240_v24  ;;  %5588 = vmatmul.mubr.msk.bf16.vlgmr.msra.gmra.mrb[32].mxu1 %vm1100_vm4, %v7240_v24 }
 0x74c   : > { %3561 = vmatpush1.bf16.msra.mxu0 %v5563_v54  ;;  %3602 = vmatpush1.bf16.msra.mxu1 %v5565_v55  ;;  %v3093_v54 = vsub.s32 5, %v7150_v9  ;;  %v3101_v55 = vsub.s32 7, %v7150_v9 }
 0x74d   : > { %3562 = vmatprep.subr.bf16.mxu0 %v5580_v56  ;;  %3603 = vmatprep.subr.bf16.mxu1 %v5582_v57 }
 0x74e   : > { %3592 = vmatprep.mubr.bf16.mxu0 %v6672_v2  ;;  %3633 = vmatprep.mubr.bf16.mxu1 %v6672_v2  ;;  %v6389_v2 = vld [vmem:[%s6947_s19 + $0x8] sm:$0xff]  }
 0x750   : > { %3563 = vmatpush1.bf16.msra.mxu0 %v5579_v58  ;;  %3604 = vmatpush1.bf16.msra.mxu1 %v5581_v59 }
 0x751   : > { %5826 = vmatprep.subr.bf16.mxu0 %v6383_v60  ;;  %5848 = vmatprep.subr.bf16.mxu1 %v6384_v61 }
 0x753   : > { %5589 = vmatmul.mubr.msk.bf16.vlgmr.msra.gmra.mrb[36].mxu0 %vm1100_vm4, %v7240_v24  ;;  %5590 = vmatmul.mubr.msk.bf16.vlgmr.msra.gmra.mrb[36].mxu1 %vm1100_vm4, %v7240_v24  ;;  %v6407_v24 = vld [vmem:[%s6947_s19 + $0x70] sm:$0xff]  }
 0x754   : > { %5827 = vmatpush3.bf16.msra.mxu0 %v6385_v62  ;;  %5849 = vmatpush3.bf16.msra.mxu1 %v6386_v63 }
 0x755   : > { %5828 = vmatprep.subr.bf16.mxu0 %v6387_v0  ;;  %5850 = vmatprep.subr.bf16.mxu1 %v6388_v1  ;;  %v3094_v0 = vrot.slane %v7325_v38, %v3093_v54  ;;  %v3102_v1 = vrot.slane %v7325_v38, %v3101_v55 }
 0x758   : > { %5829 = vmatpush3.bf16.msra.mxu0 %v6389_v2  ;;  %5851 = vmatpush3.bf16.msra.mxu1 %v6390_v3  ;;  %v6417_v2 = vld [vmem:[%s6947_s19 + $0x100] sm:$0xff]  }
 0x759   : > { %5830 = vmatprep.subr.bf16.mxu0 %v6391_v6  ;;  %5852 = vmatprep.subr.bf16.mxu1 %v6392_v4  ;;  %v6418_v3 = vld [vmem:[%s6947_s19 + $0x180] sm:$0xff]  }
 0x75c   : > { %5831 = vmatpush3.bf16.msra.mxu0 %v6393_v7  ;;  %5853 = vmatpush3.bf16.msra.mxu1 %v6394_v5  ;;  %v6419_v7 = vld [vmem:[%s6947_s19 + $0x148] sm:$0xff]  }
 0x75d   : > { %5832 = vmatprep.subr.bf16.mxu0 %v6395_v8  ;;  %5854 = vmatprep.subr.bf16.mxu1 %v6396_v10  ;;  %v6420_v5 = vld [vmem:[%s6947_s19 + $0x1c8] sm:$0xff]  }
 0x760   : > { %5833 = vmatpush3.bf16.msra.mxu0 %v6397_v11  ;;  %5855 = vmatpush3.bf16.msra.mxu1 %v6398_v12 }
 0x761   : > { %5834 = vmatprep.subr.bf16.mxu0 %v6399_v14  ;;  %5856 = vmatprep.subr.bf16.mxu1 %v6400_v15 }
 0x764   : > { %5835 = vmatpush3.bf16.msra.mxu0 %v6401_v16  ;;  %5857 = vmatpush3.bf16.msra.mxu1 %v6402_v17 }
 0x765   : > { %5836 = vmatprep.subr.bf16.mxu0 %v6403_v18  ;;  %5858 = vmatprep.subr.bf16.mxu1 %v6404_v20  ;;  %v6421_v18 = vld [vmem:[%s6947_s19 + $0x108] sm:$0xff]  }
 0x766   : > { %v6422_v20 = vld [vmem:[%s6947_s19 + $0x188] sm:$0xff]  }
 0x768   : > { %5837 = vmatpush3.bf16.msra.mxu0 %v6405_v21  ;;  %5859 = vmatpush3.bf16.msra.mxu1 %v6406_v22 }
 0x769   : > { %5838 = vmatprep.subr.bf16.mxu0 %v6407_v24  ;;  %5860 = vmatprep.subr.bf16.mxu1 %v6408_v25  ;;  %v6423_v24 = vld [vmem:[%s6947_s19 + $0x150] sm:$0xff]  }
 0x76a   : > { %v6424_v25 = vld [vmem:[%s6947_s19 + $0x1d0] sm:$0xff]  }
 0x76c   : > { %5839 = vmatpush3.bf16.msra.mxu0 %v6409_v26  ;;  %5861 = vmatpush3.bf16.msra.mxu1 %v6410_v28 }
 0x76d   : > { %5840 = vmatprep.subr.bf16.mxu0 %v6411_v19  ;;  %5862 = vmatprep.subr.bf16.mxu1 %v6412_v29  ;;  %v3114_v19 = vrot.slane %v7316_v35, %v3081_v37 }
 0x770   : > { %5841 = vmatpush3.bf16.msra.mxu0 %v6413_v30  ;;  %5863 = vmatpush3.bf16.msra.mxu1 %v6414_v27  ;;  %v6425_v27 = vld [vmem:[%s6947_s19 + $0x110] sm:$0xff]  }
 0x771   : > { %5870 = vmatprep.subr.bf16.mxu0 %v6415_v31  ;;  %5892 = vmatprep.subr.bf16.mxu1 %v6416_v32  ;;  %v6426_v31 = vld [vmem:[%s6947_s19 + $0x190] sm:$0xff]   ;;  %v6427_v32 = vld [vmem:[%s6947_s19 + $0x158] sm:$0xff]  }
 0x80e   : > { %v3348_v44 = vpop.f32.mrb[24].mxu0  ;;  %v3389_v45 = vpop.f32.mrb[24].mxu1 }
 0x80f   : > { %v3349_v46 = vadd.f32 %v3348_v44, %v3074_v40  ;;  %v3390_v47 = vadd.f32 %v3389_v45, %v3082_v41  ;;  %v3350_v48 = vpop.f32.mrb[25].mxu0  ;;  %v3391_v49 = vpop.f32.mrb[25].mxu1  ;;  %v6428_v40 = vld [vmem:[%s6947_s19 + $0x1d8] sm:$0xff]  }
 0x810   : > { %v3351_v50 = vadd.f32 %v3350_v48, %v3078_v42  ;;  %v3392_v51 = vadd.f32 %v3391_v49, %v3086_v43  ;;  %v3352_v52 = vpop.f32.mrb[26].mxu0  ;;  %v3393_v53 = vpop.f32.mrb[26].mxu1  ;;  %v6430_v48 = vld [vmem:[%s6947_s19 + $0x198] sm:$0xff]   ;;  %v3089_v49 = vsub.s32 4, %v7150_v9 }
 0x811   : > { %v3642_v56 = vmax.f32 %v3349_v46, 0.0  ;;  %v3644_v57 = vmax.f32 %v3390_v47, 0.0  ;;  %v3353_v58 = vpop.f32.mrb[27].mxu0  ;;  %v3394_v59 = vpop.f32.mrb[27].mxu1  ;;  %v6429_v47 = vld [vmem:[%s6947_s19 + $0x118] sm:$0xff]   ;;  %v6431_v52 = vld [vmem:[%s6947_s19 + $0x160] sm:$0xff]  }
 0x812   : > { %v3643_v60 = vmax.f32 %v3351_v50, 0.0  ;;  %v3645_v61 = vmax.f32 %v3392_v51, 0.0  ;;  %v6432_v53 = vld [vmem:[%s6947_s19 + $0x1e0] sm:$0xff]   ;;  %v6435_v59 = vld [vmem:[%s6947_s19 + $0x168] sm:$0xff]  }
 0x813   : > { %v3658_v6 = vpack.c.bf16 %v3642_v56, %v3642_v56  ;;  %v3660_v4 = vpack.c.bf16 %v3644_v57, %v3644_v57  ;;  %v3122_v56 = vrot.slane %v7316_v35, %v3089_v49  ;;  %v6433_v57 = vld [vmem:[%s6947_s19 + $0x120] sm:$0xff]  }
 0x814   : > { %v3659_v62 = vpack.c.bf16 %v3643_v60, %v3643_v60  ;;  %v3661_v63 = vpack.c.bf16 %v3645_v61, %v3645_v61  ;;  %v6434_v58 = vld [vmem:[%s6947_s19 + $0x1a0] sm:$0xff]   ;;  %v6436_v60 = vld [vmem:[%s6947_s19 + $0x1e8] sm:$0xff]  }
 0x816   : > { %v7350_v8 = vpop.f32.mrb[28].mxu0  ;;  %v7352_v10 = vpop.f32.mrb[28].mxu1  ;;  %4737 = vmatprep.mubr.bf16.mxu0 %v3659_v62  ;;  %4777 = vmatprep.mubr.bf16.mxu1 %v3661_v63 }
 0x817   : > { %v3432_v11 = vpop.f32.mrb[29].mxu0  ;;  %v3473_v12 = vpop.f32.mrb[29].mxu1  ;;  %4738 = vmatmul.mubr.bf16.vlgmr.msra.gmra.mrb[40].mxu0 %v3658_v6  ;;  %4778 = vmatmul.mubr.bf16.vlgmr.msra.gmra.mrb[40].mxu1 %v3660_v4  ;;  %v6437_v4 = vld [vmem:[%s6947_s19 + $0x128] sm:$0xff]  }
 0x818   : > { %v3433_v14 = vadd.f32 %v3432_v11, %v3094_v0  ;;  %v3474_v15 = vadd.f32 %v3473_v12, %v3102_v1  ;;  %5871 = vmatpush3.bf16.msra.mxu0 %v6417_v2  ;;  %5893 = vmatpush3.bf16.msra.mxu1 %v6418_v3  ;;  %v3434_v16 = vpop.f32.mrb[30].mxu0  ;;  %v3475_v17 = vpop.f32.mrb[30].mxu1 }
 0x819   : > { %v3435_v21 = vpop.f32.mrb[31].mxu0  ;;  %v3476_v22 = vpop.f32.mrb[31].mxu1  ;;  %5872 = vmatprep.subr.bf16.mxu0 %v6419_v7  ;;  %5894 = vmatprep.subr.bf16.mxu1 %v6420_v5  ;;  %v6438_v7 = vld [vmem:[%s6947_s19 + $0x1a8] sm:$0xff]   ;;  %v3090_v5 = vrot.slane %v7325_v38, %v3089_v49  ;;  %v3110_v16 = vrot.slane %v7316_v35, %v3077_v39  ;;  %v3118_v17 = vrot.slane %v7316_v35, %v3085_v34  ;;  %v6444_v39 = vld [vmem:[%s6947_s19 + $0x1f8] sm:$0xff]   ;;  %v6457_v49 = vld [vmem:[%s6947_s19 + $0x210] sm:$0xff]  }
 0x81a   : > { %v3647_v26 = vmax.f32 %v3433_v14, 0.0  ;;  %v3649_v28 = vmax.f32 %v3474_v15, 0.0  ;;  %v6439_v14 = vld [vmem:[%s6947_s19 + $0x170] sm:$0xff]   ;;  %v6443_v21 = vld [vmem:[%s6947_s19 + $0x178] sm:$0xff]  }
 0x81b   : > { %v6440_v15 = vld [vmem:[%s6947_s19 + $0x1f0] sm:$0xff]   ;;  %v6445_v34 = vld [vmem:[%s6947_s19 + $0x138] sm:$0xff]  }
 0x81c   : > { %v3663_v29 = vpack.c.bf16 %v3647_v26, %v3647_v26  ;;  %v3665_v30 = vpack.c.bf16 %v3649_v28, %v3649_v28  ;;  %5873 = vmatpush3.bf16.msra.mxu0 %v6421_v18  ;;  %5895 = vmatpush3.bf16.msra.mxu1 %v6422_v20  ;;  %v3431_v18 = vadd.f32 %v7350_v8, %v3090_v5  ;;  %v6447_v8 = vld [vmem:[%s6947_s19 + $0x240] sm:$0xff]   ;;  %v6472_v5 = vld [vmem:[%s6947_s19 + $0x2f0] sm:$0xff]  }
 0x81d   : > { %5874 = vmatprep.subr.bf16.mxu0 %v6423_v24  ;;  %5896 = vmatprep.subr.bf16.mxu1 %v6424_v25  ;;  %v6446_v25 = vld [vmem:[%s6947_s19 + $0x1b8] sm:$0xff]  }
 0x81e   : > { %v7363_v41 = vpop.f32.mrb[32].mxu0  ;;  %v3553_v42 = vpop.f32.mrb[32].mxu1  ;;  %4817 = vmatprep.mubr.bf16.mxu0 %v3663_v29  ;;  %4857 = vmatprep.mubr.bf16.mxu1 %v3665_v30  ;;  %v3646_v26 = vmax.f32 %v3431_v18, 0.0  ;;  %v6449_v30 = vld [vmem:[%s6947_s19 + $0x200] sm:$0xff]  }
 0x81f   : > { %v7365_v37 = vadd.f32 %v3553_v42, %v3114_v19  ;;  %v3514_v43 = vpop.f32.mrb[33].mxu0  ;;  %v3555_v44 = vpop.f32.mrb[33].mxu1  ;;  %v6451_v42 = vld [vmem:[%s6947_s19 + $0x248] sm:$0xff]  }
 0x820   : > { %5875 = vmatpush3.bf16.msra.mxu0 %v6425_v27  ;;  %5897 = vmatpush3.bf16.msra.mxu1 %v6426_v31  ;;  %v3516_v45 = vpop.f32.mrb[34].mxu0  ;;  %v3557_v46 = vpop.f32.mrb[34].mxu1  ;;  %v3515_v22 = vadd.f32 %v3514_v43, %v3110_v16  ;;  %v3556_v24 = vadd.f32 %v3555_v44, %v3118_v17  ;;  %v3662_v27 = vpack.c.bf16 %v3646_v26, %v3646_v26  ;;  %v6452_v43 = vld [vmem:[%s6947_s19 + $0x2c8] sm:$0xff]   ;;  %v6475_v16 = vld [vmem:[%s6947_s19 + $0x278] sm:$0xff]  }
 0x821   : > { %v3517_v50 = vpop.f32.mrb[35].mxu0  ;;  %v3558_v51 = vpop.f32.mrb[35].mxu1  ;;  %5876 = vmatprep.subr.bf16.mxu0 %v6427_v32  ;;  %5898 = vmatprep.subr.bf16.mxu1 %v6428_v40  ;;  %v6450_v32 = vld [vmem:[%s6947_s19 + $0x280] sm:$0xff]   ;;  %v6453_v45 = vld [vmem:[%s6947_s19 + $0x208] sm:$0xff]   ;;  %v6476_v17 = vld [vmem:[%s6947_s19 + $0x2f8] sm:$0xff]   ;;  %v3652_v18 = vmax.f32 %v7365_v37, 0.0 }
 0x822   : > { %v3651_v19 = vmax.f32 %v3515_v22, 0.0  ;;  %v3653_v29 = vmax.f32 %v3556_v24, 0.0  ;;  %v6454_v46 = vld [vmem:[%s6947_s19 + $0x288] sm:$0xff]   ;;  %v6458_v50 = vld [vmem:[%s6947_s19 + $0x290] sm:$0xff]   ;;  %v6459_v51 = vld [vmem:[%s6947_s19 + $0x258] sm:$0xff]  }
 0x823   : > { %v6482_v22 = vld [vmem:[%s6947_s19 + $0x380] sm:$0xff]   ;;  %v3668_v24 = vpack.c.bf16 %v3652_v18, %v3652_v18  ;;  %v6484_v37 = vld [vmem:[%s6947_s19 + $0x3c8] sm:$0xff]  }
 0x824   : > { %5877 = vmatpush3.bf16.msra.mxu0 %v6429_v47  ;;  %5899 = vmatpush3.bf16.msra.mxu1 %v6430_v48  ;;  %v3667_v40 = vpack.c.bf16 %v3651_v19, %v3651_v19  ;;  %v3669_v44 = vpack.c.bf16 %v3653_v29, %v3653_v29  ;;  %v6455_v47 = vld [vmem:[%s6947_s19 + $0x250] sm:$0xff]  }
 0x825   : > { %5878 = vmatprep.subr.bf16.mxu0 %v6431_v52  ;;  %5900 = vmatprep.subr.bf16.mxu1 %v6432_v53  ;;  %v6456_v48 = vld [vmem:[%s6947_s19 + $0x2d0] sm:$0xff]   ;;  %v6460_v52 = vld [vmem:[%s6947_s19 + $0x2d8] sm:$0xff]  }
 0x826   : > { %v3594_v61 = vpop.f32.mrb[36].mxu0  ;;  %v3635_v62 = vpop.f32.mrb[36].mxu1  ;;  %v6461_v53 = vld [vmem:[%s6947_s19 + $0x218] sm:$0xff]   ;;  %v6488_v19 = vld [vmem:[%s6947_s19 + $0x3d0] sm:$0xff]  }
 0x827   : > { %v7377_v63 = vadd.f32 %v3594_v61, %v3122_v56  ;;  %v7380_v0 = vadd.f32 %v3635_v62, %v7321_v36  ;;  %v7382_v1 = vpop.f32.mrb[37].mxu0  ;;  %v7384_v2 = vpop.f32.mrb[37].mxu1  ;;  %v3098_v36 = vrot.slane %v7325_v38, %v3097_v33  ;;  %v6441_v33 = vld [vmem:[%s6947_s19 + $0x130] sm:$0xff]   ;;  %v6462_v56 = vld [vmem:[%s6947_s19 + $0x298] sm:$0xff]   ;;  %v6467_v61 = vld [vmem:[%s6947_s19 + $0x268] sm:$0xff]  }
 0x828   : > { %5879 = vmatpush3.bf16.msra.mxu0 %v6433_v57  ;;  %5901 = vmatpush3.bf16.msra.mxu1 %v6434_v58  ;;  %v3598_v3 = vpop.f32.mrb[38].mxu0  ;;  %v3639_v6 = vpop.f32.mrb[38].mxu1  ;;  %v6442_v38 = vld [vmem:[%s6947_s19 + $0x1b0] sm:$0xff]   ;;  %v6463_v57 = vld [vmem:[%s6947_s19 + $0x260] sm:$0xff]   ;;  %v6468_v62 = vld [vmem:[%s6947_s19 + $0x2e8] sm:$0xff]  }
 0x829   : > { %v3599_v11 = vpop.f32.mrb[39].mxu0  ;;  %v3640_v12 = vpop.f32.mrb[39].mxu1  ;;  %5880 = vmatprep.subr.bf16.mxu0 %v6435_v59  ;;  %5902 = vmatprep.subr.bf16.mxu1 %v6436_v60  ;;  %v3472_v20 = vadd.f32 %v7352_v10, %v3098_v36  ;;  %v6448_v10 = vld [vmem:[%s6947_s19 + $0x2c0] sm:$0xff]   ;;  %v6469_v3 = vld [vmem:[%s6947_s19 + $0x228] sm:$0xff]   ;;  %v3106_v6 = vrot.slane %v7316_v35, %v7154_v13  ;;  %v3126_v36 = vrot.slane %v7316_v35, %v3093_v54  ;;  %v6489_v29 = vld [vmem:[%s6947_s19 + $0x310] sm:$0xff]  }
 0x82a   : > { %v6464_v58 = vld [vmem:[%s6947_s19 + $0x2e0] sm:$0xff]   ;;  %v3134_v11 = vrot.slane %v7316_v35, %v3101_v55  ;;  %v6473_v12 = vld [vmem:[%s6947_s19 + $0x230] sm:$0xff]   ;;  %v6477_v35 = vld [vmem:[%s6947_s19 + $0x238] sm:$0xff]  }
 0x82b   : > { %v3648_v28 = vmax.f32 %v3472_v20, 0.0  ;;  %v6465_v59 = vld [vmem:[%s6947_s19 + $0x220] sm:$0xff]   ;;  %v3597_v54 = vadd.f32 %v7382_v1, %v3126_v36 }
 0x82c   : > { %5881 = vmatpush3.bf16.msra.mxu0 %v6437_v4  ;;  %5903 = vmatpush3.bf16.msra.mxu1 %v6438_v7  ;;  %v6466_v60 = vld [vmem:[%s6947_s19 + $0x2a0] sm:$0xff]   ;;  %v6470_v4 = vld [vmem:[%s6947_s19 + $0x2a8] sm:$0xff]   ;;  %v6471_v7 = vld [vmem:[%s6947_s19 + $0x270] sm:$0xff]  }
 0x82d   : > { %5882 = vmatprep.subr.bf16.mxu0 %v6439_v14  ;;  %5904 = vmatprep.subr.bf16.mxu1 %v6440_v15  ;;  %v3664_v31 = vpack.c.bf16 %v3648_v28, %v3648_v28  ;;  %v3513_v14 = vadd.f32 %v7363_v41, %v3106_v6  ;;  %v6474_v15 = vld [vmem:[%s6947_s19 + $0x2b0] sm:$0xff]   ;;  %v6478_v41 = vld [vmem:[%s6947_s19 + $0x2b8] sm:$0xff]   ;;  %v6480_v20 = vld [vmem:[%s6947_s19 + $0x3c0] sm:$0xff]  }
 0x82e   : > { %v6481_v1 = vld [vmem:[%s6947_s19 + $0x300] sm:$0xff]   ;;  %v6485_v28 = vld [vmem:[%s6947_s19 + $0x308] sm:$0xff]  }
 0x82f   : > { %v3650_v55 = vmax.f32 %v3513_v14, 0.0 }
 0x830   : > { %5883 = vmatpush3.bf16.msra.mxu0 %v6441_v33  ;;  %5905 = vmatpush3.bf16.msra.mxu1 %v6442_v38  ;;  %v3638_v33 = vadd.f32 %v7384_v2, %v3134_v11  ;;  %v6479_v38 = vld [vmem:[%s6947_s19 + $0x340] sm:$0xff]  }
 0x831   : > { %5884 = vmatprep.subr.bf16.mxu0 %v6443_v21  ;;  %5906 = vmatprep.subr.bf16.mxu1 %v6444_v39  ;;  %v3655_v21 = vmax.f32 %v3597_v54, 0.0  ;;  %v3666_v2 = vpack.c.bf16 %v3650_v55, %v3650_v55 }
 0x832   : > { %v3657_v39 = vmax.f32 %v3638_v33, 0.0 }
 0x834   : > { %5885 = vmatpush3.bf16.msra.mxu0 %v6445_v34  ;;  %5907 = vmatpush3.bf16.msra.mxu1 %v6446_v25  ;;  %v6483_v34 = vld [vmem:[%s6947_s19 + $0x348] sm:$0xff]   ;;  %v3671_v25 = vpack.c.bf16 %v3655_v21, %v3655_v21  ;;  %v3673_v26 = vpack.c.bf16 %v3657_v39, %v3657_v39 }
 0x835   : > { %5914 = vmatprep.subr.bf16.mxu0 %v6447_v8  ;;  %5936 = vmatprep.subr.bf16.mxu1 %v6448_v10  ;;  %v6486_v8 = vld [vmem:[%s6947_s19 + $0x388] sm:$0xff]   ;;  %v6487_v10 = vld [vmem:[%s6947_s19 + $0x350] sm:$0xff]  }
 0x837   : > { %4818 = vmatmul.mubr.bf16.vlgmr.msra.gmra.mrb[44].mxu0 %v3662_v27  ;;  %4858 = vmatmul.mubr.bf16.vlgmr.msra.gmra.mrb[44].mxu1 %v3664_v31  ;;  %v6491_v27 = vld [vmem:[%s6947_s19 + $0x358] sm:$0xff]  }
 0x838   : > { %5915 = vmatpush3.bf16.msra.mxu0 %v6449_v30  ;;  %4897 = vmatprep.mubr.bf16.mxu0 %v3667_v40  ;;  %v6490_v30 = vld [vmem:[%s6947_s19 + $0x390] sm:$0xff]   ;;  %v6492_v31 = vld [vmem:[%s6947_s19 + $0x3d8] sm:$0xff]  }
 0x839   : > { %5937 = vmatpush3.bf16.msra.mxu1 %v6450_v32  ;;  %4937 = vmatprep.mubr.bf16.mxu1 %v3669_v44  ;;  %v6493_v32 = vld [vmem:[%s6947_s19 + $0x318] sm:$0xff]   ;;  %v6497_v44 = vld [vmem:[%s6947_s19 + $0x320] sm:$0xff]  }
 0x83a   : > { %5916 = vmatprep.subr.bf16.mxu0 %v6451_v42  ;;  %5938 = vmatprep.subr.bf16.mxu1 %v6452_v43  ;;  %v6494_v40 = vld [vmem:[%s6947_s19 + $0x398] sm:$0xff]   ;;  %v6495_v42 = vld [vmem:[%s6947_s19 + $0x360] sm:$0xff]  }
 0x83b   : > { %v6496_v43 = vld [vmem:[%s6947_s19 + $0x3e0] sm:$0xff]  }
 0x83c   : > { %5917 = vmatpush3.bf16.msra.mxu0 %v6453_v45  ;;  %v6498_v45 = vld [vmem:[%s6947_s19 + $0x3a0] sm:$0xff]  }
 0x83d   : > { %5939 = vmatpush3.bf16.msra.mxu1 %v6454_v46  ;;  %5918 = vmatprep.subr.bf16.mxu0 %v6455_v47  ;;  %v6499_v46 = vld [vmem:[%s6947_s19 + $0x368] sm:$0xff]  }
 0x83e   : > { %5940 = vmatprep.subr.bf16.mxu1 %v6456_v48  ;;  %v6500_v47 = vld [vmem:[%s6947_s19 + $0x3e8] sm:$0xff]  }
 0x83f   : > { %v6501_v48 = vld [vmem:[%s6947_s19 + $0x328] sm:$0xff]  }
 0x840   : > { %5919 = vmatpush3.bf16.msra.mxu0 %v6457_v49  ;;  %v6502_v49 = vld [vmem:[%s6947_s19 + $0x3a8] sm:$0xff]  }
 0x841   : > { %5941 = vmatpush3.bf16.msra.mxu1 %v6458_v50  ;;  %5920 = vmatprep.subr.bf16.mxu0 %v6459_v51  ;;  %v6503_v50 = vld [vmem:[%s6947_s19 + $0x370] sm:$0xff]  }
 0x842   : > { %5942 = vmatprep.subr.bf16.mxu1 %v6460_v52  ;;  %v6504_v51 = vld [vmem:[%s6947_s19 + $0x3f0] sm:$0xff]  }
 0x843   : > { %v6505_v52 = vld [vmem:[%s6947_s19 + $0x330] sm:$0xff]  }
 0x844   : > { %5921 = vmatpush3.bf16.msra.mxu0 %v6461_v53  ;;  %v6506_v53 = vld [vmem:[%s6947_s19 + $0x3b0] sm:$0xff]  }
 0x845   : > { %5943 = vmatpush3.bf16.msra.mxu1 %v6462_v56  ;;  %5922 = vmatprep.subr.bf16.mxu0 %v6463_v57  ;;  %v6507_v56 = vld [vmem:[%s6947_s19 + $0x378] sm:$0xff]  }
 0x846   : > { %5944 = vmatprep.subr.bf16.mxu1 %v6464_v58  ;;  %v6508_v57 = vld [vmem:[%s6947_s19 + $0x3f8] sm:$0xff]  }
 0x847   : > { %v6509_v58 = vld [vmem:[%s6947_s19 + $0x338] sm:$0xff]  }
 0x848   : > { %5923 = vmatpush3.bf16.msra.mxu0 %v6465_v59  ;;  %v3654_v59 = vmax.f32 %v7377_v63, 0.0 }
 0x849   : > { %5945 = vmatpush3.bf16.msra.mxu1 %v6466_v60  ;;  %5924 = vmatprep.subr.bf16.mxu0 %v6467_v61  ;;  %v6510_v60 = vld [vmem:[%s6947_s19 + $0x3b8] sm:$0xff]   ;;  %v3656_v61 = vmax.f32 %v7380_v0, 0.0 }
 0x84a   : > { %5946 = vmatprep.subr.bf16.mxu1 %v6468_v62  ;;  %v3670_v62 = vpack.c.bf16 %v3654_v59, %v3654_v59 }
 0x84c   : > { %5925 = vmatpush3.bf16.msra.mxu0 %v6469_v3  ;;  %v3672_v3 = vpack.c.bf16 %v3656_v61, %v3656_v61 }
 0x84d   : > { %5947 = vmatpush3.bf16.msra.mxu1 %v6470_v4  ;;  %5926 = vmatprep.subr.bf16.mxu0 %v6471_v7  ;;  %v5591_v7 = vld [vmem:[%s953_s21] ss:$0 sm:$0xff] }
 0x84e   : > { %5948 = vmatprep.subr.bf16.mxu1 %v6472_v5 }
 0x850   : > { %5927 = vmatpush3.bf16.msra.mxu0 %v6473_v12 }
 0x851   : > { %5949 = vmatpush3.bf16.msra.mxu1 %v6474_v15  ;;  %5928 = vmatprep.subr.bf16.mxu0 %v6475_v16 }
 0x852   : > { %5950 = vmatprep.subr.bf16.mxu1 %v6476_v17 }
 0x854   : > { %5929 = vmatpush3.bf16.msra.mxu0 %v6477_v35 }
 0x855   : > { %5951 = vmatpush3.bf16.msra.mxu1 %v6478_v41  ;;  %5958 = vmatprep.subr.bf16.mxu0 %v6479_v38 }
 0x856   : > { %5980 = vmatprep.subr.bf16.mxu1 %v6480_v20 }
 0x857   : > { %4898 = vmatmul.mubr.bf16.vlgmr.msra.gmra.mrb[48].mxu0 %v3666_v2 }
 0x858   : > { %4938 = vmatmul.mubr.bf16.vlgmr.msra.gmra.mrb[48].mxu1 %v3668_v24  ;;  %5959 = vmatpush3.bf16.msra.mxu0 %v6481_v1 }
 0x859   : > { %4977 = vmatprep.mubr.bf16.mxu0 %v3671_v25  ;;  %5981 = vmatpush3.bf16.msra.mxu1 %v6482_v22 }
 0x85a   : > { %5017 = vmatprep.mubr.bf16.mxu1 %v3673_v26  ;;  %5960 = vmatprep.subr.bf16.mxu0 %v6483_v34 }
 0x85b   : > { %5982 = vmatprep.subr.bf16.mxu1 %v6484_v37 }
 0x85c   : > { %5961 = vmatpush3.bf16.msra.mxu0 %v6485_v28 }
 0x85d   : > { %5983 = vmatpush3.bf16.msra.mxu1 %v6486_v8  ;;  %5962 = vmatprep.subr.bf16.mxu0 %v6487_v10 }
 0x85e   : > { %5984 = vmatprep.subr.bf16.mxu1 %v6488_v19 }
 0x860   : > { %5963 = vmatpush3.bf16.msra.mxu0 %v6489_v29 }
 0x861   : > { %5985 = vmatpush3.bf16.msra.mxu1 %v6490_v30  ;;  %5964 = vmatprep.subr.bf16.mxu0 %v6491_v27 }
 0x862   : > { %5986 = vmatprep.subr.bf16.mxu1 %v6492_v31 }
 0x864   : > { %5965 = vmatpush3.bf16.msra.mxu0 %v6493_v32 }
 0x865   : > { %5987 = vmatpush3.bf16.msra.mxu1 %v6494_v40  ;;  %5966 = vmatprep.subr.bf16.mxu0 %v6495_v42 }
 0x866   : > { %5988 = vmatprep.subr.bf16.mxu1 %v6496_v43 }
 0x868   : > { %5967 = vmatpush3.bf16.msra.mxu0 %v6497_v44 }
 0x869   : > { %5989 = vmatpush3.bf16.msra.mxu1 %v6498_v45  ;;  %5968 = vmatprep.subr.bf16.mxu0 %v6499_v46 }
 0x86a   : > { %5990 = vmatprep.subr.bf16.mxu1 %v6500_v47 }
 0x86c   : > { %5969 = vmatpush3.bf16.msra.mxu0 %v6501_v48 }
 0x86d   : > { %5991 = vmatpush3.bf16.msra.mxu1 %v6502_v49  ;;  %5970 = vmatprep.subr.bf16.mxu0 %v6503_v50 }
 0x86e   : > { %5992 = vmatprep.subr.bf16.mxu1 %v6504_v51 }
 0x870   : > { %5971 = vmatpush3.bf16.msra.mxu0 %v6505_v52 }
 0x871   : > { %5993 = vmatpush3.bf16.msra.mxu1 %v6506_v53  ;;  %5972 = vmatprep.subr.bf16.mxu0 %v6507_v56 }
 0x872   : > { %5994 = vmatprep.subr.bf16.mxu1 %v6508_v57 }
 0x874   : > { %5973 = vmatpush3.bf16.msra.mxu0 %v6509_v58 }
 0x875   : > { %5995 = vmatpush3.bf16.msra.mxu1 %v6510_v60 }
 0x877   : > { %4978 = vmatmul.mubr.bf16.vlgmr.msra.gmra.mrb[52].mxu0 %v3670_v62 }
 0x878   : > { %5018 = vmatmul.mubr.bf16.vlgmr.msra.gmra.mrb[52].mxu1 %v3672_v3 }
 0x8ea   : > { %v5842_v6 = vpop.f32.mrb[40].mxu0  ;;  %v5864_v4 = vpop.f32.mrb[40].mxu1 }
 0x8eb   : > { %v5843_v63 = vpop.f32.mrb[41].mxu0  ;;  %v5865_v5 = vpop.f32.mrb[41].mxu1 }
 0x8ec   : > { %v5844_v36 = vadd.f32 %v5843_v63, %v5842_v6  ;;  %v5866_v11 = vadd.f32 %v5865_v5, %v5864_v4  ;;  %v5845_v12 = vpop.f32.mrb[42].mxu0  ;;  %v5867_v0 = vpop.f32.mrb[42].mxu1  ;;  %v5721_v6 = vld [vmem:[%s959_s18] ss:$0 sm:$0xff]  ;;  %v6673_v5 = vmov (!%p5722_p2), 0.0  }
 0x8ed   : > { %v5846_v14 = vpop.f32.mrb[43].mxu0  ;;  %v5868_v15 = vpop.f32.mrb[43].mxu1  ;;  %v5060_v63 = vld [vmem:[%s7706_s26] sm:$0x1] (!%p5722_p2)  ;;  %6211 = vmatprep.subr.mxu0 (!%p5722_p2), %v6673_v5  ;;  %6213 = vmatprep.mubr.msk.f32.mxu0 (!%p5722_p2), %vm6674_vm7, %v6673_v5 }
 0x8ee   : > { %v4740_v16 = vadd.f32 %v5844_v36, %v5591_v7  ;;  %vm5061_vm8 = vcmp.lt.f32.partialorder (!%p5722_p2), %v5060_v63, -0.5  ;;  %v6675_v36 = vmov (!%p5722_p2), 1.0  }
 0x8f0   : > { %v4780_v17 = vadd.f32 %v5866_v11, %v4740_v16  ;;  %v5062_v11 = vsel (!%p5722_p2), %vm5061_vm8, 0.0, %v6675_v36 }
 0x8f1   : > { %v5137_v12 = vsel (!%p5722_p2), %vm5136_vm6, %v5062_v11, 0.0 }
 0x90a   : > { %v5886_v54 = vpop.f32.mrb[44].mxu0  ;;  %v5908_v33 = vpop.f32.mrb[44].mxu1 }
 0x90b   : > { %v5887_v35 = vpop.f32.mrb[45].mxu0  ;;  %v5909_v55 = vpop.f32.mrb[45].mxu1 }
 0x90c   : > { %v5888_v41 = vadd.f32 %v5887_v35, %v5886_v54  ;;  %v5910_v38 = vadd.f32 %v5909_v55, %v5908_v33  ;;  %v5889_v18 = vpop.f32.mrb[46].mxu0  ;;  %v5911_v20 = vpop.f32.mrb[46].mxu1 }
 0x90d   : > { %v5890_v21 = vpop.f32.mrb[47].mxu0  ;;  %v5912_v39 = vpop.f32.mrb[47].mxu1 }
 0x90e   : > { %v4820_v1 = vadd.f32 %v5888_v41, %v4780_v17 }
 0x910   : > { %v4860_v2 = vadd.f32 %v5910_v38, %v4820_v1 }
 0x92a   : > { %v5930_v22 = vpop.f32.mrb[48].mxu0 }
 0x92b   : > { %v5952_v24 = vpop.f32.mrb[48].mxu1  ;;  %v5931_v34 = vpop.f32.mrb[49].mxu0 }
 0x92c   : > { %v5932_v25 = vadd.f32 %v5931_v34, %v5930_v22  ;;  %v5953_v37 = vpop.f32.mrb[49].mxu1  ;;  %v5933_v26 = vpop.f32.mrb[50].mxu0 }
 0x92d   : > { %v5954_v28 = vadd.f32 %v5953_v37, %v5952_v24  ;;  %v5955_v8 = vpop.f32.mrb[50].mxu1  ;;  %v5934_v10 = vpop.f32.mrb[51].mxu0 }
 0x92e   : > { %v4900_v19 = vadd.f32 %v5932_v25, %v4860_v2  ;;  %v5956_v29 = vpop.f32.mrb[51].mxu1 }
 0x930   : > { %v4940_v30 = vadd.f32 %v5954_v28, %v4900_v19 }
 0x94a   : > { %v5974_v27 = vpop.f32.mrb[52].mxu0 }
 0x94b   : > { %v5996_v31 = vpop.f32.mrb[52].mxu1  ;;  %v5975_v32 = vpop.f32.mrb[53].mxu0 }
 0x94c   : > { %v5976_v40 = vadd.f32 %v5975_v32, %v5974_v27  ;;  %v5997_v42 = vpop.f32.mrb[53].mxu1  ;;  %v5977_v43 = vpop.f32.mrb[54].mxu0 }
 0x94d   : > { %v5998_v44 = vadd.f32 %v5997_v42, %v5996_v31  ;;  %v5999_v45 = vpop.f32.mrb[54].mxu1  ;;  %v5978_v46 = vpop.f32.mrb[55].mxu0 }
 0x94e   : > { %v4980_v47 = vadd.f32 %v5976_v40, %v4940_v30  ;;  %v6000_v48 = vpop.f32.mrb[55].mxu1 }
 0x950   : > { %v5020_v49 = vadd.f32 %v5998_v44, %v4980_v47 }
 0x952   : > { %v5025_v50 = vadd.f32 %v5020_v49, %v7236_v23  ;;  %v5720_v23 = vld [vmem:[%s956_s24] ss:$0 sm:$0xff] }
 0x954   : > { %v5028_v51 = vsel %vm1100_vm4, %v5025_v50, 0.0 }
 0x955   : > { %5029 = vadd.xlane.f32.xlu0 %v5028_v51 }
 0x959   : > { %5138 = vadd.xlane.f32.xlu0 (!%p5722_p2), %v5137_v12 }
 0x9e2   : > { %v5030_v52 = vpop.xlane.xlu0 %5029 }
 0x9e3   : > { %v5031_v53 = vmul.f32 0.03125, %v5030_v52 }
 0x9e5   : > { %v5032_v56 = vsub.f32 %v5025_v50, %v5031_v53 }
 0x9e6   : > { %v5139_v15 = vpop.xlane.xlu0 (!%p5722_p2), %5138 }
 0x9e7   : > { %v5033_v57 = vmul.f32 %v5032_v56, %v5032_v56  ;;  %v5140_v16 = vmax.f32 (!%p5722_p2), %v5139_v15, 1.0 }
 0x9e9   : > { %v5034_v58 = vsel %vm1100_vm4, %v5033_v57, 0.0 }
 0x9ea   : > { %5035 = vadd.xlane.f32.xlu1 %v5034_v58 }
 0xa77   : > { %v5036_v59 = vpop.xlane.xlu1 %5035 }
 0xa78   : > { %v5037_v60 = vmul.f32 0.03125, %v5036_v59 }
 0xa7a   : > { %v5038_v61 = vadd.f32 1e-05, %v5037_v60 }
 0xa7c   : > { %6529 = vrsqrt.f32 %v5038_v61 }
 0xa7d   : > { %6532 = vrcp.f32 (!%p5722_p2), %v5140_v16 }
 0xa86   : > { %v6530_v62 = vpop.eup %6529 }
 0xa87   : > { %v5040_v3 = vmul.f32 %v6530_v62, %v5032_v56  ;;  %5059 = sbr.rel (%p5722_p2) target bundleno = 3080 (0xc08), region = 108  ;;  %v6533_v17 = vpop.eup (!%p5722_p2), %6532 }
 0xa89   : > { %v5047_v4 = vmul.f32 %v5720_v23, %v5040_v3 }
 0xa8b   : > { %v5054_v7 = vadd.f32 %v5721_v6, %v5047_v4 }
 0xa8d   : > { %5055 = vst.msk [vmem:[#allocation2] sm:$0xff] %vm1100_vm4, %v5054_v7  ;;  %6212 = vmatpush3.msra.mxu0 (!%p5722_p2), %v5054_v7  ;;  %v5151_v0 = vmul.f32 (!%p5722_p2), %v5054_v7, %v5054_v7 }
 0xa8e   : > { %6214 = vmatmul.mubr.msk.f32.vlgmr.msra.gmra.mrb[0].mxu0 %vm2032_vm5, %v5062_v11 }
 0xa8f   : > { %v5152_v14 = vsel %vm1100_vm4, %v5151_v0, 0.0 }
 0xa90   : > { %5153 = vadd.xlane.f32.xlu1 %v5152_v14 }
 0xb1d   : > { %v5154_v38 = vpop.xlane.xlu1 %5153 }
 0xb1e   : > { %v5155_v18 = vmax.f32 %v5154_v38, 1e-24 }
 0xb20   : > { %6534 = vrsqrt.f32 %v5155_v18 }
 0xb2a   : > { %v6535_v39 = vpop.eup %6534 }
 0xb2b   : > { %v5157_v22 = vmul.f32 %v6535_v39, %v5054_v7 }
 0xb61   : > { %v5132_v54 = vpop.f32.mrb[0].mxu0 }
 0xb62   : > { %v5142_v33 = vmul.f32 %v6533_v17, %v5132_v54  ;;  %v6215_v35 = vpop.f32.mrb[1].mxu0 }
 0xb64   : > { %v5143_v55 = vmul.f32 %v5142_v33, %v5142_v33 }
 0xb66   : > { %v5145_v41 = vsel %vm5144_vm9, %v5143_v55, 0.0 }
 0xb67   : > { %5146 = vadd.xlane.f32.xlu0 %v5145_v41 }
 0xbf4   : > { %v5147_v20 = vpop.xlane.xlu0 %5146 }
 0xbf5   : > { %v5148_v21 = vmax.f32 %v5147_v20, 1e-24 }
 0xbf7   : > { %6536 = vrsqrt.f32 %v5148_v21 }
 0xc01   : > { %v6537_v1 = vpop.eup %6536 }
 0xc02   : > { %v5150_v2 = vmul.f32 %v6537_v1, %v5142_v33 }
 0xc04   : > { %5169 = vst.msk [vmem:[%s888_s15] sm:$0x1] %vm5144_vm9, %v5150_v2  ;;  %v5166_v24 = vrot.slane %v5150_v2, %v7154_v13 }
 0xc06   : > { %v5167_v34 = vsel %vm5160_vm10, %v5166_v24, %v5157_v22 }
 0xc07   : > { %5168 = vst.msk [vmem:[%s6959_s2] sm:$0xff] %vm1100_vm4, %v5167_v34 }
 0xc08 PF: > { %s7707_s1 = sld [smem:[#allocation13_spill]]  ;;  %s7709_s13 = sld [smem:[#allocation43_spill]] }
 0xc09   : > { %s5188_s7 = sshll.u32 %s6959_s2, 4  ;;  %s5171_s20 = scalar_lea.sflag [#allocation4], %s6858_s30  ;;  %s5189_s7 = int_to_ptr.vmem [resolvable:$true] %s5188_s7 }
 0xc0a   : > { %s6538_s27 = scalar_lea.vmem %s5189_s7, 128  ;;  %s6676_s9 = smov [#allocation3]  }
 0xc0b   : > { %p6539_p4 = scmp.ne.s32.totalorder %s5189_s7, %s6538_s27  ;;  %s6542_s5 = sshll.u32 %s6676_s9, 4  ;;  %s6543_s5 = int_to_ptr.vmem [resolvable:$false] %s6542_s5 }
 0xc0c   : > { %s6544_s23 = scalar_lea.vmem %s6543_s5, 256  ;;  %p6545_p7 = scmp.lt.s32.totalorder %s5189_s7, %s6543_s5 }
 0xc0d   : > { %p6540_p5 = pnand %p6539_p4, %p6837_p3  ;;  %p6546_p8 = scmp.lt.s32.totalorder %s6544_s23, %s6538_s27 }
 0xc0e   : > { %s5725_s18 = sshll.u32 %s7707_s1, 7 }
 0xc0f   : > { %s7519_s14 = scalar_lea.hbm %s7709_s13, %s5725_s18  ;;  %p6541_p6 = pneg %p6540_p5 }
 0xc10   : > { %p6547_p10 = por %p6546_p8, %p6545_p7 }
 0xc12   : > { %p6548_p11 = pnand %p6547_p10, %p6541_p6 }
 0xc14   : > { %6551 = shalt.err (!%p6548_p11)
}
 0xc15   : > { %s6552_s2 = scalar_lea.hbm %s7519_s14, 128  ;;  %s6556_s0 = scalar_lea.hbm %s7709_s13, 256 }
 0xc16   : > { %p6553_p12 = scmp.ne.s32.totalorder %s7519_s14, %s6552_s2  ;;  %p6557_p1 = scmp.lt.u32.totalorder %s7519_s14, %s7709_s13 }
 0xc17   : > { %p6558_p2 = scmp.lt.u32.totalorder %s6556_s0, %s6552_s2  ;;  %p6560_p5 = scmp.lt.u32.totalorder %s6552_s2, %s7519_s14 }
 0xc18   : > { %p6554_p13 = pnand %p6553_p12, %p6837_p3 }
 0xc19   : > { %p6559_p4 = por %p6558_p2, %p6557_p1 }
 0xc1a   : > { %p6555_p0 = pneg %p6554_p13 }
 0xc1b   : > { %p6561_p6 = por %p6560_p5, %p6559_p4 }
 0xc1d   : > { %p6562_p7 = pnand %p6561_p6, %p6555_p0 }
 0xc1f   : > { %6565 = shalt.err (!%p6562_p7)
}
 0xc20   : > { %6297 = dma.vmem_to_hbm [thread:$0]  (%p6837_p3), %s5189_s7, 128, %s7519_s14, %s5171_s20  }
 0xc21   : > { %s5726_s22 = sshll.u32 %s7707_s1, 4  ;;  %s5201_s25 = sshll.u32 %s888_s15, 4  ;;  %s5202_s25 = int_to_ptr.vmem [resolvable:$true] %s5201_s25 }
 0xc22   : > { %s7710_s26 = sld [smem:[#allocation44_spill]]  ;;  %s5176_s3 = scalar_lea.sflag [#allocation6], %s6858_s30 }
 0xc23   : > { %s6566_s27 = scalar_lea.vmem %s5202_s25, 16  ;;  %s6677_s9 = smov [#allocation5]  }
 0xc24   : > { %p6567_p8 = scmp.ne.s32.totalorder %s5202_s25, %s6566_s27  ;;  %s6570_s5 = sshll.u32 %s6677_s9, 4  ;;  %s6571_s5 = int_to_ptr.vmem [resolvable:$false] %s6570_s5 }
 0xc25   : > { %s6572_s23 = scalar_lea.vmem %s6571_s5, 32  ;;  %p6573_p12 = scmp.lt.s32.totalorder %s5202_s25, %s6571_s5 }
 0xc26   : > { %p6568_p10 = pnand %p6567_p8, %p6837_p3  ;;  %p6574_p13 = scmp.lt.s32.totalorder %s6572_s23, %s6566_s27 }
 0xc28   : > { %s7711_s18 = smov %s7710_s26  ;;  %s7546_s29 = scalar_lea.hbm %s7710_s26, %s5726_s22 }
 0xc29   : > { %p6569_p11 = pneg %p6568_p10  ;;  %p6575_p0 = por %p6574_p13, %p6573_p12 }
 0xc2b   : > { %p6576_p1 = pnand %p6575_p0, %p6569_p11 }
 0xc2d   : > { %6579 = shalt.err (!%p6576_p1)
}
 0xc2e   : > { %s6580_s15 = scalar_lea.hbm %s7546_s29, 16  ;;  %s6584_s14 = scalar_lea.hbm %s7711_s18, 32 }
 0xc2f   : > { %p6581_p2 = scmp.ne.s32.totalorder %s7546_s29, %s6580_s15  ;;  %p6585_p6 = scmp.lt.u32.totalorder %s7546_s29, %s7711_s18 }
 0xc30   : > { %p6586_p7 = scmp.lt.u32.totalorder %s6584_s14, %s6580_s15  ;;  %p6588_p10 = scmp.lt.u32.totalorder %s6580_s15, %s7546_s29 }
 0xc31   : > { %p6582_p4 = pnand %p6581_p2, %p6837_p3 }
 0xc32   : > { %p6587_p8 = por %p6586_p7, %p6585_p6 }
 0xc33   : > { %p6583_p5 = pneg %p6582_p4 }
 0xc34   : > { %p6589_p11 = por %p6588_p10, %p6587_p8 }
 0xc36   : > { %p6590_p12 = pnand %p6589_p11, %p6583_p5 }
 0xc38   : > { %6593 = shalt.err (!%p6590_p12)
}
 0xc39   : > { %6298 = dma.vmem_to_hbm [thread:$0]  (%p6837_p3), %s5202_s25, 16, %s7546_s29, %s5176_s3  }
 0xc3a PF: > { %s7712_s2 = sld [smem:[#allocation16_spill]]  ;;  %s7713_s6 = sld [smem:[#allocation9_spill]] }
 0xc40   : > { %p6308_p13 = scmp.ge.s32.totalorder %s7712_s2, 2  ;;  %s5213_s0 = sand.u32 1, %s7713_s6  }
 0xc41   : > { %s5214_s21 = scalar_lea.sflag [#allocation4], %s5213_s0 }
 0xc42   : > { %p6302_p0 = pnand %p6308_p13, %p6847_p9 }
 0xc44   : > { %6627 = dma.done.wait (!%p6302_p0), %s5214_s21, 128  }
 0xc45   : > { %6629 = vsyncadd (!%p6302_p0), %s5214_s21, 4294967168  ;;  %s5223_s19 = scalar_lea.sflag [#allocation6], %s5213_s0 }
 0xc46   : > { %6631 = dma.done.wait (!%p6302_p0), %s5223_s19, 16  }
 0xc47   : > { %6633 = vsyncadd (!%p6302_p0), %s5223_s19, 4294967280  ;;  %s38_s0 = sadd.s32 1, %s7712_s2   ;;  %s7715_s2 = sld [smem:[#allocation10_spill]] }
 0xc48   : > { %p35_p1 = scmp.ge.s32.totalorder %s38_s0, 10   ;;  %s7716_s25 = sld [smem:[#allocation11_spill]] }
 0xc49   : > { %s7717_s26 = sld [smem:[#allocation21_spill]]  ;;  %s7718_s27 = sld [smem:[#allocation14_spill]] }
 0xc4a   : > { %s7719_s3 = sld [smem:[#allocation15_spill]]  ;;  %s7720_s28 = sld [smem:[#allocation17_spill]] }
 0xc4b   : > { %s7721_s29 = sld [smem:[#allocation19_spill]]  ;;  %37 = sbr.rel (!%p35_p1) target bundleno = 26 (0x1a), region = 211 }
 0xc52   :  { %5227 = vsyncpa [#allocation4], 1 }
 0xc53   :  { %5229 = vsyncpa [#allocation4 + $0x1], 1 }
 0xc54   :  { %5230 = vsyncpa [#allocation6], 1 }
 0xc55   :  { %5232 = vsyncpa [#allocation6 + $0x1], 1 }

// kernel: baseline_forward.3
= control target key start
LH: loop header
LB: loop body
LE: loop exit
PB: predicated region body
PF: predicated region fallthrough
CT: control target
= control target key end

     0   :  { %s7611_s0 = inlined_call_operand.vmem [shape: f32[2,1,8], index: 0, kind: input, shape index: {}]   ;;  %s7612_s1 = inlined_call_operand.vmem [shape: f32[2,8,64], index: 1, kind: input, shape index: {}]   ;;  %s7613_s2 = inlined_call_operand.vmem [shape: f32[64,32], index: 2, kind: input, shape index: {}]   ;;  %s7614_s3 = inlined_call_operand.vmem [shape: f32[1,32], index: 3, kind: input, shape index: {}]   ;;  %s7615_s4 = inlined_call_operand.vmem [shape: f32[4,4,32,8], index: 4, kind: input, shape index: {}]   ;;  %s7616_s5 = inlined_call_operand.vmem [shape: f32[4,4,1,8], index: 5, kind: input, shape index: {}]   ;;  %s7617_s6 = inlined_call_operand.vmem [shape: f32[4,4,32,8], index: 6, kind: input, shape index: {}]   ;;  %s7618_s7 = inlined_call_operand.vmem [shape: f32[4,4,1,8], index: 7, kind: input, shape index: {}]   ;;  %s7619_s8 = inlined_call_operand.vmem [shape: f32[4,4,32,8], index: 8, kind: input, shape index: {}]   ;;  %s7620_s9 = inlined_call_operand.vmem [shape: f32[4,4,1,8], index: 9, kind: input, shape index: {}]   ;;  %s7621_s10 = inlined_call_operand.vmem [shape: f32[4,4,8,32], index: 10, kind: input, shape index: {}]   ;;  %s7622_s11 = inlined_call_operand.vmem [shape: f32[4,1,32], index: 11, kind: input, shape index: {}]   ;;  %s7623_s12 = inlined_call_operand.vmem [shape: f32[4,1,32], index: 12, kind: input, shape index: {}]   ;;  %s7624_s13 = inlined_call_operand.vmem [shape: f32[4,1,32], index: 13, kind: input, shape index: {}]   ;;  %s7625_s14 = inlined_call_operand.vmem [shape: bf16[4,32,2048], index: 14, kind: input, shape index: {}]   ;;  %s7626_s15 = inlined_call_operand.vmem [shape: f32[4,1,2048], index: 15, kind: input, shape index: {}]   ;;  %s7627_s16 = inlined_call_operand.vmem [shape: bf16[4,2048,32], index: 16, kind: input, shape index: {}]   ;;  %s7628_s17 = inlined_call_operand.vmem [shape: f32[4,1,32], index: 17, kind: input, shape index: {}]   ;;  %s7629_s18 = inlined_call_operand.vmem [shape: f32[4,1,32], index: 18, kind: input, shape index: {}]   ;;  %s7630_s19 = inlined_call_operand.vmem [shape: f32[4,1,32], index: 19, kind: input, shape index: {}]   ;;  %s7631_s20 = inlined_call_operand.hbm [shape: f32[2,8,32], index: 20, kind: output, shape index: {0}]   ;;  %s7632_s21 = inlined_call_operand.hbm [shape: f32[2,1,32], index: 21, kind: output, shape index: {1}]  }
   0x1   :  { %7655 = sst [smem:[#allocation27_spill]] %s7611_s0 }
   0x2   :  { %7656 = sst [smem:[#allocation28_spill]] %s7612_s1 }
   0x3   :  { %7657 = sst [smem:[#allocation29_spill]] %s7613_s2 }
   0x4   :  { %7658 = sst [smem:[#allocation30_spill]] %s7614_s3 }
   0x5   :  { %7659 = sst [smem:[#allocation31_spill]] %s7615_s4 }
   0x6   :  { %7660 = sst [smem:[#allocation32_spill]] %s7616_s5 }
   0x7   :  { %7661 = sst [smem:[#allocation33_spill]] %s7617_s6 }
   0x8   :  { %7662 = sst [smem:[#allocation34_spill]] %s7618_s7 }
   0x9   :  { %7663 = sst [smem:[#allocation35_spill]] %s7619_s8 }
   0xa   :  { %7664 = sst [smem:[#allocation36_spill]] %s7620_s9 }
   0xb   :  { %7665 = sst [smem:[#allocation37_spill]] %s7621_s10 }
   0xc   :  { %7666 = sst [smem:[#allocation38_spill]] %s7624_s13 }
   0xd   :  { %7667 = sst [smem:[#allocation39_spill]] %s7625_s14 }
   0xe   :  { %7668 = sst [smem:[#allocation40_spill]] %s7626_s15 }
   0xf   :  { %7669 = sst [smem:[#allocation41_spill]] %s7629_s18 }
  0x10   :  { %7670 = sst [smem:[#allocation42_spill]] %s7630_s19 }
  0x11   :  { %7671 = sst [smem:[#allocation43_spill]] %s7631_s20 }
  0x12   :  { %7672 = sst [smem:[#allocation44_spill]] %s7632_s21 }
  0x13   :  { %27 = vsyncpa [#allocation4], 0 }
  0x14   :  { %29 = vsyncpa [#allocation4 + $0x1], 0 }
  0x15   :  { %30 = vsyncpa [#allocation6], 0 }
  0x16   :  { %32 = vsyncpa [#allocation6 + $0x1], 0  ;;  %s6799_s2 = smov 0   ;;  %s6801_s25 = smov 0  }
  0x17   :  { %s6803_s26 = smov 0   ;;  %s6805_s27 = smov 0  }
  0x18   :  { %s6807_s3 = smov 0   ;;  %s6809_s28 = smov 0  }
  0x19   :  { %s6811_s29 = smov 0   ;;  %s6813_s0 = smov 0  }
  0x1a LB: > { %7673 = sst [smem:[#allocation9_spill]] %s6647_s2  ;;  %s5484_s4 = sadd.s32 4294967295, %s6675_s0   ;;  %s6675_s0 = sphi %s6813_s0, %s38_s0   ;;  %s6671_s29 = sphi %s6811_s29, %s7738_s29   ;;  %s6667_s28 = sphi %s6809_s28, %s7737_s28   ;;  %s6663_s3 = sphi %s6807_s3, %s7736_s3   ;;  %s6659_s27 = sphi %s6805_s27, %s7735_s27   ;;  %s6655_s26 = sphi %s6803_s26, %s7734_s26   ;;  %s6651_s25 = sphi %s6801_s25, %s7733_s25   ;;  %s6647_s2 = sphi %s6799_s2, %s7732_s2  }
  0x1b   : > { %7674 = sst [smem:[#allocation10_spill]] %s6651_s25  ;;  %s5485_s30 = sadd.s32 4294967294, %s6675_s0  }
  0x1c   : > { %7675 = sst [smem:[#allocation11_spill]] %s6655_s26  ;;  %s47_s5 = sadd.s32 1, %s6667_s28 }
  0x1d   : > { %7676 = sst [smem:[#allocation12_spill]] %s6659_s27  ;;  %p48_p0 = scmp.ge.s32.totalorder %s47_s5, 4 }
  0x1e   : > { %7677 = sst [smem:[#allocation13_spill]] %s6663_s3  ;;  %s50_s22 = sadd.s32 1, %s6671_s29 }
  0x1f   : > { %7678 = sst [smem:[#allocation14_spill]] %s6667_s28  ;;  %p577_p1 = scmp.ne.s32.totalorder %s6655_s26, %s6651_s25 }
  0x20   : > { %7679 = sst [smem:[#allocation15_spill]] %s6671_s29  ;;  %p578_p2 = scmp.eq.s32.totalorder %s5484_s4, 7 }
  0x21   : > { %7680 = sst [smem:[#allocation16_spill]] %s6675_s0  ;;  %s7740_s5 = smov (%p48_p0, %s47_s5), 0 }
  0x22   : > { %7681 = sst [smem:[#allocation17_spill]] %s7740_s5  ;;  %s7742_s22 = smov (!%p48_p0, %s50_s22), %s6671_s29 }
  0x23   : > { %p6848_p3 = por %p578_p2, %p577_p1  ;;  %p583_p4 = scmp.ne.s32.totalorder %s6651_s25, %s6647_s2 }
  0x24   : > { %p52_p5 = scmp.ge.s32.totalorder %s7742_s22, 2  ;;  %p584_p6 = scmp.eq.s32.totalorder %s5485_s30, 7 }
  0x25   : > { %s7682_s23 = scalar_select %p6848_p3, 1, 0 }
  0x26   : > { %p5488_p7 = scmp.ge.s32.totalorder %s6675_s0, 1  ;;  %p759_p8 = scmp.lt.s32.totalorder %s6675_s0, 9 }
  0x27   : > { %7683 = sst [smem:[#allocation18_spill]] %s7682_s23  ;;  %s7744_s22 = smov (%p52_p5, %s7742_s22), 0 }
  0x28   : > { %7684 = sst [smem:[#allocation19_spill]] %s7744_s22  ;;  %p6858_p9 = por %p584_p6, %p583_p4 }
  0x29   : > { %p760_p10 = pnand %p5488_p7, %p759_p8  ;;  %s564_s24 = ssub.s32 %s6671_s29, %s7744_s22 }
  0x2a   : > { %s7685_s1 = scalar_select %p6858_p9, 1, 0 }
  0x2b   : > { %s567_s4 = sadd.s32 1, %s6655_s26  ;;  %p565_p11 = scmp.eq.s32.totalorder %s564_s24, 0 }
  0x2c   : > { %7686 = sst [smem:[#allocation20_spill]] %s7685_s1  ;;  %763 = sbr.rel (%p760_p10) target bundleno = 3134 (0xc3e), region = 100 }
  0x2d   : > { %s6866_s5 = scalar_select %p565_p11, %s6655_s26, %s567_s4  }
  0x2f   : > { %7687 = sst [smem:[#allocation21_spill]] %s6866_s5 }
  0x33   : > { %s6869_s30 = sand.u32 1, %s6651_s25   ;;  %p889_p12 = scmp.lt.s32.totalorder %s6663_s3, 1 }
  0x34   : > { %p896_p13 = scmp.lt.s32.totalorder %s6659_s27, 3  ;;  %s7688_s24 = sld [smem:[#allocation27_spill]] }
  0x35   : > { %s890_s2 = scalar_select %p889_p12, %s6663_s3, 1 }
  0x36   : > { %s6876_s1 = scalar_select %p896_p13, %s6659_s27, 3 }
  0x37   : > { %s5490_s5 = sshll.u32 %s890_s2, 3  ;;  %s7690_s28 = sld [smem:[#allocation28_spill]] }
  0x38   : > { %s5731_s21 = sshll.u32 %s6876_s1, 7  ;;  %s7691_s29 = sld [smem:[#allocation31_spill]] }
  0x39   : > { %s5493_s3 = sshll.u32 %s6876_s1, 2  ;;  %s7694_s6 = sld [smem:[#allocation33_spill]] }
  0x3a   : > { %s6881_s4 = scalar_lea.vmem %s7688_s24, %s890_s2  ;;  %s7692_s24 = sld [smem:[#allocation32_spill]] }
  0x3b   : > { %7689 = sst [smem:[#allocation22_spill]] %s6881_s4  ;;  %s7697_s8 = sld [smem:[#allocation35_spill]] }
  0x3c   : > { %s7695_s7 = sld [smem:[#allocation34_spill]]  ;;  %s7698_s9 = sld [smem:[#allocation36_spill]] }
  0x3d   : > { %s6886_s0 = scalar_lea.vmem %s7690_s28, %s5490_s5  ;;  %s5734_s18 = sshll.u32 %s6876_s1, 5 }
  0x3e   : > { %s6892_s22 = scalar_lea.vmem %s7691_s29, %s5731_s21  ;;  %s7700_s10 = sld [smem:[#allocation37_spill]] }
  0x3f   : > { %s6903_s25 = scalar_lea.vmem %s7694_s6, %s5731_s21  ;;  %s5735_s27 = sshll.u32 %s6876_s1, 8 }
  0x40   : > { %s6898_s4 = scalar_lea.vmem %s7692_s24, %s5493_s3  ;;  %s7702_s14 = sld [smem:[#allocation39_spill]] }
  0x41   : > { %7693 = sst [smem:[#allocation23_spill]] %s6898_s4  ;;  %s6913_s29 = scalar_lea.vmem %s7697_s8, %s5731_s21 }
  0x42   : > { %s6908_s20 = scalar_lea.vmem %s7695_s7, %s5493_s3  ;;  %s6918_s24 = scalar_lea.vmem %s7698_s9, %s5493_s3 }
  0x43   : > { %7696 = sst [smem:[#allocation24_spill]] %s6908_s20  ;;  %s5504_s9 = sshll.u32 %s6876_s1, 4 }
  0x44   : > { %7699 = sst [smem:[#allocation25_spill]] %s6918_s24  ;;  %s6924_s26 = scalar_lea.vmem %s7700_s10, %s5734_s18 }
  0x45   : > { %s7703_s15 = sld [smem:[#allocation40_spill]]  ;;  %s5736_s28 = sshll.u32 %s6876_s1, 10 }
  0x46   : > { %s6943_s6 = scalar_lea.vmem %s7702_s14, %s5735_s27  ;;  %s953_s21 = scalar_lea.vmem %s7628_s17, %s6876_s1 }
  0x47   : > { %s6958_s19 = scalar_lea.vmem %s7627_s16, %s5736_s28  ;;  %s7705_s20 = sld [smem:[#allocation41_spill]] }
  0x48   : > { %s7706_s13 = sld [smem:[#allocation42_spill]] }
  0x4b   : > { %s6948_s7 = scalar_lea.vmem %s7703_s15, %s5504_s9  ;;  %s7707_s9 = sshll.u32 %s6869_s30, 3 }
  0x4c   : > { %7704 = sst [smem:[#allocation26_spill]] %s6948_s7  ;;  %s6970_s2 = scalar_lea.vmem [#allocation3], %s7707_s9 }
  0x4d   : > { %s956_s24 = scalar_lea.vmem %s7705_s20, %s6876_s1  ;;  %s888_s15 = scalar_lea.vmem [#allocation5], %s6869_s30 }
  0x4e   : > { %s959_s18 = scalar_lea.vmem %s7706_s13, %s6876_s1  ;;  %s7708_s7 = sld [smem:[#allocation12_spill]] }
  0x54   : > { %p5507_p0 = scmp.ne.s32.totalorder %s7708_s7, 0 }
  0x55   : > { %s7709_s8 = sld [smem:[#allocation29_spill]] (!%p5507_p0)  ;;  %v6677_v3 = vmov (!%p5507_p0), 0.0|0.0   ;;  %vm6678_vm0 = vmmov (!%p5507_p0), 0   ;;  %v6679_v6 = vmov (!%p5507_p0), 0.0   ;;  %v965_v14 = vld [vmem:[%s6886_s0] sm:$0xff] (!%p5507_p0)  ;;  %vm981_vm1 = vcmask (!%p5507_p0), 523264  }
  0x56   : > { %964 = sbr.rel (%p5507_p0) target bundleno = 324 (0x144), region = 104  ;;  %6224 = vmatprep.subr.bf16.mxu0 (!%p5507_p0), %v6677_v3  ;;  %6024 = vmatprep.mubr.msk.f32.mxu0 (!%p5507_p0), %vm6678_vm0, %v6679_v6  ;;  %s7710_s13 = sld [smem:[#allocation30_spill]] (!%p5507_p0)  ;;  %vm1055_vm2 = vcmask (!%p5507_p0), 261120  }
  0x5b   : > { %v966_v0 = vld [vmem:[%s7709_s8] sm:$0xff] (!%p5507_p0)  ;;  %v967_v1 = vld [vmem:[%s7709_s8 + $0x8] sm:$0xff] (!%p5507_p0)  ;;  %v968_v2 = vld [vmem:[%s7709_s8 + $0x10] sm:$0xff] (!%p5507_p0) }
  0x5c   : > { %v6225_v4 = vpack.c.bf16 (!%p5507_p0), %v967_v1, %v966_v0  ;;  %v969_v5 = vld [vmem:[%s7709_s8 + $0x18] sm:$0xff] (!%p5507_p0)  ;;  %v970_v8 = vld [vmem:[%s7709_s8 + $0x20] sm:$0xff] (!%p5507_p0)  ;;  %v971_v9 = vld [vmem:[%s7709_s8 + $0x28] sm:$0xff] (!%p5507_p0) }
  0x5d   : > { %v6228_v7 = vpack.c.bf16 %v969_v5, %v968_v2  ;;  %v6231_v10 = vpack.c.bf16 %v971_v9, %v970_v8  ;;  %v972_v11 = vld [vmem:[%s7709_s8 + $0x30] sm:$0xff]  ;;  %v973_v12 = vld [vmem:[%s7709_s8 + $0x38] sm:$0xff]  ;;  %v5508_v15 = vld [vmem:[%s7710_s13] ss:$0 sm:$0xff] }
  0x5e   : > { %6226 = vmatpush3.bf16.msra.mxu0 %v6225_v4  ;;  %v6234_v13 = vpack.c.bf16 %v973_v12, %v972_v11 }
  0x5f   : > { %6227 = vmatprep.subr.bf16.mxu0 %v6677_v3 }
  0x62   : > { %6229 = vmatpush3.bf16.msra.mxu0 %v6228_v7 }
  0x63   : > { %6230 = vmatprep.subr.bf16.mxu0 %v6677_v3 }
  0x66   : > { %6232 = vmatpush3.bf16.msra.mxu0 %v6231_v10 }
  0x67   : > { %6233 = vmatprep.subr.bf16.mxu0 %v6677_v3 }
  0x6a   : > { %6235 = vmatpush3.bf16.msra.mxu0 %v6234_v13 }
  0x6d   : > { %6025 = vmatmul.mubr.msk.f32.vlgmr.msra.gmra.mrb[0].mxu0 %vm981_vm1, %v965_v14 }
 0x140   : > { %v1051_v16 = vpop.f32.mrb[0].mxu0 }
 0x141   : > { %v1052_v17 = vadd.f32 %v5508_v15, %v1051_v16  ;;  %v6026_v18 = vpop.f32.mrb[1].mxu0 }
 0x143   : > { %1056 = vst.msk [vmem:[#allocation2] sm:$0xff] %vm1055_vm2, %v1052_v17 }
 0x144 PF: > { %v1058_v19 = vld [vmem:[%s6892_s22] sm:$0xff]  ;;  %v1059_v20 = vld [vmem:[%s6892_s22 + $0x8] sm:$0xff]  ;;  %v6680_v22 = vmov 0.0|0.0   ;;  %v1060_v25 = vld [vmem:[%s6892_s22 + $0x10] sm:$0xff]  ;;  %vm6681_vm3 = vmmov 0   ;;  %v6682_v30 = vmov 0.0   ;;  %s7716_s27 = scalar_lea.vmem %s7622_s11, %s6876_s1  ;;  %s7717_s23 = scalar_lea.vmem %s7623_s12, %s6876_s1 }
 0x145   : > { %v1062_v21 = vld [vmem:[%s6892_s22 + $0x20] sm:$0xff]  ;;  %6236 = vmatprep.subr.bf16.mxu0 %v6680_v22  ;;  %6242 = vmatprep.subr.bf16.mxu1 %v6680_v22  ;;  %v6237_v23 = vpack.c.bf16 %v1059_v20, %v1058_v19  ;;  %v1063_v24 = vld [vmem:[%s6892_s22 + $0x28] sm:$0xff]  ;;  %v1061_v26 = vld [vmem:[%s6892_s22 + $0x18] sm:$0xff]  ;;  %vm1102_vm4 = vcmask 261120   ;;  %s7711_s0 = sld [smem:[#allocation24_spill]]  ;;  %vm2034_vm5 = vcmask 64512  }
 0x146   : > { %v6243_v27 = vpack.c.bf16 %v1063_v24, %v1062_v21  ;;  %v1064_v28 = vld [vmem:[%s6892_s22 + $0x30] sm:$0xff]  ;;  %v1065_v29 = vld [vmem:[%s6892_s22 + $0x38] sm:$0xff]  ;;  %6035 = vmatprep.mubr.msk.f32.mxu0 %vm6681_vm3, %v6682_v30  ;;  %6046 = vmatprep.mubr.msk.f32.mxu1 %vm6681_vm3, %v6682_v30  ;;  %v6240_v31 = vpack.c.bf16 %v1061_v26, %v1060_v25  ;;  %v1066_v33 = vld [vmem:[%s6892_s22 + $0x40] sm:$0xff]  ;;  %s7715_s14 = sld [smem:[#allocation22_spill]]  ;;  %s7718_s10 = sld [smem:[#allocation38_spill]] }
 0x147   : > { %6238 = vmatpush3.bf16.msra.mxu0 %v6237_v23  ;;  %v6246_v32 = vpack.c.bf16 %v1065_v29, %v1064_v28  ;;  %v1067_v34 = vld [vmem:[%s6892_s22 + $0x48] sm:$0xff]  ;;  %v1070_v35 = vld [vmem:[%s6892_s22 + $0x60] sm:$0xff]  ;;  %v1068_v40 = vld [vmem:[%s6892_s22 + $0x50] sm:$0xff] }
 0x148   : > { %6244 = vmatpush3.bf16.msra.mxu1 %v6243_v27  ;;  %6239 = vmatprep.subr.bf16.mxu0 %v6680_v22  ;;  %v1071_v36 = vld [vmem:[%s6892_s22 + $0x68] sm:$0xff]  ;;  %v6249_v38 = vpack.c.bf16 %v1067_v34, %v1066_v33  ;;  %v1069_v41 = vld [vmem:[%s6892_s22 + $0x58] sm:$0xff]  ;;  %v1072_v42 = vld [vmem:[%s6892_s22 + $0x70] sm:$0xff] }
 0x149   : > { %6245 = vmatprep.subr.bf16.mxu1 %v6680_v22  ;;  %v6255_v39 = vpack.c.bf16 %v1071_v36, %v1070_v35  ;;  %v1073_v43 = vld [vmem:[%s6892_s22 + $0x78] sm:$0xff]  ;;  %v6252_v44 = vpack.c.bf16 %v1069_v41, %v1068_v40  ;;  %v1386_v45 = vld [vmem:[%s6903_s25] sm:$0xff]  ;;  %v1387_v46 = vld [vmem:[%s6903_s25 + $0x8] sm:$0xff]  ;;  %s7712_s22 = sld [smem:[#allocation23_spill]] }
 0x14a   : > { %v7022_v37 = vld [vmem:[#allocation2] sm:$0xff]  ;;  %v6258_v47 = vpack.c.bf16 %v1073_v43, %v1072_v42  ;;  %v1391_v49 = vld [vmem:[%s6903_s25 + $0x28] sm:$0xff]  ;;  %v1388_v50 = vld [vmem:[%s6903_s25 + $0x10] sm:$0xff]  ;;  %v6261_v52 = vpack.c.bf16 %v1387_v46, %v1386_v45 }
 0x14b   : > { %6241 = vmatpush3.bf16.msra.mxu0 %v6240_v31  ;;  %v1390_v48 = vld [vmem:[%s6903_s25 + $0x20] sm:$0xff]  ;;  %v1389_v51 = vld [vmem:[%s6903_s25 + $0x18] sm:$0xff]  ;;  %v1392_v53 = vld [vmem:[%s6903_s25 + $0x30] sm:$0xff] }
 0x14c   : > { %6247 = vmatpush3.bf16.msra.mxu1 %v6246_v32  ;;  %6248 = vmatprep.subr.bf16.mxu0 %v6680_v22  ;;  %v1393_v54 = vld [vmem:[%s6903_s25 + $0x38] sm:$0xff]  ;;  %v6267_v55 = vpack.c.bf16 %v1391_v49, %v1390_v48  ;;  %v1394_v56 = vld [vmem:[%s6903_s25 + $0x40] sm:$0xff]  ;;  %v1395_v57 = vld [vmem:[%s6903_s25 + $0x48] sm:$0xff]  ;;  %v6264_v58 = vpack.c.bf16 %v1389_v51, %v1388_v50  ;;  %s7719_s3 = scalar_lea.vmem %s7718_s10, %s6876_s1 }
 0x14d   : > { %6254 = vmatprep.subr.bf16.mxu1 %v6680_v22  ;;  %v1398_v59 = vld [vmem:[%s6903_s25 + $0x60] sm:$0xff]  ;;  %v1399_v60 = vld [vmem:[%s6903_s25 + $0x68] sm:$0xff]  ;;  %v6270_v61 = vpack.c.bf16 %v1393_v54, %v1392_v53  ;;  %v1396_v62 = vld [vmem:[%s6903_s25 + $0x50] sm:$0xff]  ;;  %v6273_v0 = vpack.c.bf16 %v1395_v57, %v1394_v56 }
 0x14e   : > { %6036 = vmatmul.mubr.msk.f32.vlgmr.msra.gmra.mrb[0].mxu0 %vm1102_vm4, %v7022_v37  ;;  %v1397_v63 = vld [vmem:[%s6903_s25 + $0x58] sm:$0xff]  ;;  %v1400_v1 = vld [vmem:[%s6903_s25 + $0x70] sm:$0xff]  ;;  %v6279_v3 = vpack.c.bf16 %v1399_v60, %v1398_v59  ;;  %v1710_v4 = vld [vmem:[%s6913_s29] sm:$0xff] }
 0x14f   : > { %6047 = vmatmul.mubr.msk.f32.vlgmr.msra.gmra.mrb[0].mxu1 %vm1102_vm4, %v7022_v37  ;;  %6250 = vmatpush3.bf16.msra.mxu0 %v6249_v38  ;;  %v1401_v2 = vld [vmem:[%s6903_s25 + $0x78] sm:$0xff]  ;;  %v1711_v5 = vld [vmem:[%s6913_s29 + $0x8] sm:$0xff]  ;;  %v6276_v6 = vpack.c.bf16 %v1397_v63, %v1396_v62  ;;  %v1714_v7 = vld [vmem:[%s6913_s29 + $0x20] sm:$0xff]  ;;  %s7713_s25 = sld [smem:[#allocation25_spill]] }
 0x150   : > { %6256 = vmatpush3.bf16.msra.mxu1 %v6255_v39  ;;  %6251 = vmatprep.subr.bf16.mxu0 %v6680_v22  ;;  %v1715_v8 = vld [vmem:[%s6913_s29 + $0x28] sm:$0xff]  ;;  %v6282_v9 = vpack.c.bf16 %v1401_v2, %v1400_v1  ;;  %v6285_v10 = vpack.c.bf16 %v1711_v5, %v1710_v4  ;;  %v1712_v12 = vld [vmem:[%s6913_s29 + $0x10] sm:$0xff]  ;;  %v1713_v13 = vld [vmem:[%s6913_s29 + $0x18] sm:$0xff] }
 0x151   : > { %6257 = vmatprep.subr.bf16.mxu1 %v6680_v22  ;;  %6057 = vmatprep.mubr.msk.f32.mxu0 %vm6681_vm3, %v6682_v30  ;;  %v6291_v11 = vpack.c.bf16 %v1715_v8, %v1714_v7  ;;  %v1716_v14 = vld [vmem:[%s6913_s29 + $0x30] sm:$0xff]  ;;  %v6288_v15 = vpack.c.bf16 %v1713_v13, %v1712_v12  ;;  %v1717_v16 = vld [vmem:[%s6913_s29 + $0x38] sm:$0xff]  ;;  %v1718_v18 = vld [vmem:[%s6913_s29 + $0x40] sm:$0xff] }
 0x152   : > { %6068 = vmatprep.mubr.msk.f32.mxu1 %vm6681_vm3, %v6682_v30  ;;  %v6294_v17 = vpack.c.bf16 %v1717_v16, %v1716_v14  ;;  %v1719_v19 = vld [vmem:[%s6913_s29 + $0x48] sm:$0xff]  ;;  %v1722_v20 = vld [vmem:[%s6913_s29 + $0x60] sm:$0xff]  ;;  %v1720_v25 = vld [vmem:[%s6913_s29 + $0x50] sm:$0xff] }
 0x153   : > { %6253 = vmatpush3.bf16.msra.mxu0 %v6252_v44  ;;  %v6297_v21 = vpack.c.bf16 %v1719_v19, %v1718_v18  ;;  %v1723_v23 = vld [vmem:[%s6913_s29 + $0x68] sm:$0xff]  ;;  %v1721_v26 = vld [vmem:[%s6913_s29 + $0x58] sm:$0xff]  ;;  %v1724_v27 = vld [vmem:[%s6913_s29 + $0x70] sm:$0xff] }
 0x154   : > { %6259 = vmatpush3.bf16.msra.mxu1 %v6258_v47  ;;  %6260 = vmatprep.subr.bf16.mxu0 %v6680_v22  ;;  %v6303_v24 = vpack.c.bf16 %v1723_v23, %v1722_v20  ;;  %v6300_v28 = vpack.c.bf16 %v1721_v26, %v1720_v25  ;;  %v1725_v29 = vld [vmem:[%s6913_s29 + $0x78] sm:$0xff]  ;;  %v5518_v40 = vld [vmem:[%s7711_s0] ss:$0 sm:$0xff]  ;;  %v5519_v41 = vld [vmem:[%s7711_s0 + $0x1] ss:$0 sm:$0xff]  ;;  %s7714_s29 = sld [smem:[#allocation12_spill]] }
 0x155   : > { %6266 = vmatprep.subr.bf16.mxu1 %v6680_v22  ;;  %v6306_v31 = vpack.c.bf16 %v1725_v29, %v1724_v27  ;;  %v5511_v46 = vld [vmem:[%s7712_s22 + $0x1] ss:$0 sm:$0xff]  ;;  %v5520_v51 = vld [vmem:[%s7711_s0 + $0x2] ss:$0 sm:$0xff]  ;;  %v5526_v63 = vld [vmem:[%s7713_s25] ss:$0 sm:$0xff] }
 0x156   : > { %6058 = vmatmul.mubr.msk.f32.vlgmr.msra.gmra.mrb[2].mxu0 %vm1102_vm4, %v7022_v37  ;;  %v5512_v54 = vld [vmem:[%s7712_s22 + $0x2] ss:$0 sm:$0xff]  ;;  %v2345_v13 = vld [vmem:[%s7715_s14] sm:$0x1] }
 0x157   : > { %6069 = vmatmul.mubr.msk.f32.vlgmr.msra.gmra.mrb[2].mxu1 %vm1102_vm4, %v7022_v37  ;;  %6262 = vmatpush3.bf16.msra.mxu0 %v6261_v52  ;;  %v5521_v52 = vld [vmem:[%s7711_s0 + $0x3] ss:$0 sm:$0xff] }
 0x158   : > { %6268 = vmatpush3.bf16.msra.mxu1 %v6267_v55  ;;  %6263 = vmatprep.subr.bf16.mxu0 %v6680_v22 }
 0x159   : > { %6269 = vmatprep.subr.bf16.mxu1 %v6680_v22  ;;  %6079 = vmatprep.mubr.msk.f32.mxu0 %vm6681_vm3, %v6682_v30 }
 0x15a   : > { %6090 = vmatprep.mubr.msk.f32.mxu1 %vm6681_vm3, %v6682_v30  ;;  %p2343_p1 = scmp.lt.s32.totalorder %s7714_s29, 2  ;;  %p5724_p2 = scmp.ne.s32.totalorder %s7714_s29, 3 }
 0x15b   : > { %6265 = vmatpush3.bf16.msra.mxu0 %v6264_v58  ;;  %v5513_v58 = vld [vmem:[%s7712_s22 + $0x3] ss:$0 sm:$0xff]  ;;  %vm5138_vm6 = vcmask (!%p5724_p2), 57344   ;;  %vm6685_vm7 = vmmov (!%p5724_p2), 0   ;;  %vm5146_vm9 = vcmask (!%p5724_p2), 253952  }
 0x15c   : > { %6271 = vmatpush3.bf16.msra.mxu1 %v6270_v61  ;;  %6272 = vmatprep.subr.bf16.mxu0 %v6680_v22  ;;  %s2344_s7 = scalar_select %p2343_p1, 1.0, 0.0 }
 0x15d   : > { %6278 = vmatprep.subr.bf16.mxu1 %v6680_v22 }
 0x15e   : > { %6080 = vmatmul.mubr.msk.f32.vlgmr.msra.gmra.mrb[4].mxu0 %vm1102_vm4, %v7022_v37  ;;  %v2346_v14 = vstv %s2344_s7 }
 0x15f   : > { %6091 = vmatmul.mubr.msk.f32.vlgmr.msra.gmra.mrb[4].mxu1 %vm1102_vm4, %v7022_v37  ;;  %6274 = vmatpush3.bf16.msra.mxu0 %v6273_v0  ;;  %v5527_v0 = vld [vmem:[%s7713_s25 + $0x1] ss:$0 sm:$0xff] }
 0x160   : > { %6280 = vmatpush3.bf16.msra.mxu1 %v6279_v3  ;;  %6275 = vmatprep.subr.bf16.mxu0 %v6680_v22 }
 0x161   : > { %6281 = vmatprep.subr.bf16.mxu1 %v6680_v22  ;;  %6101 = vmatprep.mubr.msk.f32.mxu0 %vm6681_vm3, %v6682_v30 }
 0x162   : > { %6112 = vmatprep.mubr.msk.f32.mxu1 %vm6681_vm3, %v6682_v30 }
 0x163   : > { %6277 = vmatpush3.bf16.msra.mxu0 %v6276_v6 }
 0x164   : > { %6283 = vmatpush3.bf16.msra.mxu1 %v6282_v9  ;;  %6284 = vmatprep.subr.bf16.mxu0 %v6680_v22 }
 0x165   : > { %6290 = vmatprep.subr.bf16.mxu1 %v6680_v22 }
 0x166   : > { %6102 = vmatmul.mubr.msk.f32.vlgmr.msra.gmra.mrb[6].mxu0 %vm1102_vm4, %v7022_v37 }
 0x167   : > { %6113 = vmatmul.mubr.msk.f32.vlgmr.msra.gmra.mrb[6].mxu1 %vm1102_vm4, %v7022_v37  ;;  %6286 = vmatpush3.bf16.msra.mxu0 %v6285_v10 }
 0x168   : > { %6292 = vmatpush3.bf16.msra.mxu1 %v6291_v11  ;;  %6287 = vmatprep.subr.bf16.mxu0 %v6680_v22  ;;  %v2349_v11 = vlaneseq }
 0x169   : > { %6293 = vmatprep.subr.bf16.mxu1 %v6680_v22  ;;  %6123 = vmatprep.mubr.msk.f32.mxu0 %vm6681_vm3, %v6682_v30 }
 0x16a   : > { %6134 = vmatprep.mubr.msk.f32.mxu1 %vm6681_vm3, %v6682_v30  ;;  %v7167_v12 = vshrl.u32 %v2349_v11, 7  ;;  %v2694_v11 = vld [vmem:[%s6924_s26] sm:$0xff] }
 0x16b   : > { %6289 = vmatpush3.bf16.msra.mxu0 %v6288_v15  ;;  %v2347_v15 = vmul.f32 %v2346_v14, %v2345_v13  ;;  %v2695_v13 = vld [vmem:[%s6924_s26 + $0x8] sm:$0xff]  ;;  %v2696_v14 = vld [vmem:[%s6924_s26 + $0x10] sm:$0xff] }
 0x16c   : > { %6295 = vmatpush3.bf16.msra.mxu1 %v6294_v17  ;;  %6296 = vmatprep.subr.bf16.mxu0 %v6680_v22  ;;  %v7171_v16 = vsub.s32 0, %v7167_v12  ;;  %vm5162_vm10 = vcmp.eq.s32.totalorder (!%p5724_p2), %v7167_v12, 0 }
 0x16d   : > { %6302 = vmatprep.subr.bf16.mxu1 %v6680_v22 }
 0x16e   : > { %6124 = vmatmul.mubr.msk.f32.vlgmr.msra.gmra.mrb[8].mxu0 %vm1102_vm4, %v7022_v37  ;;  %v2352_v17 = vrot.slane %v2347_v15, %v7171_v16 }
 0x16f   : > { %6135 = vmatmul.mubr.msk.f32.vlgmr.msra.gmra.mrb[8].mxu1 %vm1102_vm4, %v7022_v37  ;;  %6298 = vmatpush3.bf16.msra.mxu0 %v6297_v21 }
 0x170   : > { %6304 = vmatpush3.bf16.msra.mxu1 %v6303_v24  ;;  %6299 = vmatprep.subr.bf16.mxu0 %v6680_v22 }
 0x171   : > { %6305 = vmatprep.subr.bf16.mxu1 %v6680_v22  ;;  %6145 = vmatprep.mubr.msk.f32.mxu0 %vm6681_vm3, %v6682_v30 }
 0x172   : > { %6156 = vmatprep.mubr.msk.f32.mxu1 %vm6681_vm3, %v6682_v30 }
 0x173   : > { %6301 = vmatpush3.bf16.msra.mxu0 %v6300_v28 }
 0x174   : > { %6307 = vmatpush3.bf16.msra.mxu1 %v6306_v31  ;;  %6159 = vmatprep.subr.mxu0 %v6682_v30 }
 0x175   : > { %6164 = vmatprep.subr.mxu1 %v6682_v30 }
 0x176   : > { %6146 = vmatmul.mubr.msk.f32.vlgmr.msra.gmra.mrb[10].mxu0 %vm1102_vm4, %v7022_v37 }
 0x177   : > { %6157 = vmatmul.mubr.msk.f32.vlgmr.msra.gmra.mrb[10].mxu1 %vm1102_vm4, %v7022_v37  ;;  %6161 = vmatprep.mubr.msk.f32.mxu0 %vm6681_vm3, %v6682_v30  ;;  %v5510_v37 = vld [vmem:[%s7712_s22] ss:$0 sm:$0xff] }
 0x178   : > { %6166 = vmatprep.mubr.msk.f32.mxu1 %vm6681_vm3, %v6682_v30 }
 0x221   : > { %v1172_v22 = vpop.f32.mrb[0].mxu0 }
 0x222   : > { %v6037_v32 = vpop.f32.mrb[1].mxu0  ;;  %v1242_v33 = vpop.f32.mrb[0].mxu1  ;;  %v1173_v49 = vadd.f32 %v5510_v37, %v1172_v22 }
 0x223   : > { %v6048_v34 = vpop.f32.mrb[1].mxu1  ;;  %v1243_v50 = vadd.f32 %v5511_v46, %v1242_v33 }
 0x229   : > { %v1312_v35 = vpop.f32.mrb[2].mxu0 }
 0x22a   : > { %v6059_v36 = vpop.f32.mrb[3].mxu0  ;;  %v1382_v38 = vpop.f32.mrb[2].mxu1  ;;  %v1313_v61 = vadd.f32 %v5512_v54, %v1312_v35 }
 0x22b   : > { %v6070_v39 = vpop.f32.mrb[3].mxu1  ;;  %v1383_v62 = vadd.f32 %v5513_v58, %v1382_v38 }
 0x231   : > { %v1496_v42 = vpop.f32.mrb[4].mxu0 }
 0x232   : > { %v1497_v43 = vadd.f32 %v5518_v40, %v1496_v42  ;;  %v1566_v44 = vpop.f32.mrb[4].mxu1  ;;  %v6081_v45 = vpop.f32.mrb[5].mxu0 }
 0x233   : > { %v1567_v47 = vadd.f32 %v5519_v41, %v1566_v44  ;;  %v6092_v48 = vpop.f32.mrb[5].mxu1 }
 0x234   : > { %6160 = vmatpush3.xpose.msk.msra.mxu0 %vm2034_vm5, %v1497_v43 }
 0x235   : > { %6165 = vmatpush3.xpose.msk.msra.mxu1 %vm2034_vm5, %v1567_v47  ;;  %6169 = vmatprep.subr.mxu0 %v6682_v30 }
 0x236   : > { %6174 = vmatprep.subr.mxu1 %v6682_v30 }
 0x237   : > { %6162 = vmatmul.mubr.msk.f32.vlgmr.msra.gmra.mrb[12].mxu0 %vm2034_vm5, %v1173_v49 }
 0x238   : > { %6167 = vmatmul.mubr.msk.f32.vlgmr.msra.gmra.mrb[12].mxu1 %vm2034_vm5, %v1243_v50  ;;  %6171 = vmatprep.mubr.msk.f32.mxu0 %vm6681_vm3, %v6682_v30 }
 0x239   : > { %v1636_v53 = vpop.f32.mrb[6].mxu0  ;;  %6176 = vmatprep.mubr.msk.f32.mxu1 %vm6681_vm3, %v6682_v30 }
 0x23a   : > { %v1637_v55 = vadd.f32 %v5520_v51, %v1636_v53  ;;  %v1706_v56 = vpop.f32.mrb[6].mxu1  ;;  %v6103_v57 = vpop.f32.mrb[7].mxu0 }
 0x23b   : > { %v1707_v59 = vadd.f32 %v5521_v52, %v1706_v56  ;;  %v6114_v60 = vpop.f32.mrb[7].mxu1 }
 0x23c   : > { %6170 = vmatpush3.xpose.msk.msra.mxu0 %vm2034_vm5, %v1637_v55 }
 0x23d   : > { %6175 = vmatpush3.xpose.msk.msra.mxu1 %vm2034_vm5, %v1707_v59  ;;  %6179 = vmatprep.subr.mxu0 %v6682_v30 }
 0x23e   : > { %6184 = vmatprep.subr.mxu1 %v6682_v30 }
 0x23f   : > { %6172 = vmatmul.mubr.msk.f32.vlgmr.msra.gmra.mrb[14].mxu0 %vm2034_vm5, %v1313_v61 }
 0x240   : > { %6177 = vmatmul.mubr.msk.f32.vlgmr.msra.gmra.mrb[14].mxu1 %vm2034_vm5, %v1383_v62  ;;  %6181 = vmatprep.mubr.msk.f32.mxu0 %vm6681_vm3, %v6682_v30  ;;  %v5528_v62 = vld [vmem:[%s7713_s25 + $0x2] ss:$0 sm:$0xff] }
 0x241   : > { %6186 = vmatprep.mubr.msk.f32.mxu1 %vm6681_vm3, %v6682_v30  ;;  %v1820_v1 = vpop.f32.mrb[8].mxu0 }
 0x242   : > { %v1821_v2 = vadd.f32 %v5526_v63, %v1820_v1  ;;  %v6125_v3 = vpop.f32.mrb[9].mxu0  ;;  %v1890_v4 = vpop.f32.mrb[8].mxu1 }
 0x243   : > { %v1891_v5 = vadd.f32 %v5527_v0, %v1890_v4  ;;  %v6136_v6 = vpop.f32.mrb[9].mxu1  ;;  %v5529_v3 = vld [vmem:[%s7713_s25 + $0x3] ss:$0 sm:$0xff] }
 0x244   : > { %6180 = vmatpush3.msra.mxu0 %v1821_v2 }
 0x245   : > { %6185 = vmatpush3.msra.mxu1 %v1891_v5  ;;  %6189 = vmatprep.subr.mxu0 %v6682_v30 }
 0x246   : > { %6194 = vmatprep.subr.mxu1 %v6682_v30 }
 0x249   : > { %v7162_v7 = vpop.f32.mrb[10].mxu0 }
 0x24a   : > { %v7164_v8 = vpop.f32.mrb[10].mxu1  ;;  %v6147_v9 = vpop.f32.mrb[11].mxu0  ;;  %v1961_v2 = vadd.f32 %v5528_v62, %v7162_v7  ;;  %v3062_v62 = vld [vmem:[%s6943_s6 + $0xc8] sm:$0xff] }
 0x24b   : > { %v6158_v10 = vpop.f32.mrb[11].mxu1  ;;  %v2031_v6 = vadd.f32 %v5529_v3, %v7164_v8  ;;  %v3047_v3 = vld [vmem:[%s6943_s6 + $0x50] sm:$0xff] }
 0x30a   : > { %v2107_v18 = vpop.f32.mrb[12].mxu0 }
 0x30b   : > { %v2339_v19 = vmul.f32 0.35355338, %v2107_v18  ;;  %v2183_v20 = vpop.f32.mrb[12].mxu1  ;;  %v6163_v21 = vpop.f32.mrb[13].mxu0  ;;  %v2697_v18 = vld [vmem:[%s6924_s26 + $0x18] sm:$0xff]  ;;  %s7723_s26 = sld [smem:[#allocation22_spill]] (!%p5724_p2) }
 0x30c   : > { %v2340_v23 = vmul.f32 0.35355338, %v2183_v20  ;;  %v6168_v24 = vpop.f32.mrb[13].mxu1 }
 0x30d   : > { %v2354_v25 = vadd.f32 %v2352_v17, %v2339_v19 }
 0x30e   : > { %v2355_v27 = vadd.f32 %v2352_v17, %v2340_v23 }
 0x30f   : > { %v2358_v26 = vsel %vm2034_vm5, %v2354_v25, -inf }
 0x310   : > { %2359 = vmax.xlane.f32.xlu0 %v2358_v26  ;;  %v2361_v32 = vsel %vm2034_vm5, %v2355_v27, -inf }
 0x312   : > { %v2259_v28 = vpop.f32.mrb[14].mxu0 }
 0x313   : > { %v2341_v29 = vmul.f32 0.35355338, %v2259_v28  ;;  %v2335_v31 = vpop.f32.mrb[14].mxu1  ;;  %v6173_v22 = vpop.f32.mrb[15].mxu0 }
 0x314   : > { %v2342_v33 = vmul.f32 0.35355338, %v2335_v31  ;;  %v6178_v34 = vpop.f32.mrb[15].mxu1  ;;  %2362 = vmax.xlane.f32.xlu0 %v2361_v32 }
 0x315   : > { %v2356_v35 = vadd.f32 %v2352_v17, %v2341_v29 }
 0x316   : > { %v2357_v38 = vadd.f32 %v2352_v17, %v2342_v33 }
 0x317   : > { %v2364_v36 = vsel %vm2034_vm5, %v2356_v35, -inf }
 0x318   : > { %2365 = vmax.xlane.f32.xlu1 %v2364_v36  ;;  %v2367_v39 = vsel %vm2034_vm5, %v2357_v38, -inf }
 0x31c   : > { %2368 = vmax.xlane.f32.xlu1 %v2367_v39  ;;  %v5550_v39 = vld [vmem:[%s7716_s27] ss:$0 sm:$0xff] }
 0x39d   : > { %v2360_v40 = vpop.xlane.xlu0 %2359 }
 0x39e   : > { %v2370_v41 = vsub.f32 %v2354_v25, %v2360_v40 }
 0x3a0   : > { %v2374_v42 = vmul.f32 1.442695, %v2370_v41 }
 0x3a1   : > { %v2363_v37 = vpop.xlane.xlu0 %2362 }
 0x3a2   : > { %6522 = vpow2.f32 %v2374_v42  ;;  %v2371_v43 = vsub.f32 %v2355_v27, %v2363_v37  ;;  %v6542_v37 = vld [vmem:[#allocation2] sm:$0xff] }
 0x3a4   : > { %v2376_v44 = vmul.f32 1.442695, %v2371_v43 }
 0x3a5   : > { %v2366_v45 = vpop.xlane.xlu1 %2365 }
 0x3a6   : > { %6524 = vpow2.f32 %v2376_v44  ;;  %v2372_v46 = vsub.f32 %v2356_v35, %v2366_v45 }
 0x3a8   : > { %v2378_v47 = vmul.f32 1.442695, %v2372_v46 }
 0x3a9   : > { %v2369_v48 = vpop.xlane.xlu1 %2368 }
 0x3aa   : > { %6526 = vpow2.f32 %v2378_v47  ;;  %v2373_v49 = vsub.f32 %v2357_v38, %v2369_v48 }
 0x3ac   : > { %v6523_v50 = vpop.eup %6522  ;;  %v2380_v51 = vmul.f32 1.442695, %v2373_v49 }
 0x3ad   : > { %v2382_v52 = vsel %vm2034_vm5, %v6523_v50, 0.0 }
 0x3ae   : > { %6528 = vpow2.f32 %v2380_v51  ;;  %2383 = vadd.xlane.f32.xlu0 %v2382_v52  ;;  %v3045_v51 = vld [vmem:[%s6943_s6 + $0x40] sm:$0xff]  ;;  %v3038_v52 = vld [vmem:[%s6943_s6 + $0x8] sm:$0xff] }
 0x3b0   : > { %v6525_v53 = vpop.eup %6524 }
 0x3b1   : > { %v2385_v54 = vsel %vm2034_vm5, %v6525_v53, 0.0 }
 0x3b2   : > { %2386 = vadd.xlane.f32.xlu1 %v2385_v54  ;;  %v3046_v54 = vld [vmem:[%s6943_s6 + $0x48] sm:$0xff] }
 0x3b4   : > { %v6527_v55 = vpop.eup %6526 }
 0x3b5   : > { %v2388_v56 = vsel %vm2034_vm5, %v6527_v55, 0.0 }
 0x3b6   : > { %2389 = vadd.xlane.f32.xlu0 %v2388_v56  ;;  %v5555_v56 = vcombine.low %v3038_v52, %v3046_v54 }
 0x3b8   : > { %v6529_v57 = vpop.eup %6528 }
 0x3b9   : > { %v2391_v58 = vsel %vm2034_vm5, %v6529_v57, 0.0 }
 0x3ba   : > { %2392 = vadd.xlane.f32.xlu1 %v2391_v58  ;;  %v3053_v58 = vld [vmem:[%s6943_s6 + $0x80] sm:$0xff] }
 0x43b   : > { %v2384_v59 = vpop.xlane.xlu0 %2383 }
 0x43c   : > { %6530 = vrcp.f32 %v2384_v59  ;;  %v3061_v59 = vld [vmem:[%s6943_s6 + $0xc0] sm:$0xff] }
 0x43f   : > { %v2387_v60 = vpop.xlane.xlu1 %2386 }
 0x440   : > { %6532 = vrcp.f32 %v2387_v60  ;;  %v3054_v60 = vld [vmem:[%s6943_s6 + $0x88] sm:$0xff] }
 0x443   : > { %v2390_v61 = vpop.xlane.xlu0 %2389 }
 0x444   : > { %6534 = vrcp.f32 %v2390_v61  ;;  %v5570_v61 = vcombine.high %v3053_v58, %v3061_v59 }
 0x446   : > { %v6531_v63 = vpop.eup %6530 }
 0x447   : > { %v2395_v0 = vmul.f32 %v6531_v63, %v6523_v50  ;;  %v2393_v1 = vpop.xlane.xlu1 %2392  ;;  %v3037_v50 = vld [vmem:[%s6943_s6] sm:$0xff]  ;;  %v5569_v63 = vcombine.low %v3053_v58, %v3061_v59 }
 0x448   : > { %6536 = vrcp.f32 %v2393_v1  ;;  %v5572_v1 = vcombine.high %v3054_v60, %v3062_v62 }
 0x449   : > { %6182 = vmatmul.mubr.msk.f32.vlgmr.msra.gmra.mrb[16].mxu0 %vm2034_vm5, %v2395_v0  ;;  %v5571_v0 = vcombine.low %v3054_v60, %v3062_v62 }
 0x44a   : > { %v6533_v4 = vpop.eup %6532  ;;  %6190 = vmatpush3.msra.mxu0 %v1961_v2  ;;  %6191 = vmatprep.mubr.msk.f32.mxu0 %vm6681_vm3, %v6682_v30  ;;  %v3039_v2 = vld [vmem:[%s6943_s6 + $0x10] sm:$0xff] }
 0x44b   : > { %v2397_v5 = vmul.f32 %v6533_v4, %v6525_v53  ;;  %6199 = vmatprep.subr.mxu0 %v6682_v30  ;;  %v5554_v53 = vcombine.high %v3037_v50, %v3045_v51  ;;  %v3040_v4 = vld [vmem:[%s6943_s6 + $0x18] sm:$0xff] }
 0x44d   : > { %6187 = vmatmul.mubr.msk.f32.vlgmr.msra.gmra.mrb[16].mxu1 %vm2034_vm5, %v2397_v5  ;;  %v6683_v5 = vmov 0  }
 0x44e   : > { %v6535_v9 = vpop.eup %6534  ;;  %6195 = vmatpush3.msra.mxu1 %v2031_v6  ;;  %6196 = vmatprep.mubr.msk.f32.mxu1 %vm6681_vm3, %v6682_v30  ;;  %v5558_v6 = vcombine.high %v3039_v2, %v3047_v3 }
 0x44f   : > { %v2399_v7 = vmul.f32 %v6535_v9, %v6527_v55  ;;  %6204 = vmatprep.subr.mxu1 %v6682_v30  ;;  %v5553_v55 = vcombine.low %v3037_v50, %v3045_v51  ;;  %v3048_v9 = vld [vmem:[%s6943_s6 + $0x58] sm:$0xff] }
 0x451   : > { %6192 = vmatmul.mubr.msk.f32.vlgmr.msra.gmra.mrb[18].mxu0 %vm2034_vm5, %v2399_v7  ;;  %v5557_v7 = vcombine.low %v3039_v2, %v3047_v3  ;;  %v6397_v2 = vld [vmem:[%s6958_s19 + $0x80] sm:$0xff]   ;;  %v6398_v3 = vld [vmem:[%s6958_s19 + $0x48] sm:$0xff]  }
 0x452   : > { %v6537_v10 = vpop.eup %6536  ;;  %6201 = vmatprep.mubr.msk.f32.mxu0 %vm6681_vm3, %v6682_v30  ;;  %6200 = vmatpush3.msra.mxu0 %v2694_v11 }
 0x453   : > { %v2401_v8 = vmul.f32 %v6537_v10, %v6529_v57  ;;  %6209 = vmatprep.subr.mxu0 %v6682_v30  ;;  %v5556_v57 = vcombine.high %v3038_v52, %v3046_v54  ;;  %v5559_v10 = vcombine.low %v3040_v4, %v3048_v9  ;;  %v3067_v54 = vld [vmem:[%s6943_s6 + $0xf0] sm:$0xff] }
 0x455   : > { %6197 = vmatmul.mubr.msk.f32.vlgmr.msra.gmra.mrb[18].mxu1 %vm2034_vm5, %v2401_v8  ;;  %v5560_v8 = vcombine.high %v3040_v4, %v3048_v9  ;;  %v6399_v4 = vld [vmem:[%s6958_s19 + $0xc8] sm:$0xff]   ;;  %v6402_v9 = vld [vmem:[%s6958_s19 + $0x50] sm:$0xff]  }
 0x456   : > { %6206 = vmatprep.mubr.msk.f32.mxu1 %vm6681_vm3, %v6682_v30  ;;  %6205 = vmatpush3.msra.mxu1 %v2695_v13 }
 0x457   : > { %6214 = vmatprep.subr.mxu1 %v6682_v30 }
 0x51c   : > { %v2471_v15 = vpop.f32.mrb[16].mxu0 }
 0x51d   : > { %v6183_v17 = vpop.f32.mrb[17].mxu0  ;;  %6202 = vmatmul.mubr.msk.f32.vlgmr.msra.gmra.mrb[20].mxu0 %vm2034_vm5, %v2471_v15 }
 0x51e   : > { %6210 = vmatpush3.msra.mxu0 %v2696_v14  ;;  %6211 = vmatprep.mubr.msk.f32.mxu0 %vm6681_vm3, %v6682_v30  ;;  %v5551_v17 = vld [vmem:[%s7717_s23] ss:$0 sm:$0xff] }
 0x51f   : > { %3316 = vmatprep.subr.bf16.mxu0 %v5554_v53  ;;  %v3059_v53 = vld [vmem:[%s6943_s6 + $0xb0] sm:$0xff] }
 0x520   : > { %v2544_v19 = vpop.f32.mrb[16].mxu1  ;;  %v5582_v59 = vcombine.high %v3059_v53, %v3067_v54 }
 0x521   : > { %v6188_v20 = vpop.f32.mrb[17].mxu1  ;;  %6207 = vmatmul.mubr.msk.f32.vlgmr.msra.gmra.mrb[20].mxu1 %vm2034_vm5, %v2544_v19  ;;  %v5552_v19 = vld [vmem:[%s7719_s3] ss:$0 sm:$0xff] }
 0x522   : > { %6215 = vmatpush3.msra.mxu1 %v2697_v18  ;;  %6216 = vmatprep.mubr.msk.f32.mxu1 %vm6681_vm3, %v6682_v30 }
 0x523   : > { %3357 = vmatprep.subr.bf16.mxu1 %v5556_v57 }
 0x524   : > { %v2617_v21 = vpop.f32.mrb[18].mxu0 }
 0x525   : > { %v6193_v23 = vpop.f32.mrb[19].mxu0  ;;  %6212 = vmatmul.mubr.msk.f32.vlgmr.msra.gmra.mrb[22].mxu0 %vm2034_vm5, %v2617_v21  ;;  %v3055_v21 = vld [vmem:[%s6943_s6 + $0x90] sm:$0xff] }
 0x526   : > { %3317 = vmatpush1.bf16.msra.mxu0 %v5553_v55  ;;  %3348 = vmatprep.mubr.bf16.mxu0 %v6683_v5  ;;  %v3063_v23 = vld [vmem:[%s6943_s6 + $0xd0] sm:$0xff]  ;;  %v3060_v55 = vld [vmem:[%s6943_s6 + $0xb8] sm:$0xff] }
 0x527   : > { %3318 = vmatprep.subr.bf16.mxu0 %v5570_v61  ;;  %v5581_v61 = vcombine.low %v3059_v53, %v3067_v54 }
 0x528   : > { %v2690_v24 = vpop.f32.mrb[18].mxu1 }
 0x529   : > { %v6198_v25 = vpop.f32.mrb[19].mxu1  ;;  %6217 = vmatmul.mubr.msk.f32.vlgmr.msra.gmra.mrb[22].mxu1 %vm2034_vm5, %v2690_v24  ;;  %v3056_v24 = vld [vmem:[%s6943_s6 + $0x98] sm:$0xff] }
 0x52a   : > { %3358 = vmatpush1.bf16.msra.mxu1 %v5555_v56  ;;  %3319 = vmatpush1.bf16.msra.mxu0 %v5569_v63  ;;  %v3064_v25 = vld [vmem:[%s6943_s6 + $0xd8] sm:$0xff]  ;;  %v6394_v63 = vld [vmem:[%s6958_s19 + $0x40] sm:$0xff]  }
 0x52b   : > { %3359 = vmatprep.subr.bf16.mxu1 %v5572_v1  ;;  %3389 = vmatprep.mubr.bf16.mxu1 %v6683_v5  ;;  %v3068_v56 = vld [vmem:[%s6943_s6 + $0xf8] sm:$0xff]  ;;  %v6396_v1 = vld [vmem:[%s6958_s19] sm:$0xff]  }
 0x52c   : > { %3398 = vmatprep.subr.bf16.mxu0 %v5558_v6  ;;  %v5584_v60 = vcombine.high %v3060_v55, %v3068_v56  ;;  %v5583_v62 = vcombine.low %v3060_v55, %v3068_v56  ;;  %v6401_v6 = vld [vmem:[%s6958_s19 + $0x88] sm:$0xff]  }
 0x52e   : > { %3360 = vmatpush1.bf16.msra.mxu1 %v5571_v0  ;;  %v6395_v0 = vld [vmem:[%s6958_s19 + $0xc0] sm:$0xff]  }
 0x52f   : > { %3439 = vmatprep.subr.bf16.mxu1 %v5560_v8  ;;  %v6405_v8 = vld [vmem:[%s6958_s19 + $0x90] sm:$0xff]  }
 0x5f0   : > { %v2767_v26 = vpop.f32.mrb[20].mxu0 }
 0x5f1   : > { %v6203_v27 = vpop.f32.mrb[21].mxu0  ;;  %v2990_v29 = vsel %vm1102_vm4, %v2767_v26, 0.0 }
 0x5f4   : > { %v2840_v28 = vpop.f32.mrb[20].mxu1 }
 0x5f5   : > { %v2991_v31 = vsel %vm1102_vm4, %v2840_v28, 0.0  ;;  %v6208_v22 = vpop.f32.mrb[21].mxu1  ;;  %v5574_v28 = vcombine.high %v3055_v21, %v3063_v23 }
 0x5f6   : > { %v2992_v32 = vadd.f32 %v2991_v31, %v2990_v29  ;;  %v5576_v29 = vcombine.high %v3056_v24, %v3064_v25  ;;  %v3041_v31 = vld [vmem:[%s6943_s6 + $0x20] sm:$0xff] }
 0x5f7   : > { %v3049_v22 = vld [vmem:[%s6943_s6 + $0x60] sm:$0xff] }
 0x5f8   : > { %v2913_v33 = vpop.f32.mrb[22].mxu0 }
 0x5f9   : > { %v2993_v30 = vsel %vm1102_vm4, %v2913_v33, 0.0  ;;  %v6213_v34 = vpop.f32.mrb[23].mxu0  ;;  %v3050_v33 = vld [vmem:[%s6943_s6 + $0x68] sm:$0xff] }
 0x5fa   : > { %v2994_v35 = vadd.f32 %v2993_v30, %v2992_v32  ;;  %v3042_v32 = vld [vmem:[%s6943_s6 + $0x28] sm:$0xff]  ;;  %v5573_v30 = vcombine.low %v3055_v21, %v3063_v23  ;;  %v5575_v34 = vcombine.low %v3056_v24, %v3064_v25 }
 0x5fb   : > { %v6414_v21 = vld [vmem:[%s6958_s19 + $0x68] sm:$0xff]  }
 0x5fc   : > { %v2986_v36 = vpop.f32.mrb[22].mxu1  ;;  %v6415_v23 = vld [vmem:[%s6958_s19 + $0xe8] sm:$0xff]  }
 0x5fd   : > { %v2995_v38 = vsel %vm1102_vm4, %v2986_v36, 0.0  ;;  %v6218_v40 = vpop.f32.mrb[23].mxu1  ;;  %v5564_v36 = vcombine.high %v3042_v32, %v3050_v33  ;;  %v6416_v24 = vld [vmem:[%s6958_s19 + $0x28] sm:$0xff]  }
 0x5fe   : > { %v2996_v41 = vadd.f32 %v2995_v38, %v2994_v35  ;;  %v5562_v35 = vcombine.high %v3041_v31, %v3049_v22  ;;  %v3057_v38 = vld [vmem:[%s6943_s6 + $0xa0] sm:$0xff]  ;;  %v3058_v40 = vld [vmem:[%s6943_s6 + $0xa8] sm:$0xff] }
 0x5ff   : > { %v6417_v25 = vld [vmem:[%s6958_s19 + $0xa8] sm:$0xff]  }
 0x600   : > { %v3004_v42 = vadd.f32 %v5550_v39, %v2996_v41  ;;  %v3065_v39 = vld [vmem:[%s6943_s6 + $0xe0] sm:$0xff]  ;;  %v3066_v41 = vld [vmem:[%s6943_s6 + $0xe8] sm:$0xff] }
 0x601   : > { %v5579_v50 = vcombine.low %v3058_v40, %v3066_v41 }
 0x602   : > { %v3005_v43 = vadd.f32 %v6542_v37, %v3004_v42  ;;  %v5561_v42 = vcombine.low %v3041_v31, %v3049_v22  ;;  %v5563_v37 = vcombine.low %v3042_v32, %v3050_v33  ;;  %v6421_v31 = vld [vmem:[%s6958_s19 + $0xb0] sm:$0xff]   ;;  %v6422_v22 = vld [vmem:[%s6958_s19 + $0x78] sm:$0xff]  }
 0x603   : > { %v6423_v32 = vld [vmem:[%s6958_s19 + $0xf8] sm:$0xff]  }
 0x604   : > { %v3008_v44 = vsel %vm1102_vm4, %v3005_v43, 0.0  ;;  %v6424_v33 = vld [vmem:[%s6958_s19 + $0x38] sm:$0xff]  }
 0x605   : > { %3009 = vadd.xlane.f32.xlu0 %v3008_v44  ;;  %v5580_v44 = vcombine.high %v3058_v40, %v3066_v41  ;;  %v3083_v40 = vsub.s32 2, %v7167_v12 }
 0x692   : > { %v3010_v45 = vpop.xlane.xlu0 %3009 }
 0x693   : > { %v3012_v46 = vmul.f32 0.03125, %v3010_v45  ;;  %v3043_v45 = vld [vmem:[%s6943_s6 + $0x30] sm:$0xff] }
 0x695   : > { %v3013_v47 = vsub.f32 %v3005_v43, %v3012_v46  ;;  %v5578_v43 = vcombine.high %v3057_v38, %v3065_v39  ;;  %v3051_v46 = vld [vmem:[%s6943_s6 + $0x70] sm:$0xff] }
 0x696   : > { %v5566_v51 = vcombine.high %v3043_v45, %v3051_v46  ;;  %v5565_v57 = vcombine.low %v3043_v45, %v3051_v46 }
 0x697   : > { %v3014_v48 = vmul.f32 %v3013_v47, %v3013_v47 }
 0x699   : > { %v3015_v49 = vsel %vm1102_vm4, %v3014_v48, 0.0  ;;  %v3052_v48 = vld [vmem:[%s6943_s6 + $0x78] sm:$0xff] }
 0x69a   : > { %3016 = vadd.xlane.f32.xlu1 %v3015_v49  ;;  %v5577_v49 = vcombine.low %v3057_v38, %v3065_v39 }
 0x727   : > { %v3017_v11 = vpop.xlane.xlu1 %3016 }
 0x728   : > { %v3018_v13 = vmul.f32 0.03125, %v3017_v11  ;;  %v6406_v11 = vld [vmem:[%s6958_s19 + $0x58] sm:$0xff]  }
 0x72a   : > { %v3019_v14 = vadd.f32 1e-05, %v3018_v13  ;;  %v6407_v13 = vld [vmem:[%s6958_s19 + $0xd8] sm:$0xff]  }
 0x72c   : > { %6538 = vrsqrt.f32 %v3019_v14  ;;  %v6408_v14 = vld [vmem:[%s6958_s19 + $0x18] sm:$0xff]  }
 0x736   : > { %v6539_v15 = vpop.eup %6538 }
 0x737   : > { %v3021_v18 = vmul.f32 %v6539_v15, %v3013_v47  ;;  %v3044_v47 = vld [vmem:[%s6943_s6 + $0x38] sm:$0xff]  ;;  %s7720_s6 = sld [smem:[#allocation26_spill]] }
 0x738   : > { %v5568_v52 = vcombine.high %v3044_v47, %v3052_v48  ;;  %v5567_v58 = vcombine.low %v3044_v47, %v3052_v48  ;;  %v6409_v15 = vld [vmem:[%s6958_s19 + $0x98] sm:$0xff]  }
 0x739   : > { %v3028_v20 = vmul.f32 %v5551_v17, %v3021_v18  ;;  %v6410_v17 = vld [vmem:[%s6958_s19 + $0x60] sm:$0xff]  }
 0x73a   : > { %v6411_v18 = vld [vmem:[%s6958_s19 + $0xe0] sm:$0xff]  }
 0x73b   : > { %v7253_v26 = vadd.f32 %v5552_v19, %v3028_v20  ;;  %v6412_v19 = vld [vmem:[%s6958_s19 + $0x20] sm:$0xff]  }
 0x73c   : > { %v6413_v20 = vld [vmem:[%s6958_s19 + $0xa0] sm:$0xff]  }
 0x73d   : > { %v7257_v27 = vpack.c.bf16 %v7253_v26, %v7253_v26  ;;  %v7333_v38 = vld [vmem:[%s7720_s6 + $0x8] sm:$0xff]  ;;  %v7342_v41 = vld [vmem:[%s7720_s6] sm:$0xff] }
 0x73f   : > { %5585 = vmatmul.mubr.msk.bf16.vlgmr.msra.gmra.mrb[24].mxu0 %vm1102_vm4, %v7257_v27  ;;  %5586 = vmatmul.mubr.msk.bf16.vlgmr.msra.gmra.mrb[24].mxu1 %vm1102_vm4, %v7257_v27 }
 0x740   : > { %3399 = vmatpush1.bf16.msra.mxu0 %v5557_v7  ;;  %3440 = vmatpush1.bf16.msra.mxu1 %v5559_v10  ;;  %v6403_v7 = vld [vmem:[%s6958_s19 + $0xd0] sm:$0xff]  }
 0x741   : > { %3400 = vmatprep.subr.bf16.mxu0 %v5574_v28  ;;  %3441 = vmatprep.subr.bf16.mxu1 %v5576_v29  ;;  %v6404_v10 = vld [vmem:[%s6958_s19 + $0x10] sm:$0xff]  }
 0x742   : > { %3430 = vmatprep.mubr.bf16.mxu0 %v6683_v5  ;;  %3471 = vmatprep.mubr.bf16.mxu1 %v6683_v5  ;;  %v6419_v28 = vld [vmem:[%s6958_s19 + $0xf0] sm:$0xff]  }
 0x743   : > { %v6420_v29 = vld [vmem:[%s6958_s19 + $0x30] sm:$0xff]  }
 0x744   : > { %3401 = vmatpush1.bf16.msra.mxu0 %v5573_v30  ;;  %3442 = vmatpush1.bf16.msra.mxu1 %v5575_v34  ;;  %v6425_v30 = vld [vmem:[%s6958_s19 + $0xb8] sm:$0xff]   ;;  %v6426_v34 = vld [vmem:[%s6958_s19 + $0x140] sm:$0xff]  }
 0x745   : > { %3480 = vmatprep.subr.bf16.mxu0 %v5562_v35  ;;  %3521 = vmatprep.subr.bf16.mxu1 %v5564_v36  ;;  %v6427_v35 = vld [vmem:[%s6958_s19 + $0x1c0] sm:$0xff]   ;;  %v3099_v36 = vsub.s32 6, %v7167_v12 }
 0x747   : > { %5587 = vmatmul.mubr.msk.bf16.vlgmr.msra.gmra.mrb[28].mxu0 %vm1102_vm4, %v7257_v27  ;;  %5588 = vmatmul.mubr.msk.bf16.vlgmr.msra.gmra.mrb[28].mxu1 %vm1102_vm4, %v7257_v27  ;;  %v7338_v39 = vrot.slane %v7333_v38, %v3099_v36 }
 0x748   : > { %3481 = vmatpush1.bf16.msra.mxu0 %v5561_v42  ;;  %3522 = vmatpush1.bf16.msra.mxu1 %v5563_v37  ;;  %v3079_v42 = vsub.s32 1, %v7167_v12  ;;  %v3087_v37 = vsub.s32 3, %v7167_v12 }
 0x749   : > { %3482 = vmatprep.subr.bf16.mxu0 %v5578_v43  ;;  %3523 = vmatprep.subr.bf16.mxu1 %v5580_v44  ;;  %v3076_v43 = vrot.slane %v7342_v41, %v7171_v16  ;;  %v3084_v44 = vrot.slane %v7342_v41, %v3083_v40 }
 0x74a   : > { %3512 = vmatprep.mubr.bf16.mxu0 %v6683_v5  ;;  %3553 = vmatprep.mubr.bf16.mxu1 %v6683_v5  ;;  %v3080_v45 = vrot.slane %v7342_v41, %v3079_v42  ;;  %v3088_v46 = vrot.slane %v7342_v41, %v3087_v37 }
 0x74c   : > { %3483 = vmatpush1.bf16.msra.mxu0 %v5577_v49  ;;  %3524 = vmatpush1.bf16.msra.mxu1 %v5579_v50 }
 0x74d   : > { %3562 = vmatprep.subr.bf16.mxu0 %v5566_v51  ;;  %3603 = vmatprep.subr.bf16.mxu1 %v5568_v52 }
 0x74f   : > { %5589 = vmatmul.mubr.msk.bf16.vlgmr.msra.gmra.mrb[32].mxu0 %vm1102_vm4, %v7257_v27  ;;  %5590 = vmatmul.mubr.msk.bf16.vlgmr.msra.gmra.mrb[32].mxu1 %vm1102_vm4, %v7257_v27 }
 0x750   : > { %3563 = vmatpush1.bf16.msra.mxu0 %v5565_v57  ;;  %3604 = vmatpush1.bf16.msra.mxu1 %v5567_v58  ;;  %v3095_v57 = vsub.s32 5, %v7167_v12  ;;  %v3103_v58 = vsub.s32 7, %v7167_v12 }
 0x751   : > { %3564 = vmatprep.subr.bf16.mxu0 %v5582_v59  ;;  %3605 = vmatprep.subr.bf16.mxu1 %v5584_v60 }
 0x752   : > { %3594 = vmatprep.mubr.bf16.mxu0 %v6683_v5  ;;  %3635 = vmatprep.mubr.bf16.mxu1 %v6683_v5  ;;  %v6400_v5 = vld [vmem:[%s6958_s19 + $0x8] sm:$0xff]  }
 0x754   : > { %3565 = vmatpush1.bf16.msra.mxu0 %v5581_v61  ;;  %3606 = vmatpush1.bf16.msra.mxu1 %v5583_v62 }
 0x755   : > { %5830 = vmatprep.subr.bf16.mxu0 %v6394_v63  ;;  %5852 = vmatprep.subr.bf16.mxu1 %v6395_v0 }
 0x757   : > { %5591 = vmatmul.mubr.msk.bf16.vlgmr.msra.gmra.mrb[36].mxu0 %vm1102_vm4, %v7257_v27  ;;  %5592 = vmatmul.mubr.msk.bf16.vlgmr.msra.gmra.mrb[36].mxu1 %vm1102_vm4, %v7257_v27  ;;  %v6418_v27 = vld [vmem:[%s6958_s19 + $0x70] sm:$0xff]  }
 0x758   : > { %5831 = vmatpush3.bf16.msra.mxu0 %v6396_v1  ;;  %5853 = vmatpush3.bf16.msra.mxu1 %v6397_v2 }
 0x759   : > { %5832 = vmatprep.subr.bf16.mxu0 %v6398_v3  ;;  %5854 = vmatprep.subr.bf16.mxu1 %v6399_v4  ;;  %v3096_v3 = vrot.slane %v7342_v41, %v3095_v57  ;;  %v3104_v4 = vrot.slane %v7342_v41, %v3103_v58 }
 0x75c   : > { %5833 = vmatpush3.bf16.msra.mxu0 %v6400_v5  ;;  %5855 = vmatpush3.bf16.msra.mxu1 %v6401_v6  ;;  %v6428_v5 = vld [vmem:[%s6958_s19 + $0x100] sm:$0xff]  }
 0x75d   : > { %5834 = vmatprep.subr.bf16.mxu0 %v6402_v9  ;;  %5856 = vmatprep.subr.bf16.mxu1 %v6403_v7  ;;  %v6429_v6 = vld [vmem:[%s6958_s19 + $0x180] sm:$0xff]  }
 0x760   : > { %5835 = vmatpush3.bf16.msra.mxu0 %v6404_v10  ;;  %5857 = vmatpush3.bf16.msra.mxu1 %v6405_v8  ;;  %v6430_v10 = vld [vmem:[%s6958_s19 + $0x148] sm:$0xff]  }
 0x761   : > { %5836 = vmatprep.subr.bf16.mxu0 %v6406_v11  ;;  %5858 = vmatprep.subr.bf16.mxu1 %v6407_v13  ;;  %v6431_v8 = vld [vmem:[%s6958_s19 + $0x1c8] sm:$0xff]  }
 0x764   : > { %5837 = vmatpush3.bf16.msra.mxu0 %v6408_v14  ;;  %5859 = vmatpush3.bf16.msra.mxu1 %v6409_v15 }
 0x765   : > { %5838 = vmatprep.subr.bf16.mxu0 %v6410_v17  ;;  %5860 = vmatprep.subr.bf16.mxu1 %v6411_v18 }
 0x768   : > { %5839 = vmatpush3.bf16.msra.mxu0 %v6412_v19  ;;  %5861 = vmatpush3.bf16.msra.mxu1 %v6413_v20 }
 0x769   : > { %5840 = vmatprep.subr.bf16.mxu0 %v6414_v21  ;;  %5862 = vmatprep.subr.bf16.mxu1 %v6415_v23  ;;  %v6432_v21 = vld [vmem:[%s6958_s19 + $0x108] sm:$0xff]  }
 0x76a   : > { %v6433_v23 = vld [vmem:[%s6958_s19 + $0x188] sm:$0xff]  }
 0x76c   : > { %5841 = vmatpush3.bf16.msra.mxu0 %v6416_v24  ;;  %5863 = vmatpush3.bf16.msra.mxu1 %v6417_v25 }
 0x76d   : > { %5842 = vmatprep.subr.bf16.mxu0 %v6418_v27  ;;  %5864 = vmatprep.subr.bf16.mxu1 %v6419_v28  ;;  %v6434_v27 = vld [vmem:[%s6958_s19 + $0x150] sm:$0xff]  }
 0x76e   : > { %v6435_v28 = vld [vmem:[%s6958_s19 + $0x1d0] sm:$0xff]  }
 0x770   : > { %5843 = vmatpush3.bf16.msra.mxu0 %v6420_v29  ;;  %5865 = vmatpush3.bf16.msra.mxu1 %v6421_v31 }
 0x771   : > { %5844 = vmatprep.subr.bf16.mxu0 %v6422_v22  ;;  %5866 = vmatprep.subr.bf16.mxu1 %v6423_v32  ;;  %v3116_v22 = vrot.slane %v7333_v38, %v3083_v40 }
 0x774   : > { %5845 = vmatpush3.bf16.msra.mxu0 %v6424_v33  ;;  %5867 = vmatpush3.bf16.msra.mxu1 %v6425_v30  ;;  %v6436_v30 = vld [vmem:[%s6958_s19 + $0x110] sm:$0xff]  }
 0x775   : > { %5874 = vmatprep.subr.bf16.mxu0 %v6426_v34  ;;  %5896 = vmatprep.subr.bf16.mxu1 %v6427_v35  ;;  %v6437_v34 = vld [vmem:[%s6958_s19 + $0x190] sm:$0xff]   ;;  %v6438_v35 = vld [vmem:[%s6958_s19 + $0x158] sm:$0xff]  }
 0x812   : > { %v3350_v47 = vpop.f32.mrb[24].mxu0  ;;  %v3391_v48 = vpop.f32.mrb[24].mxu1 }
 0x813   : > { %v3351_v49 = vadd.f32 %v3350_v47, %v3076_v43  ;;  %v3392_v50 = vadd.f32 %v3391_v48, %v3084_v44  ;;  %v3352_v51 = vpop.f32.mrb[25].mxu0  ;;  %v3393_v52 = vpop.f32.mrb[25].mxu1  ;;  %v6439_v43 = vld [vmem:[%s6958_s19 + $0x1d8] sm:$0xff]  }
 0x814   : > { %v3353_v53 = vadd.f32 %v3352_v51, %v3080_v45  ;;  %v3394_v54 = vadd.f32 %v3393_v52, %v3088_v46  ;;  %v3354_v55 = vpop.f32.mrb[26].mxu0  ;;  %v3395_v56 = vpop.f32.mrb[26].mxu1  ;;  %v6441_v51 = vld [vmem:[%s6958_s19 + $0x198] sm:$0xff]   ;;  %v3091_v52 = vsub.s32 4, %v7167_v12 }
 0x815   : > { %v3644_v59 = vmax.f32 %v3351_v49, 0.0  ;;  %v3646_v60 = vmax.f32 %v3392_v50, 0.0  ;;  %v3355_v61 = vpop.f32.mrb[27].mxu0  ;;  %v3396_v62 = vpop.f32.mrb[27].mxu1  ;;  %v6440_v50 = vld [vmem:[%s6958_s19 + $0x118] sm:$0xff]   ;;  %v6442_v55 = vld [vmem:[%s6958_s19 + $0x160] sm:$0xff]  }
 0x816   : > { %v3645_v63 = vmax.f32 %v3353_v53, 0.0  ;;  %v3647_v0 = vmax.f32 %v3394_v54, 0.0  ;;  %v6443_v56 = vld [vmem:[%s6958_s19 + $0x1e0] sm:$0xff]   ;;  %v6446_v62 = vld [vmem:[%s6958_s19 + $0x168] sm:$0xff]  }
 0x817   : > { %v3660_v9 = vpack.c.bf16 %v3644_v59, %v3644_v59  ;;  %v3662_v7 = vpack.c.bf16 %v3646_v60, %v3646_v60  ;;  %v3124_v59 = vrot.slane %v7333_v38, %v3091_v52  ;;  %v6444_v60 = vld [vmem:[%s6958_s19 + $0x120] sm:$0xff]  }
 0x818   : > { %v3661_v1 = vpack.c.bf16 %v3645_v63, %v3645_v63  ;;  %v3663_v2 = vpack.c.bf16 %v3647_v0, %v3647_v0  ;;  %v6445_v61 = vld [vmem:[%s6958_s19 + $0x1a0] sm:$0xff]   ;;  %v6447_v63 = vld [vmem:[%s6958_s19 + $0x1e8] sm:$0xff]  }
 0x81a   : > { %v7367_v11 = vpop.f32.mrb[28].mxu0  ;;  %v7369_v13 = vpop.f32.mrb[28].mxu1  ;;  %4739 = vmatprep.mubr.bf16.mxu0 %v3661_v1  ;;  %4779 = vmatprep.mubr.bf16.mxu1 %v3663_v2 }
 0x81b   : > { %v3434_v14 = vpop.f32.mrb[29].mxu0  ;;  %v3475_v15 = vpop.f32.mrb[29].mxu1  ;;  %4740 = vmatmul.mubr.bf16.vlgmr.msra.gmra.mrb[40].mxu0 %v3660_v9  ;;  %4780 = vmatmul.mubr.bf16.vlgmr.msra.gmra.mrb[40].mxu1 %v3662_v7  ;;  %v6448_v7 = vld [vmem:[%s6958_s19 + $0x128] sm:$0xff]  }
 0x81c   : > { %v3435_v17 = vadd.f32 %v3434_v14, %v3096_v3  ;;  %v3476_v18 = vadd.f32 %v3475_v15, %v3104_v4  ;;  %5875 = vmatpush3.bf16.msra.mxu0 %v6428_v5  ;;  %5897 = vmatpush3.bf16.msra.mxu1 %v6429_v6  ;;  %v3436_v19 = vpop.f32.mrb[30].mxu0  ;;  %v3477_v20 = vpop.f32.mrb[30].mxu1 }
 0x81d   : > { %v3437_v24 = vpop.f32.mrb[31].mxu0  ;;  %v3478_v25 = vpop.f32.mrb[31].mxu1  ;;  %5876 = vmatprep.subr.bf16.mxu0 %v6430_v10  ;;  %5898 = vmatprep.subr.bf16.mxu1 %v6431_v8  ;;  %v6449_v10 = vld [vmem:[%s6958_s19 + $0x1a8] sm:$0xff]   ;;  %v3092_v8 = vrot.slane %v7342_v41, %v3091_v52  ;;  %v3112_v19 = vrot.slane %v7333_v38, %v3079_v42  ;;  %v3120_v20 = vrot.slane %v7333_v38, %v3087_v37  ;;  %v6455_v42 = vld [vmem:[%s6958_s19 + $0x1f8] sm:$0xff]   ;;  %v6468_v52 = vld [vmem:[%s6958_s19 + $0x210] sm:$0xff]  }
 0x81e   : > { %v3649_v29 = vmax.f32 %v3435_v17, 0.0  ;;  %v3651_v31 = vmax.f32 %v3476_v18, 0.0  ;;  %v6450_v17 = vld [vmem:[%s6958_s19 + $0x170] sm:$0xff]   ;;  %v6454_v24 = vld [vmem:[%s6958_s19 + $0x178] sm:$0xff]  }
 0x81f   : > { %v6451_v18 = vld [vmem:[%s6958_s19 + $0x1f0] sm:$0xff]   ;;  %v6456_v37 = vld [vmem:[%s6958_s19 + $0x138] sm:$0xff]  }
 0x820   : > { %v3665_v32 = vpack.c.bf16 %v3649_v29, %v3649_v29  ;;  %v3667_v33 = vpack.c.bf16 %v3651_v31, %v3651_v31  ;;  %5877 = vmatpush3.bf16.msra.mxu0 %v6432_v21  ;;  %5899 = vmatpush3.bf16.msra.mxu1 %v6433_v23  ;;  %v3433_v21 = vadd.f32 %v7367_v11, %v3092_v8  ;;  %v6458_v11 = vld [vmem:[%s6958_s19 + $0x240] sm:$0xff]   ;;  %v6483_v8 = vld [vmem:[%s6958_s19 + $0x2f0] sm:$0xff]  }
 0x821   : > { %5878 = vmatprep.subr.bf16.mxu0 %v6434_v27  ;;  %5900 = vmatprep.subr.bf16.mxu1 %v6435_v28  ;;  %v6457_v28 = vld [vmem:[%s6958_s19 + $0x1b8] sm:$0xff]  }
 0x822   : > { %v7380_v44 = vpop.f32.mrb[32].mxu0  ;;  %v3555_v45 = vpop.f32.mrb[32].mxu1  ;;  %4819 = vmatprep.mubr.bf16.mxu0 %v3665_v32  ;;  %4859 = vmatprep.mubr.bf16.mxu1 %v3667_v33  ;;  %v3648_v29 = vmax.f32 %v3433_v21, 0.0  ;;  %v6460_v33 = vld [vmem:[%s6958_s19 + $0x200] sm:$0xff]  }
 0x823   : > { %v7382_v40 = vadd.f32 %v3555_v45, %v3116_v22  ;;  %v3516_v46 = vpop.f32.mrb[33].mxu0  ;;  %v3557_v47 = vpop.f32.mrb[33].mxu1  ;;  %v6462_v45 = vld [vmem:[%s6958_s19 + $0x248] sm:$0xff]  }
 0x824   : > { %5879 = vmatpush3.bf16.msra.mxu0 %v6436_v30  ;;  %5901 = vmatpush3.bf16.msra.mxu1 %v6437_v34  ;;  %v3518_v48 = vpop.f32.mrb[34].mxu0  ;;  %v3559_v49 = vpop.f32.mrb[34].mxu1  ;;  %v3517_v25 = vadd.f32 %v3516_v46, %v3112_v19  ;;  %v3558_v27 = vadd.f32 %v3557_v47, %v3120_v20  ;;  %v3664_v30 = vpack.c.bf16 %v3648_v29, %v3648_v29  ;;  %v6463_v46 = vld [vmem:[%s6958_s19 + $0x2c8] sm:$0xff]   ;;  %v6486_v19 = vld [vmem:[%s6958_s19 + $0x278] sm:$0xff]  }
 0x825   : > { %v3519_v53 = vpop.f32.mrb[35].mxu0  ;;  %v3560_v54 = vpop.f32.mrb[35].mxu1  ;;  %5880 = vmatprep.subr.bf16.mxu0 %v6438_v35  ;;  %5902 = vmatprep.subr.bf16.mxu1 %v6439_v43  ;;  %v6461_v35 = vld [vmem:[%s6958_s19 + $0x280] sm:$0xff]   ;;  %v6464_v48 = vld [vmem:[%s6958_s19 + $0x208] sm:$0xff]   ;;  %v6487_v20 = vld [vmem:[%s6958_s19 + $0x2f8] sm:$0xff]   ;;  %v3654_v21 = vmax.f32 %v7382_v40, 0.0 }
 0x826   : > { %v3653_v22 = vmax.f32 %v3517_v25, 0.0  ;;  %v3655_v32 = vmax.f32 %v3558_v27, 0.0  ;;  %v6465_v49 = vld [vmem:[%s6958_s19 + $0x288] sm:$0xff]   ;;  %v6469_v53 = vld [vmem:[%s6958_s19 + $0x290] sm:$0xff]   ;;  %v6470_v54 = vld [vmem:[%s6958_s19 + $0x258] sm:$0xff]  }
 0x827   : > { %v6493_v25 = vld [vmem:[%s6958_s19 + $0x380] sm:$0xff]   ;;  %v3670_v27 = vpack.c.bf16 %v3654_v21, %v3654_v21  ;;  %v6495_v40 = vld [vmem:[%s6958_s19 + $0x3c8] sm:$0xff]  }
 0x828   : > { %5881 = vmatpush3.bf16.msra.mxu0 %v6440_v50  ;;  %5903 = vmatpush3.bf16.msra.mxu1 %v6441_v51  ;;  %v3669_v43 = vpack.c.bf16 %v3653_v22, %v3653_v22  ;;  %v3671_v47 = vpack.c.bf16 %v3655_v32, %v3655_v32  ;;  %v6466_v50 = vld [vmem:[%s6958_s19 + $0x250] sm:$0xff]  }
 0x829   : > { %5882 = vmatprep.subr.bf16.mxu0 %v6442_v55  ;;  %5904 = vmatprep.subr.bf16.mxu1 %v6443_v56  ;;  %v6467_v51 = vld [vmem:[%s6958_s19 + $0x2d0] sm:$0xff]   ;;  %v6471_v55 = vld [vmem:[%s6958_s19 + $0x2d8] sm:$0xff]  }
 0x82a   : > { %v3596_v0 = vpop.f32.mrb[36].mxu0  ;;  %v3637_v1 = vpop.f32.mrb[36].mxu1  ;;  %v6472_v56 = vld [vmem:[%s6958_s19 + $0x218] sm:$0xff]   ;;  %v6499_v22 = vld [vmem:[%s6958_s19 + $0x3d0] sm:$0xff]  }
 0x82b   : > { %v7394_v2 = vadd.f32 %v3596_v0, %v3124_v59  ;;  %v7397_v3 = vadd.f32 %v3637_v1, %v7338_v39  ;;  %v7399_v4 = vpop.f32.mrb[37].mxu0  ;;  %v7401_v5 = vpop.f32.mrb[37].mxu1  ;;  %v3100_v39 = vrot.slane %v7342_v41, %v3099_v36  ;;  %v6452_v36 = vld [vmem:[%s6958_s19 + $0x130] sm:$0xff]   ;;  %v6473_v59 = vld [vmem:[%s6958_s19 + $0x298] sm:$0xff]   ;;  %v6478_v0 = vld [vmem:[%s6958_s19 + $0x268] sm:$0xff]  }
 0x82c   : > { %5883 = vmatpush3.bf16.msra.mxu0 %v6444_v60  ;;  %5905 = vmatpush3.bf16.msra.mxu1 %v6445_v61  ;;  %v3600_v6 = vpop.f32.mrb[38].mxu0  ;;  %v3641_v9 = vpop.f32.mrb[38].mxu1  ;;  %v6453_v41 = vld [vmem:[%s6958_s19 + $0x1b0] sm:$0xff]   ;;  %v6474_v60 = vld [vmem:[%s6958_s19 + $0x260] sm:$0xff]   ;;  %v6479_v1 = vld [vmem:[%s6958_s19 + $0x2e8] sm:$0xff]  }
 0x82d   : > { %v3601_v14 = vpop.f32.mrb[39].mxu0  ;;  %v3642_v15 = vpop.f32.mrb[39].mxu1  ;;  %5884 = vmatprep.subr.bf16.mxu0 %v6446_v62  ;;  %5906 = vmatprep.subr.bf16.mxu1 %v6447_v63  ;;  %v3474_v23 = vadd.f32 %v7369_v13, %v3100_v39  ;;  %v6459_v13 = vld [vmem:[%s6958_s19 + $0x2c0] sm:$0xff]   ;;  %v6480_v6 = vld [vmem:[%s6958_s19 + $0x228] sm:$0xff]   ;;  %v3108_v9 = vrot.slane %v7333_v38, %v7171_v16  ;;  %v3128_v39 = vrot.slane %v7333_v38, %v3095_v57  ;;  %v6500_v32 = vld [vmem:[%s6958_s19 + $0x310] sm:$0xff]  }
 0x82e   : > { %v6475_v61 = vld [vmem:[%s6958_s19 + $0x2e0] sm:$0xff]   ;;  %v3136_v14 = vrot.slane %v7333_v38, %v3103_v58  ;;  %v6484_v15 = vld [vmem:[%s6958_s19 + $0x230] sm:$0xff]   ;;  %v6488_v38 = vld [vmem:[%s6958_s19 + $0x238] sm:$0xff]  }
 0x82f   : > { %v3650_v31 = vmax.f32 %v3474_v23, 0.0  ;;  %v6476_v62 = vld [vmem:[%s6958_s19 + $0x220] sm:$0xff]   ;;  %v3599_v57 = vadd.f32 %v7399_v4, %v3128_v39 }
 0x830   : > { %5885 = vmatpush3.bf16.msra.mxu0 %v6448_v7  ;;  %5907 = vmatpush3.bf16.msra.mxu1 %v6449_v10  ;;  %v6477_v63 = vld [vmem:[%s6958_s19 + $0x2a0] sm:$0xff]   ;;  %v6481_v7 = vld [vmem:[%s6958_s19 + $0x2a8] sm:$0xff]   ;;  %v6482_v10 = vld [vmem:[%s6958_s19 + $0x270] sm:$0xff]  }
 0x831   : > { %5886 = vmatprep.subr.bf16.mxu0 %v6450_v17  ;;  %5908 = vmatprep.subr.bf16.mxu1 %v6451_v18  ;;  %v3666_v34 = vpack.c.bf16 %v3650_v31, %v3650_v31  ;;  %v3515_v17 = vadd.f32 %v7380_v44, %v3108_v9  ;;  %v6485_v18 = vld [vmem:[%s6958_s19 + $0x2b0] sm:$0xff]   ;;  %v6489_v44 = vld [vmem:[%s6958_s19 + $0x2b8] sm:$0xff]   ;;  %v6491_v23 = vld [vmem:[%s6958_s19 + $0x3c0] sm:$0xff]  }
 0x832   : > { %v6492_v4 = vld [vmem:[%s6958_s19 + $0x300] sm:$0xff]   ;;  %v6496_v31 = vld [vmem:[%s6958_s19 + $0x308] sm:$0xff]  }
 0x833   : > { %v3652_v58 = vmax.f32 %v3515_v17, 0.0 }
 0x834   : > { %5887 = vmatpush3.bf16.msra.mxu0 %v6452_v36  ;;  %5909 = vmatpush3.bf16.msra.mxu1 %v6453_v41  ;;  %v3640_v36 = vadd.f32 %v7401_v5, %v3136_v14  ;;  %v6490_v41 = vld [vmem:[%s6958_s19 + $0x340] sm:$0xff]  }
 0x835   : > { %5888 = vmatprep.subr.bf16.mxu0 %v6454_v24  ;;  %5910 = vmatprep.subr.bf16.mxu1 %v6455_v42  ;;  %v3657_v24 = vmax.f32 %v3599_v57, 0.0  ;;  %v3668_v5 = vpack.c.bf16 %v3652_v58, %v3652_v58 }
 0x836   : > { %v3659_v42 = vmax.f32 %v3640_v36, 0.0 }
 0x838   : > { %5889 = vmatpush3.bf16.msra.mxu0 %v6456_v37  ;;  %5911 = vmatpush3.bf16.msra.mxu1 %v6457_v28  ;;  %v6494_v37 = vld [vmem:[%s6958_s19 + $0x348] sm:$0xff]   ;;  %v3673_v28 = vpack.c.bf16 %v3657_v24, %v3657_v24  ;;  %v3675_v29 = vpack.c.bf16 %v3659_v42, %v3659_v42 }
 0x839   : > { %5918 = vmatprep.subr.bf16.mxu0 %v6458_v11  ;;  %5940 = vmatprep.subr.bf16.mxu1 %v6459_v13  ;;  %v6497_v11 = vld [vmem:[%s6958_s19 + $0x388] sm:$0xff]   ;;  %v6498_v13 = vld [vmem:[%s6958_s19 + $0x350] sm:$0xff]  }
 0x83b   : > { %4820 = vmatmul.mubr.bf16.vlgmr.msra.gmra.mrb[44].mxu0 %v3664_v30  ;;  %4860 = vmatmul.mubr.bf16.vlgmr.msra.gmra.mrb[44].mxu1 %v3666_v34  ;;  %v6502_v30 = vld [vmem:[%s6958_s19 + $0x358] sm:$0xff]  }
 0x83c   : > { %5919 = vmatpush3.bf16.msra.mxu0 %v6460_v33  ;;  %4899 = vmatprep.mubr.bf16.mxu0 %v3669_v43  ;;  %v6501_v33 = vld [vmem:[%s6958_s19 + $0x390] sm:$0xff]   ;;  %v6503_v34 = vld [vmem:[%s6958_s19 + $0x3d8] sm:$0xff]  }
 0x83d   : > { %5941 = vmatpush3.bf16.msra.mxu1 %v6461_v35  ;;  %4939 = vmatprep.mubr.bf16.mxu1 %v3671_v47  ;;  %v6504_v35 = vld [vmem:[%s6958_s19 + $0x318] sm:$0xff]   ;;  %v6508_v47 = vld [vmem:[%s6958_s19 + $0x320] sm:$0xff]  }
 0x83e   : > { %5920 = vmatprep.subr.bf16.mxu0 %v6462_v45  ;;  %5942 = vmatprep.subr.bf16.mxu1 %v6463_v46  ;;  %v6505_v43 = vld [vmem:[%s6958_s19 + $0x398] sm:$0xff]   ;;  %v6506_v45 = vld [vmem:[%s6958_s19 + $0x360] sm:$0xff]  }
 0x83f   : > { %v6507_v46 = vld [vmem:[%s6958_s19 + $0x3e0] sm:$0xff]  }
 0x840   : > { %5921 = vmatpush3.bf16.msra.mxu0 %v6464_v48  ;;  %v6509_v48 = vld [vmem:[%s6958_s19 + $0x3a0] sm:$0xff]  }
 0x841   : > { %5943 = vmatpush3.bf16.msra.mxu1 %v6465_v49  ;;  %5922 = vmatprep.subr.bf16.mxu0 %v6466_v50  ;;  %v6510_v49 = vld [vmem:[%s6958_s19 + $0x368] sm:$0xff]  }
 0x842   : > { %5944 = vmatprep.subr.bf16.mxu1 %v6467_v51  ;;  %v6511_v50 = vld [vmem:[%s6958_s19 + $0x3e8] sm:$0xff]  }
 0x843   : > { %v6512_v51 = vld [vmem:[%s6958_s19 + $0x328] sm:$0xff]  }
 0x844   : > { %5923 = vmatpush3.bf16.msra.mxu0 %v6468_v52  ;;  %v6513_v52 = vld [vmem:[%s6958_s19 + $0x3a8] sm:$0xff]  }
 0x845   : > { %5945 = vmatpush3.bf16.msra.mxu1 %v6469_v53  ;;  %5924 = vmatprep.subr.bf16.mxu0 %v6470_v54  ;;  %v6514_v53 = vld [vmem:[%s6958_s19 + $0x370] sm:$0xff]  }
 0x846   : > { %5946 = vmatprep.subr.bf16.mxu1 %v6471_v55  ;;  %v6515_v54 = vld [vmem:[%s6958_s19 + $0x3f0] sm:$0xff]  }
 0x847   : > { %v6516_v55 = vld [vmem:[%s6958_s19 + $0x330] sm:$0xff]  }
 0x848   : > { %5925 = vmatpush3.bf16.msra.mxu0 %v6472_v56  ;;  %v6517_v56 = vld [vmem:[%s6958_s19 + $0x3b0] sm:$0xff]  }
 0x849   : > { %5947 = vmatpush3.bf16.msra.mxu1 %v6473_v59  ;;  %5926 = vmatprep.subr.bf16.mxu0 %v6474_v60  ;;  %v6518_v59 = vld [vmem:[%s6958_s19 + $0x378] sm:$0xff]  }
 0x84a   : > { %5948 = vmatprep.subr.bf16.mxu1 %v6475_v61  ;;  %v6519_v60 = vld [vmem:[%s6958_s19 + $0x3f8] sm:$0xff]  }
 0x84b   : > { %v6520_v61 = vld [vmem:[%s6958_s19 + $0x338] sm:$0xff]  }
 0x84c   : > { %5927 = vmatpush3.bf16.msra.mxu0 %v6476_v62  ;;  %v3656_v62 = vmax.f32 %v7394_v2, 0.0 }
 0x84d   : > { %5949 = vmatpush3.bf16.msra.mxu1 %v6477_v63  ;;  %5928 = vmatprep.subr.bf16.mxu0 %v6478_v0  ;;  %v6521_v63 = vld [vmem:[%s6958_s19 + $0x3b8] sm:$0xff]   ;;  %v3658_v0 = vmax.f32 %v7397_v3, 0.0 }
 0x84e   : > { %5950 = vmatprep.subr.bf16.mxu1 %v6479_v1  ;;  %v3672_v1 = vpack.c.bf16 %v3656_v62, %v3656_v62 }
 0x850   : > { %5929 = vmatpush3.bf16.msra.mxu0 %v6480_v6  ;;  %v3674_v6 = vpack.c.bf16 %v3658_v0, %v3658_v0 }
 0x851   : > { %5951 = vmatpush3.bf16.msra.mxu1 %v6481_v7  ;;  %5930 = vmatprep.subr.bf16.mxu0 %v6482_v10  ;;  %v5593_v10 = vld [vmem:[%s953_s21] ss:$0 sm:$0xff] }
 0x852   : > { %5952 = vmatprep.subr.bf16.mxu1 %v6483_v8 }
 0x854   : > { %5931 = vmatpush3.bf16.msra.mxu0 %v6484_v15 }
 0x855   : > { %5953 = vmatpush3.bf16.msra.mxu1 %v6485_v18  ;;  %5932 = vmatprep.subr.bf16.mxu0 %v6486_v19 }
 0x856   : > { %5954 = vmatprep.subr.bf16.mxu1 %v6487_v20 }
 0x858   : > { %5933 = vmatpush3.bf16.msra.mxu0 %v6488_v38 }
 0x859   : > { %5955 = vmatpush3.bf16.msra.mxu1 %v6489_v44  ;;  %5962 = vmatprep.subr.bf16.mxu0 %v6490_v41 }
 0x85a   : > { %5984 = vmatprep.subr.bf16.mxu1 %v6491_v23 }
 0x85b   : > { %4900 = vmatmul.mubr.bf16.vlgmr.msra.gmra.mrb[48].mxu0 %v3668_v5 }
 0x85c   : > { %4940 = vmatmul.mubr.bf16.vlgmr.msra.gmra.mrb[48].mxu1 %v3670_v27  ;;  %5963 = vmatpush3.bf16.msra.mxu0 %v6492_v4 }
 0x85d   : > { %4979 = vmatprep.mubr.bf16.mxu0 %v3673_v28  ;;  %5985 = vmatpush3.bf16.msra.mxu1 %v6493_v25 }
 0x85e   : > { %5019 = vmatprep.mubr.bf16.mxu1 %v3675_v29  ;;  %5964 = vmatprep.subr.bf16.mxu0 %v6494_v37 }
 0x85f   : > { %5986 = vmatprep.subr.bf16.mxu1 %v6495_v40 }
 0x860   : > { %5965 = vmatpush3.bf16.msra.mxu0 %v6496_v31 }
 0x861   : > { %5987 = vmatpush3.bf16.msra.mxu1 %v6497_v11  ;;  %5966 = vmatprep.subr.bf16.mxu0 %v6498_v13 }
 0x862   : > { %5988 = vmatprep.subr.bf16.mxu1 %v6499_v22 }
 0x864   : > { %5967 = vmatpush3.bf16.msra.mxu0 %v6500_v32 }
 0x865   : > { %5989 = vmatpush3.bf16.msra.mxu1 %v6501_v33  ;;  %5968 = vmatprep.subr.bf16.mxu0 %v6502_v30 }
 0x866   : > { %5990 = vmatprep.subr.bf16.mxu1 %v6503_v34 }
 0x868   : > { %5969 = vmatpush3.bf16.msra.mxu0 %v6504_v35 }
 0x869   : > { %5991 = vmatpush3.bf16.msra.mxu1 %v6505_v43  ;;  %5970 = vmatprep.subr.bf16.mxu0 %v6506_v45 }
 0x86a   : > { %5992 = vmatprep.subr.bf16.mxu1 %v6507_v46 }
 0x86c   : > { %5971 = vmatpush3.bf16.msra.mxu0 %v6508_v47 }
 0x86d   : > { %5993 = vmatpush3.bf16.msra.mxu1 %v6509_v48  ;;  %5972 = vmatprep.subr.bf16.mxu0 %v6510_v49 }
 0x86e   : > { %5994 = vmatprep.subr.bf16.mxu1 %v6511_v50 }
 0x870   : > { %5973 = vmatpush3.bf16.msra.mxu0 %v6512_v51 }
 0x871   : > { %5995 = vmatpush3.bf16.msra.mxu1 %v6513_v52  ;;  %5974 = vmatprep.subr.bf16.mxu0 %v6514_v53 }
 0x872   : > { %5996 = vmatprep.subr.bf16.mxu1 %v6515_v54 }
 0x874   : > { %5975 = vmatpush3.bf16.msra.mxu0 %v6516_v55 }
 0x875   : > { %5997 = vmatpush3.bf16.msra.mxu1 %v6517_v56  ;;  %5976 = vmatprep.subr.bf16.mxu0 %v6518_v59 }
 0x876   : > { %5998 = vmatprep.subr.bf16.mxu1 %v6519_v60 }
 0x878   : > { %5977 = vmatpush3.bf16.msra.mxu0 %v6520_v61 }
 0x879   : > { %5999 = vmatpush3.bf16.msra.mxu1 %v6521_v63 }
 0x87b   : > { %4980 = vmatmul.mubr.bf16.vlgmr.msra.gmra.mrb[52].mxu0 %v3672_v1 }
 0x87c   : > { %5020 = vmatmul.mubr.bf16.vlgmr.msra.gmra.mrb[52].mxu1 %v3674_v6 }
 0x8ee   : > { %v5846_v9 = vpop.f32.mrb[40].mxu0  ;;  %v5868_v7 = vpop.f32.mrb[40].mxu1 }
 0x8ef   : > { %v5847_v2 = vpop.f32.mrb[41].mxu0  ;;  %v5869_v8 = vpop.f32.mrb[41].mxu1 }
 0x8f0   : > { %v5848_v39 = vadd.f32 %v5847_v2, %v5846_v9  ;;  %v5870_v14 = vadd.f32 %v5869_v8, %v5868_v7  ;;  %v5849_v15 = vpop.f32.mrb[42].mxu0  ;;  %v5871_v3 = vpop.f32.mrb[42].mxu1  ;;  %v5723_v9 = vld [vmem:[%s959_s18] ss:$0 sm:$0xff]  ;;  %v6684_v8 = vmov (!%p5724_p2), 0.0  }
 0x8f1   : > { %v5850_v17 = vpop.f32.mrb[43].mxu0  ;;  %v5872_v18 = vpop.f32.mrb[43].mxu1  ;;  %v5062_v2 = vld [vmem:[%s7723_s26] sm:$0x1] (!%p5724_p2)  ;;  %6219 = vmatprep.subr.mxu0 (!%p5724_p2), %v6684_v8  ;;  %6221 = vmatprep.mubr.msk.f32.mxu0 (!%p5724_p2), %vm6685_vm7, %v6684_v8 }
 0x8f2   : > { %v4742_v19 = vadd.f32 %v5848_v39, %v5593_v10  ;;  %vm5063_vm8 = vcmp.lt.f32.partialorder (!%p5724_p2), %v5062_v2, -0.5  ;;  %v6686_v39 = vmov (!%p5724_p2), 1.0  }
 0x8f4   : > { %v4782_v20 = vadd.f32 %v5870_v14, %v4742_v19  ;;  %v5064_v14 = vsel (!%p5724_p2), %vm5063_vm8, 0.0, %v6686_v39 }
 0x8f5   : > { %v5139_v15 = vsel (!%p5724_p2), %vm5138_vm6, %v5064_v14, 0.0 }
 0x90e   : > { %v5890_v57 = vpop.f32.mrb[44].mxu0  ;;  %v5912_v36 = vpop.f32.mrb[44].mxu1 }
 0x90f   : > { %v5891_v38 = vpop.f32.mrb[45].mxu0  ;;  %v5913_v58 = vpop.f32.mrb[45].mxu1 }
 0x910   : > { %v5892_v44 = vadd.f32 %v5891_v38, %v5890_v57  ;;  %v5914_v41 = vadd.f32 %v5913_v58, %v5912_v36  ;;  %v5893_v21 = vpop.f32.mrb[46].mxu0  ;;  %v5915_v23 = vpop.f32.mrb[46].mxu1 }
 0x911   : > { %v5894_v24 = vpop.f32.mrb[47].mxu0  ;;  %v5916_v42 = vpop.f32.mrb[47].mxu1 }
 0x912   : > { %v4822_v4 = vadd.f32 %v5892_v44, %v4782_v20 }
 0x914   : > { %v4862_v5 = vadd.f32 %v5914_v41, %v4822_v4 }
 0x92e   : > { %v5934_v25 = vpop.f32.mrb[48].mxu0 }
 0x92f   : > { %v5956_v27 = vpop.f32.mrb[48].mxu1  ;;  %v5935_v37 = vpop.f32.mrb[49].mxu0 }
 0x930   : > { %v5936_v28 = vadd.f32 %v5935_v37, %v5934_v25  ;;  %v5957_v40 = vpop.f32.mrb[49].mxu1  ;;  %v5937_v29 = vpop.f32.mrb[50].mxu0 }
 0x931   : > { %v5958_v31 = vadd.f32 %v5957_v40, %v5956_v27  ;;  %v5959_v11 = vpop.f32.mrb[50].mxu1  ;;  %v5938_v13 = vpop.f32.mrb[51].mxu0 }
 0x932   : > { %v4902_v22 = vadd.f32 %v5936_v28, %v4862_v5  ;;  %v5960_v32 = vpop.f32.mrb[51].mxu1 }
 0x934   : > { %v4942_v33 = vadd.f32 %v5958_v31, %v4902_v22 }
 0x94e   : > { %v5978_v30 = vpop.f32.mrb[52].mxu0 }
 0x94f   : > { %v6000_v34 = vpop.f32.mrb[52].mxu1  ;;  %v5979_v35 = vpop.f32.mrb[53].mxu0 }
 0x950   : > { %v5980_v43 = vadd.f32 %v5979_v35, %v5978_v30  ;;  %v6001_v45 = vpop.f32.mrb[53].mxu1  ;;  %v5981_v46 = vpop.f32.mrb[54].mxu0 }
 0x951   : > { %v6002_v47 = vadd.f32 %v6001_v45, %v6000_v34  ;;  %v6003_v48 = vpop.f32.mrb[54].mxu1  ;;  %v5982_v49 = vpop.f32.mrb[55].mxu0 }
 0x952   : > { %v4982_v50 = vadd.f32 %v5980_v43, %v4942_v33  ;;  %v6004_v51 = vpop.f32.mrb[55].mxu1 }
 0x954   : > { %v5022_v52 = vadd.f32 %v6002_v47, %v4982_v50 }
 0x956   : > { %v5027_v53 = vadd.f32 %v5022_v52, %v7253_v26  ;;  %v5722_v26 = vld [vmem:[%s956_s24] ss:$0 sm:$0xff] }
 0x958   : > { %v5030_v54 = vsel %vm1102_vm4, %v5027_v53, 0.0 }
 0x959   : > { %5031 = vadd.xlane.f32.xlu0 %v5030_v54 }
 0x95d   : > { %5140 = vadd.xlane.f32.xlu0 (!%p5724_p2), %v5139_v15 }
 0x9e6   : > { %v5032_v55 = vpop.xlane.xlu0 %5031 }
 0x9e7   : > { %v5033_v56 = vmul.f32 0.03125, %v5032_v55 }
 0x9e9   : > { %v5034_v59 = vsub.f32 %v5027_v53, %v5033_v56 }
 0x9ea   : > { %v5141_v18 = vpop.xlane.xlu0 (!%p5724_p2), %5140 }
 0x9eb   : > { %v5035_v60 = vmul.f32 %v5034_v59, %v5034_v59  ;;  %v5142_v19 = vmax.f32 (!%p5724_p2), %v5141_v18, 1.0 }
 0x9ed   : > { %v5036_v61 = vsel %vm1102_vm4, %v5035_v60, 0.0 }
 0x9ee   : > { %5037 = vadd.xlane.f32.xlu1 %v5036_v61 }
 0xa7b   : > { %v5038_v62 = vpop.xlane.xlu1 %5037 }
 0xa7c   : > { %v5039_v63 = vmul.f32 0.03125, %v5038_v62 }
 0xa7e   : > { %v5040_v0 = vadd.f32 1e-05, %v5039_v63 }
 0xa80   : > { %6540 = vrsqrt.f32 %v5040_v0 }
 0xa81   : > { %6543 = vrcp.f32 (!%p5724_p2), %v5142_v19 }
 0xa8a   : > { %v6541_v1 = vpop.eup %6540 }
 0xa8b   : > { %v5042_v6 = vmul.f32 %v6541_v1, %v5034_v59  ;;  %5061 = sbr.rel (%p5724_p2) target bundleno = 3084 (0xc0c), region = 108  ;;  %v6544_v20 = vpop.eup (!%p5724_p2), %6543 }
 0xa8d   : > { %v5049_v7 = vmul.f32 %v5722_v26, %v5042_v6 }
 0xa8f   : > { %v5056_v10 = vadd.f32 %v5723_v9, %v5049_v7 }
 0xa91   : > { %5057 = vst.msk [vmem:[#allocation2] sm:$0xff] %vm1102_vm4, %v5056_v10  ;;  %6220 = vmatpush3.msra.mxu0 (!%p5724_p2), %v5056_v10  ;;  %v5153_v3 = vmul.f32 (!%p5724_p2), %v5056_v10, %v5056_v10 }
 0xa92   : > { %6222 = vmatmul.mubr.msk.f32.vlgmr.msra.gmra.mrb[0].mxu0 %vm2034_vm5, %v5064_v14 }
 0xa93   : > { %v5154_v17 = vsel %vm1102_vm4, %v5153_v3, 0.0 }
 0xa94   : > { %5155 = vadd.xlane.f32.xlu1 %v5154_v17 }
 0xb21   : > { %v5156_v41 = vpop.xlane.xlu1 %5155 }
 0xb22   : > { %v5157_v21 = vmax.f32 %v5156_v41, 1e-24 }
 0xb24   : > { %6545 = vrsqrt.f32 %v5157_v21 }
 0xb2e   : > { %v6546_v42 = vpop.eup %6545 }
 0xb2f   : > { %v5159_v25 = vmul.f32 %v6546_v42, %v5056_v10 }
 0xb65   : > { %v5134_v57 = vpop.f32.mrb[0].mxu0 }
 0xb66   : > { %v5144_v36 = vmul.f32 %v6544_v20, %v5134_v57  ;;  %v6223_v38 = vpop.f32.mrb[1].mxu0 }
 0xb68   : > { %v5145_v58 = vmul.f32 %v5144_v36, %v5144_v36 }
 0xb6a   : > { %v5147_v44 = vsel %vm5146_vm9, %v5145_v58, 0.0 }
 0xb6b   : > { %5148 = vadd.xlane.f32.xlu0 %v5147_v44 }
 0xbf8   : > { %v5149_v23 = vpop.xlane.xlu0 %5148 }
 0xbf9   : > { %v5150_v24 = vmax.f32 %v5149_v23, 1e-24 }
 0xbfb   : > { %6547 = vrsqrt.f32 %v5150_v24 }
 0xc05   : > { %v6548_v4 = vpop.eup %6547 }
 0xc06   : > { %v5152_v5 = vmul.f32 %v6548_v4, %v5144_v36 }
 0xc08   : > { %5171 = vst.msk [vmem:[%s888_s15] sm:$0x1] %vm5146_vm9, %v5152_v5  ;;  %v5168_v27 = vrot.slane %v5152_v5, %v7171_v16 }
 0xc0a   : > { %v5169_v37 = vsel %vm5162_vm10, %v5168_v27, %v5159_v25 }
 0xc0b   : > { %5170 = vst.msk [vmem:[%s6970_s2] sm:$0xff] %vm1102_vm4, %v5169_v37 }
 0xc0c PF: > { %s7724_s1 = sld [smem:[#allocation13_spill]]  ;;  %s7726_s27 = sld [smem:[#allocation43_spill]] }
 0xc0d   : > { %s5190_s23 = sshll.u32 %s6970_s2, 4  ;;  %s5173_s28 = scalar_lea.sflag [#allocation4], %s6869_s30  ;;  %s5191_s23 = int_to_ptr.vmem [resolvable:$true] %s5190_s23 }
 0xc0e   : > { %s6549_s4 = scalar_lea.vmem %s5191_s23, 128  ;;  %s6687_s10 = smov [#allocation3]  }
 0xc0f   : > { %p6550_p4 = scmp.ne.s32.totalorder %s5191_s23, %s6549_s4  ;;  %s6553_s3 = sshll.u32 %s6687_s10, 4  ;;  %s6554_s3 = int_to_ptr.vmem [resolvable:$false] %s6553_s3 }
 0xc10   : > { %s6555_s6 = scalar_lea.vmem %s6554_s3, 256  ;;  %p6556_p7 = scmp.lt.s32.totalorder %s5191_s23, %s6554_s3 }
 0xc11   : > { %p6551_p5 = pnand %p6550_p4, %p6848_p3  ;;  %p6557_p8 = scmp.lt.s32.totalorder %s6555_s6, %s6549_s4 }
 0xc12   : > { %s5727_s18 = sshll.u32 %s7724_s1, 7  ;;  %s7727_s9 = smov %s7726_s27 }
 0xc13   : > { %s7536_s5 = scalar_lea.hbm %s7726_s27, %s5727_s18  ;;  %p6552_p6 = pneg %p6551_p5 }
 0xc14   : > { %p6558_p10 = por %p6557_p8, %p6556_p7 }
 0xc16   : > { %p6559_p11 = pnand %p6558_p10, %p6552_p6 }
 0xc18   : > { %6562 = shalt.err (!%p6559_p11)
}
 0xc19   : > { %s6563_s2 = scalar_lea.hbm %s7536_s5, 128  ;;  %s6567_s21 = scalar_lea.hbm %s7727_s9, 256 }
 0xc1a   : > { %p6564_p12 = scmp.ne.s32.totalorder %s7536_s5, %s6563_s2  ;;  %p6568_p1 = scmp.lt.u32.totalorder %s7536_s5, %s7727_s9 }
 0xc1b   : > { %p6569_p2 = scmp.lt.u32.totalorder %s6567_s21, %s6563_s2  ;;  %p6571_p5 = scmp.lt.u32.totalorder %s6563_s2, %s7536_s5 }
 0xc1c   : > { %p6565_p13 = pnand %p6564_p12, %p6848_p3 }
 0xc1d   : > { %p6570_p4 = por %p6569_p2, %p6568_p1 }
 0xc1e   : > { %p6566_p0 = pneg %p6565_p13 }
 0xc1f   : > { %p6572_p6 = por %p6571_p5, %p6570_p4 }
 0xc21   : > { %p6573_p7 = pnand %p6572_p6, %p6566_p0 }
 0xc23   : > { %6576 = shalt.err (!%p6573_p7)
}
 0xc24   : > { %6308 = dma.vmem_to_hbm [thread:$0]  (%p6848_p3), %s5191_s23, 128, %s7536_s5, %s5173_s28  }
 0xc25   : > { %s5728_s25 = sshll.u32 %s7724_s1, 4  ;;  %s5203_s14 = sshll.u32 %s888_s15, 4  ;;  %s5204_s14 = int_to_ptr.vmem [resolvable:$true] %s5203_s14 }
 0xc26   : > { %s7728_s18 = sld [smem:[#allocation44_spill]]  ;;  %s5178_s20 = scalar_lea.sflag [#allocation6], %s6869_s30 }
 0xc27   : > { %s6577_s27 = scalar_lea.vmem %s5204_s14, 16  ;;  %s6688_s4 = smov [#allocation5]  }
 0xc28   : > { %p6578_p8 = scmp.ne.s32.totalorder %s5204_s14, %s6577_s27  ;;  %s6581_s10 = sshll.u32 %s6688_s4, 4  ;;  %s6582_s10 = int_to_ptr.vmem [resolvable:$false] %s6581_s10 }
 0xc29   : > { %s6583_s3 = scalar_lea.vmem %s6582_s10, 32  ;;  %p6584_p12 = scmp.lt.s32.totalorder %s5204_s14, %s6582_s10 }
 0xc2a   : > { %p6579_p10 = pnand %p6578_p8, %p6848_p3  ;;  %p6585_p13 = scmp.lt.s32.totalorder %s6583_s3, %s6577_s27 }
 0xc2c   : > { %s7563_s29 = scalar_lea.hbm %s7728_s18, %s5728_s25  ;;  %p6580_p11 = pneg %p6579_p10 }
 0xc2d   : > { %p6586_p0 = por %p6585_p13, %p6584_p12 }
 0xc2f   : > { %p6587_p1 = pnand %p6586_p0, %p6580_p11 }
 0xc31   : > { %6590 = shalt.err (!%p6587_p1)
}
 0xc32   : > { %s6591_s15 = scalar_lea.hbm %s7563_s29, 16  ;;  %s6595_s5 = scalar_lea.hbm %s7728_s18, 32 }
 0xc33   : > { %p6592_p2 = scmp.ne.s32.totalorder %s7563_s29, %s6591_s15  ;;  %p6596_p6 = scmp.lt.u32.totalorder %s7563_s29, %s7728_s18 }
 0xc34   : > { %p6597_p7 = scmp.lt.u32.totalorder %s6595_s5, %s6591_s15  ;;  %p6599_p10 = scmp.lt.u32.totalorder %s6591_s15, %s7563_s29 }
 0xc35   : > { %p6593_p4 = pnand %p6592_p2, %p6848_p3 }
 0xc36   : > { %p6598_p8 = por %p6597_p7, %p6596_p6 }
 0xc37   : > { %p6594_p5 = pneg %p6593_p4 }
 0xc38   : > { %p6600_p11 = por %p6599_p10, %p6598_p8 }
 0xc3a   : > { %p6601_p12 = pnand %p6600_p11, %p6594_p5 }
 0xc3c   : > { %6604 = shalt.err (!%p6601_p12)
}
 0xc3d   : > { %6309 = dma.vmem_to_hbm [thread:$0]  (%p6848_p3), %s5204_s14, 16, %s7563_s29, %s5178_s20  }
 0xc3e PF: > { %s7729_s6 = sld [smem:[#allocation16_spill]]  ;;  %s7730_s2 = sld [smem:[#allocation9_spill]] }
 0xc44   : > { %p6319_p13 = scmp.ge.s32.totalorder %s7729_s6, 2  ;;  %s5215_s0 = sand.u32 1, %s7730_s2  }
 0xc45   : > { %s5216_s21 = scalar_lea.sflag [#allocation4], %s5215_s0 }
 0xc46   : > { %p6313_p0 = pnand %p6319_p13, %p6858_p9 }
 0xc48   : > { %6638 = dma.done.wait (!%p6313_p0), %s5216_s21, 128  }
 0xc49   : > { %6640 = vsyncadd (!%p6313_p0), %s5216_s21, 4294967168  ;;  %s5225_s19 = scalar_lea.sflag [#allocation6], %s5215_s0 }
 0xc4a   : > { %6642 = dma.done.wait (!%p6313_p0), %s5225_s19, 16  }
 0xc4b   : > { %6644 = vsyncadd (!%p6313_p0), %s5225_s19, 4294967280  ;;  %s38_s0 = sadd.s32 1, %s7729_s6   ;;  %s7732_s2 = sld [smem:[#allocation10_spill]] }
 0xc4c   : > { %p35_p1 = scmp.ge.s32.totalorder %s38_s0, 10   ;;  %s7733_s25 = sld [smem:[#allocation11_spill]] }
 0xc4d   : > { %s7734_s26 = sld [smem:[#allocation21_spill]]  ;;  %s7735_s27 = sld [smem:[#allocation14_spill]] }
 0xc4e   : > { %s7736_s3 = sld [smem:[#allocation15_spill]]  ;;  %s7737_s28 = sld [smem:[#allocation17_spill]] }
 0xc4f   : > { %s7738_s29 = sld [smem:[#allocation19_spill]]  ;;  %37 = sbr.rel (!%p35_p1) target bundleno = 26 (0x1a), region = 211 }
 0xc56   :  { %5229 = vsyncpa [#allocation4], 1 }
 0xc57   :  { %5231 = vsyncpa [#allocation4 + $0x1], 1 }
 0xc58   :  { %5232 = vsyncpa [#allocation6], 1 }
 0xc59   :  { %5234 = vsyncpa [#allocation6 + $0x1], 1 }

</bundles_post_ra>
